<compile_context>
chip_gen: v7x
topology: tpu7x:2x2x1
jax: 0.10.0
libtpu: 0.0.40
codegen_flags: <defaults>
</compile_context>

<pallas_src>
import functools

import jax
import jax.numpy as jnp
from jax.experimental import pallas as pl
from jax.experimental.pallas import tpu as pltpu

EPS_NORM = 1e-8   # clamp used by _norm_no_nan
LN_EPS = 1e-5     # torch.nn.LayerNorm default eps

USE_BF16_MXU = True   # bf16 MXU operands (f32 accumulate); norm/LN/activation math stays f32


def _round_up(x, m):
    return ((x + m - 1) // m) * m


def _tpu_vmem_capacity():
    try:
        cap = getattr(pltpu.get_tpu_info(), "vmem_capacity_bytes", None)
        return int(cap) if cap else None
    except Exception:
        return None


_VMEM_CAP = _tpu_vmem_capacity()
# scoped-VMEM budget: 3/4 of physical (~96 MiB on v5e/v6e 128-MiB parts, ~48 MiB on v7x).
_VMEM_LIMIT = (_VMEM_CAP * 3 // 4) if _VMEM_CAP else None
# smaller row tiles on 64-MiB-VMEM parts (v7x); also helps give its 2 TCs >=2 tiles.
ROW_TILE = 256 if (_VMEM_CAP is not None and _VMEM_CAP <= 64 * 1024 * 1024) else 512


def _compiler_params(dimension_semantics):
    kw = dict(dimension_semantics=dimension_semantics)
    if _VMEM_LIMIT is not None:
        kw["vmem_limit_bytes"] = _VMEM_LIMIT
    return pltpu.CompilerParams(**kw)


def _mm(x, w):
    """MXU dot: bf16 activation operand (weights are pre-cast), f32 accumulation."""
    if USE_BF16_MXU:
        x = x.astype(jnp.bfloat16)
    return jnp.dot(x, w, preferred_element_type=jnp.float32)


# ----------------------------------------------------------------------------
# Pallas kernels
# ----------------------------------------------------------------------------
def _gvp_cell_kernel(*refs, layer_meta, scalar_act, vector_act):
    """Fused GVPCell: a chain of GVP (vi>0, vo>0, vector_gate=False) + GVPLayerNorm
    layers over one row tile of lane-packed (rt, s + 3*v) slabs.

    Layer 0 consumes `layer_meta[0]` fused input slabs as if channel-concatenated
    (the concat is folded into zero-padded / split weights).  Later layers keep
    (s, v) as separate in-register arrays (no concats, no re-splits)."""
    n_in = layer_meta[0]
    in_refs = refs[:n_in]
    out_ref = refs[-1]
    params = refs[n_in:-1]

    x_list = [r[...] for r in in_refs]   # fused slabs for layer 0
    s = v = None
    idx = 0
    for li, k in enumerate(layer_meta):
        Ws_list = params[idx:idx + k]; idx += k
        Wv_list = params[idx:idx + k]; idx += k
        (ws_v_ref, ws_b_ref, wv_ref, sum3_h_ref, sum3_v_ref,
         rep3_v_ref, gamma_ref, beta_ref) = params[idx:idx + 8]; idx += 8

        if li == 0:
            vh = _mm(x_list[0], Wv_list[0][...])
            s_pre = _mm(x_list[0], Ws_list[0][...])
            for j in range(1, k):
                vh = vh + _mm(x_list[j], Wv_list[j][...])
                s_pre = s_pre + _mm(x_list[j], Ws_list[j][...])
        else:
            vh = _mm(v, Wv_list[0][...])
            s_pre = _mm(s, Ws_list[0][...])

        # _norm_no_nan over xyz of vh; lane-packed -> sum-of-squares via structural matmul
        vn = jnp.sqrt(jnp.maximum(
            jnp.dot(vh * vh, sum3_h_ref[...], preferred_element_type=jnp.float32),
            EPS_NORM))                                                      # (rt, h)

        # s = ws(cat([s_in..., vn]))  (concat folded into split matmuls)
        s = s_pre + _mm(vn, ws_v_ref[...]) + ws_b_ref[...]                  # (rt, so)
        # v = wv(vh)  (block-diag weight keeps lane packing)
        v = _mm(vh, wv_ref[...])                                            # (rt, 3*vo)

        if vector_act:  # vector_act = sigmoid, vector_gate=False path
            vno = jnp.sqrt(jnp.maximum(
                jnp.dot(v * v, sum3_v_ref[...], preferred_element_type=jnp.float32),
                EPS_NORM))                                                  # (rt, vo)
            gate = jax.nn.sigmoid(vno)
            v = v * jnp.dot(gate, rep3_v_ref[...], preferred_element_type=jnp.float32)
        if scalar_act:  # scalar_act = relu6
            s = jnp.clip(s, 0.0, 6.0)

        # ---- GVPLayerNorm (dropout is identity in eval mode) ----
        vsq = jnp.maximum(
            jnp.dot(v * v, sum3_v_ref[...], preferred_element_type=jnp.float32),
            EPS_NORM)                                                       # (rt, vo)
        v = v * jax.lax.rsqrt(jnp.mean(vsq, axis=-1, keepdims=True))
        mu = jnp.mean(s, axis=-1, keepdims=True)
        var = jnp.mean(jnp.square(s - mu), axis=-1, keepdims=True)
        s = (s - mu) * jax.lax.rsqrt(var + LN_EPS) * gamma_ref[...] + beta_ref[...]

    out_ref[...] = jnp.concatenate([s, v], axis=-1)   # one fused lane-dense store


def _aggregate_kernel(dst_ref, invdeg_ref, msg_ref, node_ref, out_ref, acc_ref, *, so):
    """DGL update_all: mean(msg_s) / sum(msg_v) per dst node, residual add fused.
    Grid = (node tiles [parallel], edge tiles [arbitrary reduction]).  The one-hot
    destination tile is built in-kernel from the dst-id vector (no dense HBM adjacency)."""
    ke = pl.program_id(1)
    nt, W = acc_ref.shape
    et = dst_ref.shape[1]

    @pl.when(ke == 0)
    def _():
        acc_ref[...] = jnp.zeros_like(acc_ref)

    row_ids = pl.program_id(0) * nt + jax.lax.broadcasted_iota(jnp.int32, (nt, et), 0)
    onehot = (row_ids == dst_ref[...]).astype(
        jnp.bfloat16 if USE_BF16_MXU else jnp.float32)        # padded dst = -1 -> all zero
    msg = msg_ref[...]
    if USE_BF16_MXU:
        msg = msg.astype(jnp.bfloat16)
    acc_ref[...] += jnp.dot(onehot, msg, preferred_element_type=jnp.float32)

    @pl.when(ke == pl.num_programs(1) - 1)
    def _():
        # scalar lanes (< so): mean (scale by 1/deg); vector lanes: sum.  Residual fused.
        lane = jax.lax.broadcasted_iota(jnp.int32, (nt, W), 1)
        scale = jnp.where(lane < so, invdeg_ref[...], 1.0)
        out_ref[...] = node_ref[...] + scale * acc_ref[...]


# ----------------------------------------------------------------------------
# pallas_call wrappers
# ----------------------------------------------------------------------------
def gvp_cell_apply(inputs, in_dims_list, layers, scalar_act, vector_act, row_tile):
    """Run a whole GVPCell as one pallas_call tiled over (pre-padded) rows.

    `inputs` is a list of fused (R_pad, si_j + 3*vi_j) f32 slabs that the first GVP
    layer consumes as if channel-concatenated."""
    n_in = len(inputs)
    R_pad = inputs[0].shape[0]
    assert R_pad % row_tile == 0
    so = layers[-1]["gamma"].shape[1]
    vo = layers[-1]["wv"].shape[1]
    w_out = so + 3 * vo

    wdt = jnp.bfloat16 if USE_BF16_MXU else jnp.float32   # weights pre-cast ONCE per call
    eye3 = jnp.eye(3, dtype=jnp.float32)

    flat_params, layer_meta = [], []
    for li, lp in enumerate(layers):
        wh, ws_s, ws_v, ws_b, wv = lp["wh"], lp["ws_s"], lp["ws_v"], lp["ws_b"], lp["wv"]
        h = wh.shape[1]
        if li == 0:
            k = n_in
            Ws_list, Wv_list = [], []
            s_off = v_off = 0
            for (si_j, vi_j) in in_dims_list:            # torch cat order: [node, edge]
                ws_j = ws_s[s_off:s_off + si_j]; s_off += si_j
                wh_j = wh[v_off:v_off + vi_j]; v_off += vi_j
                Ws_list.append(jnp.concatenate(
                    [ws_j, jnp.zeros((3 * vi_j, so), jnp.float32)], axis=0).astype(wdt))
                Wv_list.append(jnp.concatenate(
                    [jnp.zeros((si_j, 3 * h), jnp.float32),
                     jnp.kron(eye3, wh_j)], axis=0).astype(wdt))
            assert s_off == ws_s.shape[0] and v_off == wh.shape[0]
        else:
            k = 1
            Ws_list = [ws_s.astype(wdt)]
            Wv_list = [jnp.kron(eye3, wh).astype(wdt)]
        layer_meta.append(k)
        # structural matrices (0/1): xyz sum-of-squares reduction and gate lane-replication
        sum3_h = jnp.tile(jnp.eye(h, dtype=jnp.float32), (3, 1))     # (3h, h)
        sum3_v = jnp.tile(jnp.eye(vo, dtype=jnp.float32), (3, 1))    # (3vo, vo)
        rep3_v = jnp.tile(jnp.eye(vo, dtype=jnp.float32), (1, 3))    # (vo, 3vo)
        flat_params += (Ws_list + Wv_list
                        + [ws_v.astype(wdt), ws_b, jnp.kron(eye3, wv).astype(wdt),
                           sum3_h, sum3_v, rep3_v, lp["gamma"], lp["beta"]])

    grid = (R_pad // row_tile,)
    in_specs = ([pl.BlockSpec((row_tile, x.shape[1]), lambda i: (i, 0)) for x in inputs]
                + [pl.BlockSpec(p.shape, lambda i: (0, 0)) for p in flat_params])
    out_specs = pl.BlockSpec((row_tile, w_out), lambda i: (i, 0))

    kernel = functools.partial(_gvp_cell_kernel, layer_meta=tuple(layer_meta),
                               scalar_act=scalar_act, vector_act=vector_act)
    return pl.pallas_call(
        kernel,
        out_shape=jax.ShapeDtypeStruct((R_pad, w_out), jnp.float32),
        grid=grid,
        in_specs=in_specs,
        out_specs=out_specs,
        compiler_params=_compiler_params(("parallel",)),
    )(*inputs, *flat_params)


def aggregate(dst_row, inv_deg, msg, node_x, so, node_tile, edge_tile):
    """Fused scalar+vector neighborhood aggregation with residual add."""
    N_pad, W = node_x.shape
    E_pad = msg.shape[0]
    grid = (N_pad // node_tile, E_pad // edge_tile)
    return pl.pallas_call(
        functools.partial(_aggregate_kernel, so=so),
        out_shape=jax.ShapeDtypeStruct((N_pad, W), jnp.float32),
        grid=grid,
        in_specs=[
            pl.BlockSpec((1, edge_tile), lambda i, k: (0, k)),       # dst ids (int32)
            pl.BlockSpec((node_tile, 1), lambda i, k: (i, 0)),       # 1/deg
            pl.BlockSpec((edge_tile, W), lambda i, k: (k, 0)),       # fused messages
            pl.BlockSpec((node_tile, W), lambda i, k: (i, 0)),       # fused node residual
        ],
        out_specs=pl.BlockSpec((node_tile, W), lambda i, k: (i, 0)),
        scratch_shapes=[pltpu.VMEM((node_tile, W), jnp.float32)],
        compiler_params=_compiler_params(("parallel", "arbitrary")),
    )(dst_row, inv_deg, msg, node_x)


# ----------------------------------------------------------------------------
# Model glue (plain JAX): layout pack/unpack, GVPConv / GVPGNN
# ----------------------------------------------------------------------------
def _pack_sv(s, v):
    """(R, si), (3, R, vi) -> fused (R, si + 3*vi) lane layout [s | vx | vy | vz]."""
    return jnp.concatenate([s, v[0], v[1], v[2]], axis=-1).astype(jnp.float32)


def _unpack_sv(x, so, vo):
    s = x[:, :so]
    v = jnp.stack([x[:, so:so + vo], x[:, so + vo:so + 2 * vo],
                   x[:, so + 2 * vo:so + 3 * vo]], axis=0)
    return s, v


def _pad_rows(x, rows):
    return jnp.pad(x, ((0, rows - x.shape[0]), (0, 0))) if rows != x.shape[0] else x


def gvpgnn_forward(dst, node_feats, edge_feats, params):
    ns, nv = node_feats          # (N, si), (3, N, vi)
    es, ev = edge_feats
    N, E = ns.shape[0], es.shape[0]
    node_in = (ns.shape[1], nv.shape[2])
    edge_in = (es.shape[1], ev.shape[2])
    node_out = (params["n_proj"][-1]["gamma"].shape[1], params["n_proj"][-1]["wv"].shape[1])
    edge_out = (params["e_proj"][-1]["gamma"].shape[1], params["e_proj"][-1]["wv"].shape[1])

    # --- hoisted padding / layout packing: done ONCE per forward, sliced once at the end
    rt_n = min(ROW_TILE, _round_up(N, 8)); n_pad = _round_up(N, rt_n)
    rt_e = min(ROW_TILE, _round_up(E, 8)); e_pad = _round_up(E, rt_e)

    node_x = _pad_rows(_pack_sv(ns, nv), n_pad)
    edge_x = _pad_rows(_pack_sv(es, ev), e_pad)

    dst = dst.astype(jnp.int32)
    dst_pad = jnp.pad(dst, (0, e_pad - E), constant_values=-1)   # -1 matches no node
    dst_gather = jnp.maximum(dst_pad, 0)
    dst_row = dst_pad.reshape(1, e_pad)
    deg = jnp.zeros((n_pad,), jnp.float32).at[dst].add(1.0)
    inv_deg = (1.0 / jnp.maximum(deg, 1.0)).reshape(n_pad, 1)    # mean-of-empty == 0 (DGL)

    # n_proj / e_proj: GVPCell(num_layers=1, activations=(None, None))
    node_x = gvp_cell_apply([node_x], [node_in], params["n_proj"], False, False, rt_n)
    edge_x = gvp_cell_apply([edge_x], [edge_in], params["e_proj"], False, False, rt_e)

    for conv in params["gconvs"]:
        # e_gvp on edge features (relu6 / sigmoid activations)
        edge_x = gvp_cell_apply([edge_x], [edge_out], conv["e_gvp"], True, True, rt_e)
        # message = n_conv(cat([dst node feats, edge feats])); the gather is plain-JAX
        # and row-contiguous on the fused layout; the concat is folded into split weights.
        dst_x = node_x[dst_gather]                                # (E_pad, so_n + 3*vo_n)
        msg = gvp_cell_apply([dst_x, edge_x], [node_out, edge_out], conv["n_conv"],
                             True, True, rt_e)
        # update_all: mean(msg_s) / sum(msg_v) per dst node + residual, one kernel
        node_x = aggregate(dst_row, inv_deg, msg, node_x, node_out[0], rt_n, rt_e)

    out_ns, out_nv = _unpack_sv(node_x[:N], *node_out)
    out_es, out_ev = _unpack_sv(edge_x[:E], *edge_out)
    return (out_ns, out_nv), (out_es, out_ev)


# ----------------------------------------------------------------------------
# Deterministic parameter initialization (torch-like layouts, transposed to x @ W)
# ----------------------------------------------------------------------------
def _init_linear(key, fan_in, fan_out, bias=True):
    k1, k2 = jax.random.split(key)
    bound = 1.0 / (fan_in ** 0.5)
    w = jax.random.uniform(k1, (fan_in, fan_out), jnp.float32, -bound, bound)
    b = (jax.random.uniform(k2, (1, fan_out), jnp.float32, -bound, bound)
         if bias else None)
    return w, b


def _init_gvp_ln_layer(key, in_dims, out_dims):
    si, vi = in_dims
    so, vo = out_dims
    h = max(vi, vo)                      # GVP default h_dim
    k = jax.random.split(key, 3)
    wh, _ = _init_linear(k[0], vi, h, bias=False)
    ws_w, ws_b = _init_linear(k[1], si + h, so, bias=True)
    wv, _ = _init_linear(k[2], h, vo, bias=False)
    return dict(
        wh=wh, ws_s=ws_w[:si], ws_v=ws_w[si:], ws_b=ws_b, wv=wv,
        gamma=jnp.ones((1, so), jnp.float32),
        beta=jnp.zeros((1, so), jnp.float32),
    )


def _init_gvp_cell(key, in_dims, out_dims, num_layers):
    keys = jax.random.split(key, num_layers)
    layers = [_init_gvp_ln_layer(keys[0], in_dims, out_dims)]
    for i in range(1, num_layers):
        layers.append(_init_gvp_ln_layer(keys[i], out_dims, out_dims))
    return layers


def init_gvpgnn(key, node_in, node_out, edge_in, edge_out, num_mp_layers, num_layers):
    k = jax.random.split(key, 2 + num_mp_layers)
    params = {
        "n_proj": _init_gvp_cell(k[0], node_in, node_out, 1),
        "e_proj": _init_gvp_cell(k[1], edge_in, edge_out, 1),
        "gconvs": [],
    }
    n_sc, n_vc = node_out
    e_sc, e_vc = edge_out
    conv_in = (n_sc + e_sc, n_vc + e_vc)
    for i in range(num_mp_layers):
        kk = jax.random.split(k[2 + i], 2)
        params["gconvs"].append(dict(
            e_gvp=_init_gvp_cell(kk[0], edge_out, edge_out, num_layers),
            n_conv=_init_gvp_cell(kk[1], conv_in, node_out, num_layers),
        ))
    return params


# ----------------------------------------------------------------------------
if __name__ == "__main__":
    key = jax.random.PRNGKey(0)
    N, E = 8, 16
    node_in_dims, node_out_dims = (6, 3), (16, 4)
    edge_in_dims, edge_out_dims = (8, 2), (12, 3)
    num_mp_layers = 2
    num_layers_per_conv_cell = 2    # GVPCell num_layers inside each GVPConv

    keys = jax.random.split(key, 6)
    ns = jax.random.normal(keys[0], (N, node_in_dims[0]), jnp.float32)
    nv = jax.random.normal(keys[1], (3, N, node_in_dims[1]), jnp.float32)
    es = jax.random.normal(keys[2], (E, edge_in_dims[0]), jnp.float32)
    ev = jax.random.normal(keys[3], (3, E, edge_in_dims[1]), jnp.float32)
    dst = jax.random.randint(keys[4], (E,), 0, N)   # edge destination node ids

    params = init_gvpgnn(keys[5], node_in_dims, node_out_dims,
                         edge_in_dims, edge_out_dims,
                         num_mp_layers, num_layers_per_conv_cell)

    fwd = jax.jit(gvpgnn_forward)
    (out_ns, out_nv), (out_es, out_ev) = fwd(dst, (ns, nv), (es, ev), params)
    jax.block_until_ready((out_ns, out_nv, out_es, out_ev))

    assert out_ns.shape == (N, node_out_dims[0])
    assert out_nv.shape == (3, N, node_out_dims[1])
    assert out_es.shape == (E, edge_out_dims[0])
    assert out_ev.shape == (3, E, edge_out_dims[1])
    assert bool(jnp.all(jnp.isfinite(out_ns))) and bool(jnp.all(jnp.isfinite(out_nv)))
    assert bool(jnp.all(jnp.isfinite(out_es))) and bool(jnp.all(jnp.isfinite(out_ev)))
    print("KERNEL_OK")
</pallas_src>

<mosaic_0001>
module attributes {stable_mosaic.version = 11 : i64} {
  func.func private @main(%arg0: i32) attributes {dimension_semantics = [#tpu.dimension_semantics<core_parallel>], iteration_bounds = array<i64: 2>, tpu.core_type = #tpu.core_type<sc_scalar_subcore>, window_params = []} {
    return
  }
}

module attributes {stable_mosaic.version = 11 : i64} {
  func.func private @main(%arg0: i32) attributes {dimension_semantics = [#tpu.dimension_semantics<core_parallel>], iteration_bounds = array<i64: 2>, tpu.core_type = #tpu.core_type<sc_scalar_subcore>, window_params = []} {
    return
  }
}

module attributes {stable_mosaic.version = 11 : i64} {
  func.func @_gvp_cell_kernel(%arg0: i32, %arg1: memref<16x14xf32, #tpu.memory_space<vmem>>, %arg2: memref<14x12xbf16, #tpu.memory_space<vmem>>, %arg3: memref<14x9xbf16, #tpu.memory_space<vmem>>, %arg4: memref<3x12xbf16, #tpu.memory_space<vmem>>, %arg5: memref<1x12xf32, #tpu.memory_space<vmem>>, %arg6: memref<9x9xbf16, #tpu.memory_space<vmem>>, %arg7: memref<9x3xf32, #tpu.memory_space<vmem>>, %arg8: memref<9x3xf32, #tpu.memory_space<vmem>>, %arg9: memref<3x9xf32, #tpu.memory_space<vmem>>, %arg10: memref<1x12xf32, #tpu.memory_space<vmem>>, %arg11: memref<1x12xf32, #tpu.memory_space<vmem>>, %arg12: memref<16x21xf32, #tpu.memory_space<vmem>>) attributes {dimension_semantics = [#tpu.dimension_semantics<parallel>], iteration_bounds = array<i64: 1>, scalar_prefetch = 0 : i64, scratch_operands = 0 : i64, tpu.core_type = #tpu.core_type<tc>, window_params = [{transform_indices = @transform_0, window_bounds = array<i64: 16, 14>}, {pipeline_mode = #tpu.pipeline_mode<synchronous>, transform_indices = @transform_1, window_bounds = array<i64: 14, 12>}, {pipeline_mode = #tpu.pipeline_mode<synchronous>, transform_indices = @transform_2, window_bounds = array<i64: 14, 9>}, {pipeline_mode = #tpu.pipeline_mode<synchronous>, transform_indices = @transform_3, window_bounds = array<i64: 3, 12>}, {pipeline_mode = #tpu.pipeline_mode<synchronous>, transform_indices = @transform_4, window_bounds = array<i64: 1, 12>}, {pipeline_mode = #tpu.pipeline_mode<synchronous>, transform_indices = @transform_5, window_bounds = array<i64: 9, 9>}, {pipeline_mode = #tpu.pipeline_mode<synchronous>, transform_indices = @transform_6, window_bounds = array<i64: 9, 3>}, {pipeline_mode = #tpu.pipeline_mode<synchronous>, transform_indices = @transform_7, window_bounds = array<i64: 9, 3>}, {pipeline_mode = #tpu.pipeline_mode<synchronous>, transform_indices = @transform_8, window_bounds = array<i64: 3, 9>}, {pipeline_mode = #tpu.pipeline_mode<synchronous>, transform_indices = @transform_9, window_bounds = array<i64: 1, 12>}, {pipeline_mode = #tpu.pipeline_mode<synchronous>, transform_indices = @transform_10, window_bounds = array<i64: 1, 12>}, {transform_indices = @transform_11, window_bounds = array<i64: 16, 21>}]} {
    %c0 = arith.constant 0 : index
    %c0_0 = arith.constant 0 : index
    %0 = vector.load %arg1[%c0, %c0_0] : memref<16x14xf32, #tpu.memory_space<vmem>>, vector<16x14xf32>
    %c0_1 = arith.constant 0 : index
    %c0_2 = arith.constant 0 : index
    %1 = vector.load %arg3[%c0_1, %c0_2] : memref<14x9xbf16, #tpu.memory_space<vmem>>, vector<14x9xbf16>
    %2 = arith.truncf %0 : vector<16x14xf32> to vector<16x14xbf16>
    %cst = arith.constant dense<0.000000e+00> : vector<16x9xf32>
    %3 = tpu.matmul %2, %1, %cst {dimension_numbers = #tpu.dot_dimension_numbers<[1], [0], [0], [1], [0, 0, 1, 1], [], []>} : vector<16x14xbf16>, vector<14x9xbf16>, vector<16x9xf32> -> vector<16x9xf32>
    %c0_3 = arith.constant 0 : index
    %c0_4 = arith.constant 0 : index
    %4 = vector.load %arg2[%c0_3, %c0_4] : memref<14x12xbf16, #tpu.memory_space<vmem>>, vector<14x12xbf16>
    %5 = arith.truncf %0 : vector<16x14xf32> to vector<16x14xbf16>
    %cst_5 = arith.constant dense<0.000000e+00> : vector<16x12xf32>
    %6 = tpu.matmul %5, %4, %cst_5 {dimension_numbers = #tpu.dot_dimension_numbers<[1], [0], [0], [1], [0, 0, 1, 1], [], []>} : vector<16x14xbf16>, vector<14x12xbf16>, vector<16x12xf32> -> vector<16x12xf32>
    %7 = arith.mulf %3, %3 : vector<16x9xf32>
    %c0_6 = arith.constant 0 : index
    %c0_7 = arith.constant 0 : index
    %8 = vector.load %arg7[%c0_6, %c0_7] : memref<9x3xf32, #tpu.memory_space<vmem>>, vector<9x3xf32>
    %cst_8 = arith.constant dense<0.000000e+00> : vector<16x3xf32>
    %9 = tpu.matmul %7, %8, %cst_8 {dimension_numbers = #tpu.dot_dimension_numbers<[1], [0], [0], [1], [0, 0, 1, 1], [], []>} : vector<16x9xf32>, vector<9x3xf32>, vector<16x3xf32> -> vector<16x3xf32>
    %cst_9 = arith.constant 9.99999993E-9 : f32
    %10 = vector.broadcast %cst_9 : f32 to vector<16x3xf32>
    %11 = arith.maximumf %9, %10 : vector<16x3xf32>
    %12 = math.sqrt %11 : vector<16x3xf32>
    %c0_10 = arith.constant 0 : index
    %c0_11 = arith.constant 0 : index
    %13 = vector.load %arg4[%c0_10, %c0_11] : memref<3x12xbf16, #tpu.memory_space<vmem>>, vector<3x12xbf16>
    %14 = arith.truncf %12 : vector<16x3xf32> to vector<16x3xbf16>
    %cst_12 = arith.constant dense<0.000000e+00> : vector<16x12xf32>
    %15 = tpu.matmul %14, %13, %cst_12 {dimension_numbers = #tpu.dot_dimension_numbers<[1], [0], [0], [1], [0, 0, 1, 1], [], []>} : vector<16x3xbf16>, vector<3x12xbf16>, vector<16x12xf32> -> vector<16x12xf32>
    %16 = arith.addf %6, %15 : vector<16x12xf32>
    %c0_13 = arith.constant 0 : index
    %c0_14 = arith.constant 0 : index
    %17 = vector.load %arg5[%c0_13, %c0_14] : memref<1x12xf32, #tpu.memory_space<vmem>>, vector<1x12xf32>
    %18 = vector.broadcast %17 : vector<1x12xf32> to vector<16x12xf32>
    %19 = arith.addf %16, %18 : vector<16x12xf32>
    %c0_15 = arith.constant 0 : index
    %c0_16 = arith.constant 0 : index
    %20 = vector.load %arg6[%c0_15, %c0_16] : memref<9x9xbf16, #tpu.memory_space<vmem>>, vector<9x9xbf16>
    %21 = arith.truncf %3 : vector<16x9xf32> to vector<16x9xbf16>
    %cst_17 = arith.constant dense<0.000000e+00> : vector<16x9xf32>
    %22 = tpu.matmul %21, %20, %cst_17 {dimension_numbers = #tpu.dot_dimension_numbers<[1], [0], [0], [1], [0, 0, 1, 1], [], []>} : vector<16x9xbf16>, vector<9x9xbf16>, vector<16x9xf32> -> vector<16x9xf32>
    %23 = arith.mulf %22, %22 : vector<16x9xf32>
    %c0_18 = arith.constant 0 : index
    %c0_19 = arith.constant 0 : index
    %24 = vector.load %arg8[%c0_18, %c0_19] : memref<9x3xf32, #tpu.memory_space<vmem>>, vector<9x3xf32>
    %cst_20 = arith.constant dense<0.000000e+00> : vector<16x3xf32>
    %25 = tpu.matmul %23, %24, %cst_20 {dimension_numbers = #tpu.dot_dimension_numbers<[1], [0], [0], [1], [0, 0, 1, 1], [], []>} : vector<16x9xf32>, vector<9x3xf32>, vector<16x3xf32> -> vector<16x3xf32>
    %cst_21 = arith.constant 9.99999993E-9 : f32
    %26 = vector.broadcast %cst_21 : f32 to vector<16x3xf32>
    %27 = arith.maximumf %25, %26 : vector<16x3xf32>
    %cst_22 = arith.constant dense<0.000000e+00> : vector<16xf32>
    %28 = vector.multi_reduction <add>, %27, %cst_22 [1] : vector<16x3xf32> to vector<16xf32>
    %29 = vector.shape_cast %28 : vector<16xf32> to vector<16x1xf32>
    %cst_23 = arith.constant 3.000000e+00 : f32
    %30 = vector.broadcast %cst_23 : f32 to vector<16x1xf32>
    %31 = arith.divf %29, %30 : vector<16x1xf32>
    %32 = math.rsqrt %31 : vector<16x1xf32>
    %33 = vector.broadcast %32 : vector<16x1xf32> to vector<16x9xf32>
    %34 = arith.mulf %22, %33 : vector<16x9xf32>
    %cst_24 = arith.constant dense<0.000000e+00> : vector<16xf32>
    %35 = vector.multi_reduction <add>, %19, %cst_24 [1] : vector<16x12xf32> to vector<16xf32>
    %36 = vector.shape_cast %35 : vector<16xf32> to vector<16x1xf32>
    %cst_25 = arith.constant 1.200000e+01 : f32
    %37 = vector.broadcast %cst_25 : f32 to vector<16x1xf32>
    %38 = arith.divf %36, %37 : vector<16x1xf32>
    %39 = vector.broadcast %38 : vector<16x1xf32> to vector<16x12xf32>
    %40 = arith.subf %19, %39 : vector<16x12xf32>
    %41 = arith.mulf %40, %40 : vector<16x12xf32>
    %cst_26 = arith.constant dense<0.000000e+00> : vector<16xf32>
    %42 = vector.multi_reduction <add>, %41, %cst_26 [1] : vector<16x12xf32> to vector<16xf32>
    %43 = vector.shape_cast %42 : vector<16xf32> to vector<16x1xf32>
    %cst_27 = arith.constant 1.200000e+01 : f32
    %44 = vector.broadcast %cst_27 : f32 to vector<16x1xf32>
    %45 = arith.divf %43, %44 : vector<16x1xf32>
    %46 = vector.broadcast %38 : vector<16x1xf32> to vector<16x12xf32>
    %47 = arith.subf %19, %46 : vector<16x12xf32>
    %cst_28 = arith.constant 9.99999974E-6 : f32
    %48 = vector.broadcast %cst_28 : f32 to vector<16x1xf32>
    %49 = arith.addf %45, %48 : vector<16x1xf32>
    %50 = math.rsqrt %49 : vector<16x1xf32>
    %51 = vector.broadcast %50 : vector<16x1xf32> to vector<16x12xf32>
    %52 = arith.mulf %47, %51 : vector<16x12xf32>
    %c0_29 = arith.constant 0 : index
    %c0_30 = arith.constant 0 : index
    %53 = vector.load %arg10[%c0_29, %c0_30] : memref<1x12xf32, #tpu.memory_space<vmem>>, vector<1x12xf32>
    %54 = vector.broadcast %53 : vector<1x12xf32> to vector<16x12xf32>
    %55 = arith.mulf %52, %54 : vector<16x12xf32>
    %c0_31 = arith.constant 0 : index
    %c0_32 = arith.constant 0 : index
    %56 = vector.load %arg11[%c0_31, %c0_32] : memref<1x12xf32, #tpu.memory_space<vmem>>, vector<1x12xf32>
    %57 = vector.broadcast %56 : vector<1x12xf32> to vector<16x12xf32>
    %58 = arith.addf %55, %57 : vector<16x12xf32>
    %59 = tpu.concatenate %58, %34 in 1 : vector<16x12xf32>, vector<16x9xf32> -> vector<16x21xf32>
    %c0_33 = arith.constant 0 : index
    %c0_34 = arith.constant 0 : index
    %60 = vector.load %arg12[%c0_33, %c0_34] : memref<16x21xf32, #tpu.memory_space<vmem>>, vector<16x21xf32>
    tpu.vector_store %arg12[%c0_33, %c0_34], %59 {strides = array<i32>} : memref<16x21xf32, #tpu.memory_space<vmem>>, vector<16x21xf32>,
    return
  }
  func.func @transform_0(%arg0: i32) -> (i32, i32) {
    %c0_i32 = arith.constant 0 : i32
    %c0_i32_0 = arith.constant 0 : i32
    return %arg0, %c0_i32 : i32, i32
  }
  func.func @transform_1(%arg0: i32) -> (i32, i32) {
    %c0_i32 = arith.constant 0 : i32
    %c0_i32_0 = arith.constant 0 : i32
    %c0_i32_1 = arith.constant 0 : i32
    return %c0_i32, %c0_i32_0 : i32, i32
  }
  func.func @transform_2(%arg0: i32) -> (i32, i32) {
    %c0_i32 = arith.constant 0 : i32
    %c0_i32_0 = arith.constant 0 : i32
    %c0_i32_1 = arith.constant 0 : i32
    return %c0_i32, %c0_i32_0 : i32, i32
  }
  func.func @transform_3(%arg0: i32) -> (i32, i32) {
    %c0_i32 = arith.constant 0 : i32
    %c0_i32_0 = arith.constant 0 : i32
    %c0_i32_1 = arith.constant 0 : i32
    return %c0_i32, %c0_i32_0 : i32, i32
  }
  func.func @transform_4(%arg0: i32) -> (i32, i32) {
    %c0_i32 = arith.constant 0 : i32
    %c0_i32_0 = arith.constant 0 : i32
    %c0_i32_1 = arith.constant 0 : i32
    return %c0_i32, %c0_i32_0 : i32, i32
  }
  func.func @transform_5(%arg0: i32) -> (i32, i32) {
    %c0_i32 = arith.constant 0 : i32
    %c0_i32_0 = arith.constant 0 : i32
    %c0_i32_1 = arith.constant 0 : i32
    return %c0_i32, %c0_i32_0 : i32, i32
  }
  func.func @transform_6(%arg0: i32) -> (i32, i32) {
    %c0_i32 = arith.constant 0 : i32
    %c0_i32_0 = arith.constant 0 : i32
    %c0_i32_1 = arith.constant 0 : i32
    return %c0_i32, %c0_i32_0 : i32, i32
  }
  func.func @transform_7(%arg0: i32) -> (i32, i32) {
    %c0_i32 = arith.constant 0 : i32
    %c0_i32_0 = arith.constant 0 : i32
    %c0_i32_1 = arith.constant 0 : i32
    return %c0_i32, %c0_i32_0 : i32, i32
  }
  func.func @transform_8(%arg0: i32) -> (i32, i32) {
    %c0_i32 = arith.constant 0 : i32
    %c0_i32_0 = arith.constant 0 : i32
    %c0_i32_1 = arith.constant 0 : i32
    return %c0_i32, %c0_i32_0 : i32, i32
  }
  func.func @transform_9(%arg0: i32) -> (i32, i32) {
    %c0_i32 = arith.constant 0 : i32
    %c0_i32_0 = arith.constant 0 : i32
    %c0_i32_1 = arith.constant 0 : i32
    return %c0_i32, %c0_i32_0 : i32, i32
  }
  func.func @transform_10(%arg0: i32) -> (i32, i32) {
    %c0_i32 = arith.constant 0 : i32
    %c0_i32_0 = arith.constant 0 : i32
    %c0_i32_1 = arith.constant 0 : i32
    return %c0_i32, %c0_i32_0 : i32, i32
  }
  func.func @transform_11(%arg0: i32) -> (i32, i32) {
    %c0_i32 = arith.constant 0 : i32
    %c0_i32_0 = arith.constant 0 : i32
    return %arg0, %c0_i32 : i32, i32
  }
}

module attributes {stable_mosaic.version = 11 : i64} {
  func.func @_gvp_cell_kernel(%arg0: i32, %arg1: memref<16x21xf32, #tpu.memory_space<vmem>>, %arg2: memref<21x12xbf16, #tpu.memory_space<vmem>>, %arg3: memref<21x9xbf16, #tpu.memory_space<vmem>>, %arg4: memref<3x12xbf16, #tpu.memory_space<vmem>>, %arg5: memref<1x12xf32, #tpu.memory_space<vmem>>, %arg6: memref<9x9xbf16, #tpu.memory_space<vmem>>, %arg7: memref<9x3xf32, #tpu.memory_space<vmem>>, %arg8: memref<9x3xf32, #tpu.memory_space<vmem>>, %arg9: memref<3x9xf32, #tpu.memory_space<vmem>>, %arg10: memref<1x12xf32, #tpu.memory_space<vmem>>, %arg11: memref<1x12xf32, #tpu.memory_space<vmem>>, %arg12: memref<12x12xbf16, #tpu.memory_space<vmem>>, %arg13: memref<9x9xbf16, #tpu.memory_space<vmem>>, %arg14: memref<3x12xbf16, #tpu.memory_space<vmem>>, %arg15: memref<1x12xf32, #tpu.memory_space<vmem>>, %arg16: memref<9x9xbf16, #tpu.memory_space<vmem>>, %arg17: memref<9x3xf32, #tpu.memory_space<vmem>>, %arg18: memref<9x3xf32, #tpu.memory_space<vmem>>, %arg19: memref<3x9xf32, #tpu.memory_space<vmem>>, %arg20: memref<1x12xf32, #tpu.memory_space<vmem>>, %arg21: memref<1x12xf32, #tpu.memory_space<vmem>>, %arg22: memref<16x21xf32, #tpu.memory_space<vmem>>) attributes {dimension_semantics = [#tpu.dimension_semantics<parallel>], iteration_bounds = array<i64: 1>, scalar_prefetch = 0 : i64, scratch_operands = 0 : i64, tpu.core_type = #tpu.core_type<tc>, window_params = [{transform_indices = @transform_0, window_bounds = array<i64: 16, 21>}, {pipeline_mode = #tpu.pipeline_mode<synchronous>, transform_indices = @transform_1, window_bounds = array<i64: 21, 12>}, {pipeline_mode = #tpu.pipeline_mode<synchronous>, transform_indices = @transform_2, window_bounds = array<i64: 21, 9>}, {pipeline_mode = #tpu.pipeline_mode<synchronous>, transform_indices = @transform_3, window_bounds = array<i64: 3, 12>}, {pipeline_mode = #tpu.pipeline_mode<synchronous>, transform_indices = @transform_4, window_bounds = array<i64: 1, 12>}, {pipeline_mode = #tpu.pipeline_mode<synchronous>, transform_indices = @transform_5, window_bounds = array<i64: 9, 9>}, {pipeline_mode = #tpu.pipeline_mode<synchronous>, transform_indices = @transform_6, window_bounds = array<i64: 9, 3>}, {pipeline_mode = #tpu.pipeline_mode<synchronous>, transform_indices = @transform_7, window_bounds = array<i64: 9, 3>}, {pipeline_mode = #tpu.pipeline_mode<synchronous>, transform_indices = @transform_8, window_bounds = array<i64: 3, 9>}, {pipeline_mode = #tpu.pipeline_mode<synchronous>, transform_indices = @transform_9, window_bounds = array<i64: 1, 12>}, {pipeline_mode = #tpu.pipeline_mode<synchronous>, transform_indices = @transform_10, window_bounds = array<i64: 1, 12>}, {pipeline_mode = #tpu.pipeline_mode<synchronous>, transform_indices = @transform_11, window_bounds = array<i64: 12, 12>}, {pipeline_mode = #tpu.pipeline_mode<synchronous>, transform_indices = @transform_12, window_bounds = array<i64: 9, 9>}, {pipeline_mode = #tpu.pipeline_mode<synchronous>, transform_indices = @transform_13, window_bounds = array<i64: 3, 12>}, {pipeline_mode = #tpu.pipeline_mode<synchronous>, transform_indices = @transform_14, window_bounds = array<i64: 1, 12>}, {pipeline_mode = #tpu.pipeline_mode<synchronous>, transform_indices = @transform_15, window_bounds = array<i64: 9, 9>}, {pipeline_mode = #tpu.pipeline_mode<synchronous>, transform_indices = @transform_16, window_bounds = array<i64: 9, 3>}, {pipeline_mode = #tpu.pipeline_mode<synchronous>, transform_indices = @transform_17, window_bounds = array<i64: 9, 3>}, {pipeline_mode = #tpu.pipeline_mode<synchronous>, transform_indices = @transform_18, window_bounds = array<i64: 3, 9>}, {pipeline_mode = #tpu.pipeline_mode<synchronous>, transform_indices = @transform_19, window_bounds = array<i64: 1, 12>}, {pipeline_mode = #tpu.pipeline_mode<synchronous>, transform_indices = @transform_20, window_bounds = array<i64: 1, 12>}, {transform_indices = @transform_21, window_bounds = array<i64: 16, 21>}]} {
    %c0 = arith.constant 0 : index
    %c0_0 = arith.constant 0 : index
    %0 = vector.load %arg1[%c0, %c0_0] : memref<16x21xf32, #tpu.memory_space<vmem>>, vector<16x21xf32>
    %c0_1 = arith.constant 0 : index
    %c0_2 = arith.constant 0 : index
    %1 = vector.load %arg3[%c0_1, %c0_2] : memref<21x9xbf16, #tpu.memory_space<vmem>>, vector<21x9xbf16>
    %2 = arith.truncf %0 : vector<16x21xf32> to vector<16x21xbf16>
    %cst = arith.constant dense<0.000000e+00> : vector<16x9xf32>
    %3 = tpu.matmul %2, %1, %cst {dimension_numbers = #tpu.dot_dimension_numbers<[1], [0], [0], [1], [0, 0, 1, 1], [], []>} : vector<16x21xbf16>, vector<21x9xbf16>, vector<16x9xf32> -> vector<16x9xf32>
    %c0_3 = arith.constant 0 : index
    %c0_4 = arith.constant 0 : index
    %4 = vector.load %arg2[%c0_3, %c0_4] : memref<21x12xbf16, #tpu.memory_space<vmem>>, vector<21x12xbf16>
    %5 = arith.truncf %0 : vector<16x21xf32> to vector<16x21xbf16>
    %cst_5 = arith.constant dense<0.000000e+00> : vector<16x12xf32>
    %6 = tpu.matmul %5, %4, %cst_5 {dimension_numbers = #tpu.dot_dimension_numbers<[1], [0], [0], [1], [0, 0, 1, 1], [], []>} : vector<16x21xbf16>, vector<21x12xbf16>, vector<16x12xf32> -> vector<16x12xf32>
    %7 = arith.mulf %3, %3 : vector<16x9xf32>
    %c0_6 = arith.constant 0 : index
    %c0_7 = arith.constant 0 : index
    %8 = vector.load %arg7[%c0_6, %c0_7] : memref<9x3xf32, #tpu.memory_space<vmem>>, vector<9x3xf32>
    %cst_8 = arith.constant dense<0.000000e+00> : vector<16x3xf32>
    %9 = tpu.matmul %7, %8, %cst_8 {dimension_numbers = #tpu.dot_dimension_numbers<[1], [0], [0], [1], [0, 0, 1, 1], [], []>} : vector<16x9xf32>, vector<9x3xf32>, vector<16x3xf32> -> vector<16x3xf32>
    %cst_9 = arith.constant 9.99999993E-9 : f32
    %10 = vector.broadcast %cst_9 : f32 to vector<16x3xf32>
    %11 = arith.maximumf %9, %10 : vector<16x3xf32>
    %12 = math.sqrt %11 : vector<16x3xf32>
    %c0_10 = arith.constant 0 : index
    %c0_11 = arith.constant 0 : index
    %13 = vector.load %arg4[%c0_10, %c0_11] : memref<3x12xbf16, #tpu.memory_space<vmem>>, vector<3x12xbf16>
    %14 = arith.truncf %12 : vector<16x3xf32> to vector<16x3xbf16>
    %cst_12 = arith.constant dense<0.000000e+00> : vector<16x12xf32>
    %15 = tpu.matmul %14, %13, %cst_12 {dimension_numbers = #tpu.dot_dimension_numbers<[1], [0], [0], [1], [0, 0, 1, 1], [], []>} : vector<16x3xbf16>, vector<3x12xbf16>, vector<16x12xf32> -> vector<16x12xf32>
    %16 = arith.addf %6, %15 : vector<16x12xf32>
    %c0_13 = arith.constant 0 : index
    %c0_14 = arith.constant 0 : index
    %17 = vector.load %arg5[%c0_13, %c0_14] : memref<1x12xf32, #tpu.memory_space<vmem>>, vector<1x12xf32>
    %18 = vector.broadcast %17 : vector<1x12xf32> to vector<16x12xf32>
    %19 = arith.addf %16, %18 : vector<16x12xf32>
    %c0_15 = arith.constant 0 : index
    %c0_16 = arith.constant 0 : index
    %20 = vector.load %arg6[%c0_15, %c0_16] : memref<9x9xbf16, #tpu.memory_space<vmem>>, vector<9x9xbf16>
    %21 = arith.truncf %3 : vector<16x9xf32> to vector<16x9xbf16>
    %cst_17 = arith.constant dense<0.000000e+00> : vector<16x9xf32>
    %22 = tpu.matmul %21, %20, %cst_17 {dimension_numbers = #tpu.dot_dimension_numbers<[1], [0], [0], [1], [0, 0, 1, 1], [], []>} : vector<16x9xbf16>, vector<9x9xbf16>, vector<16x9xf32> -> vector<16x9xf32>
    %23 = arith.mulf %22, %22 : vector<16x9xf32>
    %c0_18 = arith.constant 0 : index
    %c0_19 = arith.constant 0 : index
    %24 = vector.load %arg8[%c0_18, %c0_19] : memref<9x3xf32, #tpu.memory_space<vmem>>, vector<9x3xf32>
    %cst_20 = arith.constant dense<0.000000e+00> : vector<16x3xf32>
    %25 = tpu.matmul %23, %24, %cst_20 {dimension_numbers = #tpu.dot_dimension_numbers<[1], [0], [0], [1], [0, 0, 1, 1], [], []>} : vector<16x9xf32>, vector<9x3xf32>, vector<16x3xf32> -> vector<16x3xf32>
    %cst_21 = arith.constant 9.99999993E-9 : f32
    %26 = vector.broadcast %cst_21 : f32 to vector<16x3xf32>
    %27 = arith.maximumf %25, %26 : vector<16x3xf32>
    %28 = math.sqrt %27 : vector<16x3xf32>
    %29 = arith.negf %28 : vector<16x3xf32>
    %30 = math.exp %29 : vector<16x3xf32>
    %cst_22 = arith.constant 1.000000e+00 : f32
    %31 = vector.broadcast %cst_22 : f32 to vector<16x3xf32>
    %32 = arith.addf %31, %30 : vector<16x3xf32>
    %33 = arith.divf %31, %32 : vector<16x3xf32>
    %c0_23 = arith.constant 0 : index
    %c0_24 = arith.constant 0 : index
    %34 = vector.load %arg9[%c0_23, %c0_24] : memref<3x9xf32, #tpu.memory_space<vmem>>, vector<3x9xf32>
    %cst_25 = arith.constant dense<0.000000e+00> : vector<16x9xf32>
    %35 = tpu.matmul %33, %34, %cst_25 {dimension_numbers = #tpu.dot_dimension_numbers<[1], [0], [0], [1], [0, 0, 1, 1], [], []>} : vector<16x3xf32>, vector<3x9xf32>, vector<16x9xf32> -> vector<16x9xf32>
    %36 = arith.mulf %22, %35 : vector<16x9xf32>
    %cst_26 = arith.constant 0.000000e+00 : f32
    %cst_27 = arith.constant 6.000000e+00 : f32
    %37 = vector.broadcast %cst_26 : f32 to vector<16x12xf32>
    %38 = arith.maximumf %37, %19 : vector<16x12xf32>
    %39 = vector.broadcast %cst_27 : f32 to vector<16x12xf32>
    %40 = arith.minimumf %39, %38 : vector<16x12xf32>
    %41 = arith.mulf %36, %36 : vector<16x9xf32>
    %c0_28 = arith.constant 0 : index
    %c0_29 = arith.constant 0 : index
    %42 = vector.load %arg8[%c0_28, %c0_29] : memref<9x3xf32, #tpu.memory_space<vmem>>, vector<9x3xf32>
    %cst_30 = arith.constant dense<0.000000e+00> : vector<16x3xf32>
    %43 = tpu.matmul %41, %42, %cst_30 {dimension_numbers = #tpu.dot_dimension_numbers<[1], [0], [0], [1], [0, 0, 1, 1], [], []>} : vector<16x9xf32>, vector<9x3xf32>, vector<16x3xf32> -> vector<16x3xf32>
    %cst_31 = arith.constant 9.99999993E-9 : f32
    %44 = vector.broadcast %cst_31 : f32 to vector<16x3xf32>
    %45 = arith.maximumf %43, %44 : vector<16x3xf32>
    %cst_32 = arith.constant dense<0.000000e+00> : vector<16xf32>
    %46 = vector.multi_reduction <add>, %45, %cst_32 [1] : vector<16x3xf32> to vector<16xf32>
    %47 = vector.shape_cast %46 : vector<16xf32> to vector<16x1xf32>
    %cst_33 = arith.constant 3.000000e+00 : f32
    %48 = vector.broadcast %cst_33 : f32 to vector<16x1xf32>
    %49 = arith.divf %47, %48 : vector<16x1xf32>
    %50 = math.rsqrt %49 : vector<16x1xf32>
    %51 = vector.broadcast %50 : vector<16x1xf32> to vector<16x9xf32>
    %52 = arith.mulf %36, %51 : vector<16x9xf32>
    %cst_34 = arith.constant dense<0.000000e+00> : vector<16xf32>
    %53 = vector.multi_reduction <add>, %40, %cst_34 [1] : vector<16x12xf32> to vector<16xf32>
    %54 = vector.shape_cast %53 : vector<16xf32> to vector<16x1xf32>
    %cst_35 = arith.constant 1.200000e+01 : f32
    %55 = vector.broadcast %cst_35 : f32 to vector<16x1xf32>
    %56 = arith.divf %54, %55 : vector<16x1xf32>
    %57 = vector.broadcast %56 : vector<16x1xf32> to vector<16x12xf32>
    %58 = arith.subf %40, %57 : vector<16x12xf32>
    %59 = arith.mulf %58, %58 : vector<16x12xf32>
    %cst_36 = arith.constant dense<0.000000e+00> : vector<16xf32>
    %60 = vector.multi_reduction <add>, %59, %cst_36 [1] : vector<16x12xf32> to vector<16xf32>
    %61 = vector.shape_cast %60 : vector<16xf32> to vector<16x1xf32>
    %cst_37 = arith.constant 1.200000e+01 : f32
    %62 = vector.broadcast %cst_37 : f32 to vector<16x1xf32>
    %63 = arith.divf %61, %62 : vector<16x1xf32>
    %64 = vector.broadcast %56 : vector<16x1xf32> to vector<16x12xf32>
    %65 = arith.subf %40, %64 : vector<16x12xf32>
    %cst_38 = arith.constant 9.99999974E-6 : f32
    %66 = vector.broadcast %cst_38 : f32 to vector<16x1xf32>
    %67 = arith.addf %63, %66 : vector<16x1xf32>
    %68 = math.rsqrt %67 : vector<16x1xf32>
    %69 = vector.broadcast %68 : vector<16x1xf32> to vector<16x12xf32>
    %70 = arith.mulf %65, %69 : vector<16x12xf32>
    %c0_39 = arith.constant 0 : index
    %c0_40 = arith.constant 0 : index
    %71 = vector.load %arg10[%c0_39, %c0_40] : memref<1x12xf32, #tpu.memory_space<vmem>>, vector<1x12xf32>
    %72 = vector.broadcast %71 : vector<1x12xf32> to vector<16x12xf32>
    %73 = arith.mulf %70, %72 : vector<16x12xf32>
    %c0_41 = arith.constant 0 : index
    %c0_42 = arith.constant 0 : index
    %74 = vector.load %arg11[%c0_41, %c0_42] : memref<1x12xf32, #tpu.memory_space<vmem>>, vector<1x12xf32>
    %75 = vector.broadcast %74 : vector<1x12xf32> to vector<16x12xf32>
    %76 = arith.addf %73, %75 : vector<16x12xf32>
    %c0_43 = arith.constant 0 : index
    %c0_44 = arith.constant 0 : index
    %77 = vector.load %arg13[%c0_43, %c0_44] : memref<9x9xbf16, #tpu.memory_space<vmem>>, vector<9x9xbf16>
    %78 = arith.truncf %52 : vector<16x9xf32> to vector<16x9xbf16>
    %cst_45 = arith.constant dense<0.000000e+00> : vector<16x9xf32>
    %79 = tpu.matmul %78, %77, %cst_45 {dimension_numbers = #tpu.dot_dimension_numbers<[1], [0], [0], [1], [0, 0, 1, 1], [], []>} : vector<16x9xbf16>, vector<9x9xbf16>, vector<16x9xf32> -> vector<16x9xf32>
    %c0_46 = arith.constant 0 : index
    %c0_47 = arith.constant 0 : index
    %80 = vector.load %arg12[%c0_46, %c0_47] : memref<12x12xbf16, #tpu.memory_space<vmem>>, vector<12x12xbf16>
    %81 = arith.truncf %76 : vector<16x12xf32> to vector<16x12xbf16>
    %cst_48 = arith.constant dense<0.000000e+00> : vector<16x12xf32>
    %82 = tpu.matmul %81, %80, %cst_48 {dimension_numbers = #tpu.dot_dimension_numbers<[1], [0], [0], [1], [0, 0, 1, 1], [], []>} : vector<16x12xbf16>, vector<12x12xbf16>, vector<16x12xf32> -> vector<16x12xf32>
    %83 = arith.mulf %79, %79 : vector<16x9xf32>
    %c0_49 = arith.constant 0 : index
    %c0_50 = arith.constant 0 : index
    %84 = vector.load %arg17[%c0_49, %c0_50] : memref<9x3xf32, #tpu.memory_space<vmem>>, vector<9x3xf32>
    %cst_51 = arith.constant dense<0.000000e+00> : vector<16x3xf32>
    %85 = tpu.matmul %83, %84, %cst_51 {dimension_numbers = #tpu.dot_dimension_numbers<[1], [0], [0], [1], [0, 0, 1, 1], [], []>} : vector<16x9xf32>, vector<9x3xf32>, vector<16x3xf32> -> vector<16x3xf32>
    %cst_52 = arith.constant 9.99999993E-9 : f32
    %86 = vector.broadcast %cst_52 : f32 to vector<16x3xf32>
    %87 = arith.maximumf %85, %86 : vector<16x3xf32>
    %88 = math.sqrt %87 : vector<16x3xf32>
    %c0_53 = arith.constant 0 : index
    %c0_54 = arith.constant 0 : index
    %89 = vector.load %arg14[%c0_53, %c0_54] : memref<3x12xbf16, #tpu.memory_space<vmem>>, vector<3x12xbf16>
    %90 = arith.truncf %88 : vector<16x3xf32> to vector<16x3xbf16>
    %cst_55 = arith.constant dense<0.000000e+00> : vector<16x12xf32>
    %91 = tpu.matmul %90, %89, %cst_55 {dimension_numbers = #tpu.dot_dimension_numbers<[1], [0], [0], [1], [0, 0, 1, 1], [], []>} : vector<16x3xbf16>, vector<3x12xbf16>, vector<16x12xf32> -> vector<16x12xf32>
    %92 = arith.addf %82, %91 : vector<16x12xf32>
    %c0_56 = arith.constant 0 : index
    %c0_57 = arith.constant 0 : index
    %93 = vector.load %arg15[%c0_56, %c0_57] : memref<1x12xf32, #tpu.memory_space<vmem>>, vector<1x12xf32>
    %94 = vector.broadcast %93 : vector<1x12xf32> to vector<16x12xf32>
    %95 = arith.addf %92, %94 : vector<16x12xf32>
    %c0_58 = arith.constant 0 : index
    %c0_59 = arith.constant 0 : index
    %96 = vector.load %arg16[%c0_58, %c0_59] : memref<9x9xbf16, #tpu.memory_space<vmem>>, vector<9x9xbf16>
    %97 = arith.truncf %79 : vector<16x9xf32> to vector<16x9xbf16>
    %cst_60 = arith.constant dense<0.000000e+00> : vector<16x9xf32>
    %98 = tpu.matmul %97, %96, %cst_60 {dimension_numbers = #tpu.dot_dimension_numbers<[1], [0], [0], [1], [0, 0, 1, 1], [], []>} : vector<16x9xbf16>, vector<9x9xbf16>, vector<16x9xf32> -> vector<16x9xf32>
    %99 = arith.mulf %98, %98 : vector<16x9xf32>
    %c0_61 = arith.constant 0 : index
    %c0_62 = arith.constant 0 : index
    %100 = vector.load %arg18[%c0_61, %c0_62] : memref<9x3xf32, #tpu.memory_space<vmem>>, vector<9x3xf32>
    %cst_63 = arith.constant dense<0.000000e+00> : vector<16x3xf32>
    %101 = tpu.matmul %99, %100, %cst_63 {dimension_numbers = #tpu.dot_dimension_numbers<[1], [0], [0], [1], [0, 0, 1, 1], [], []>} : vector<16x9xf32>, vector<9x3xf32>, vector<16x3xf32> -> vector<16x3xf32>
    %cst_64 = arith.constant 9.99999993E-9 : f32
    %102 = vector.broadcast %cst_64 : f32 to vector<16x3xf32>
    %103 = arith.maximumf %101, %102 : vector<16x3xf32>
    %104 = math.sqrt %103 : vector<16x3xf32>
    %105 = arith.negf %104 : vector<16x3xf32>
    %106 = math.exp %105 : vector<16x3xf32>
    %cst_65 = arith.constant 1.000000e+00 : f32
    %107 = vector.broadcast %cst_65 : f32 to vector<16x3xf32>
    %108 = arith.addf %107, %106 : vector<16x3xf32>
    %109 = arith.divf %107, %108 : vector<16x3xf32>
    %c0_66 = arith.constant 0 : index
    %c0_67 = arith.constant 0 : index
    %110 = vector.load %arg19[%c0_66, %c0_67] : memref<3x9xf32, #tpu.memory_space<vmem>>, vector<3x9xf32>
    %cst_68 = arith.constant dense<0.000000e+00> : vector<16x9xf32>
    %111 = tpu.matmul %109, %110, %cst_68 {dimension_numbers = #tpu.dot_dimension_numbers<[1], [0], [0], [1], [0, 0, 1, 1], [], []>} : vector<16x3xf32>, vector<3x9xf32>, vector<16x9xf32> -> vector<16x9xf32>
    %112 = arith.mulf %98, %111 : vector<16x9xf32>
    %cst_69 = arith.constant 0.000000e+00 : f32
    %cst_70 = arith.constant 6.000000e+00 : f32
    %113 = vector.broadcast %cst_69 : f32 to vector<16x12xf32>
    %114 = arith.maximumf %113, %95 : vector<16x12xf32>
    %115 = vector.broadcast %cst_70 : f32 to vector<16x12xf32>
    %116 = arith.minimumf %115, %114 : vector<16x12xf32>
    %117 = arith.mulf %112, %112 : vector<16x9xf32>
    %c0_71 = arith.constant 0 : index
    %c0_72 = arith.constant 0 : index
    %118 = vector.load %arg18[%c0_71, %c0_72] : memref<9x3xf32, #tpu.memory_space<vmem>>, vector<9x3xf32>
    %cst_73 = arith.constant dense<0.000000e+00> : vector<16x3xf32>
    %119 = tpu.matmul %117, %118, %cst_73 {dimension_numbers = #tpu.dot_dimension_numbers<[1], [0], [0], [1], [0, 0, 1, 1], [], []>} : vector<16x9xf32>, vector<9x3xf32>, vector<16x3xf32> -> vector<16x3xf32>
    %cst_74 = arith.constant 9.99999993E-9 : f32
    %120 = vector.broadcast %cst_74 : f32 to vector<16x3xf32>
    %121 = arith.maximumf %119, %120 : vector<16x3xf32>
    %cst_75 = arith.constant dense<0.000000e+00> : vector<16xf32>
    %122 = vector.multi_reduction <add>, %121, %cst_75 [1] : vector<16x3xf32> to vector<16xf32>
    %123 = vector.shape_cast %122 : vector<16xf32> to vector<16x1xf32>
    %cst_76 = arith.constant 3.000000e+00 : f32
    %124 = vector.broadcast %cst_76 : f32 to vector<16x1xf32>
    %125 = arith.divf %123, %124 : vector<16x1xf32>
    %126 = math.rsqrt %125 : vector<16x1xf32>
    %127 = vector.broadcast %126 : vector<16x1xf32> to vector<16x9xf32>
    %128 = arith.mulf %112, %127 : vector<16x9xf32>
    %cst_77 = arith.constant dense<0.000000e+00> : vector<16xf32>
    %129 = vector.multi_reduction <add>, %116, %cst_77 [1] : vector<16x12xf32> to vector<16xf32>
    %130 = vector.shape_cast %129 : vector<16xf32> to vector<16x1xf32>
    %cst_78 = arith.constant 1.200000e+01 : f32
    %131 = vector.broadcast %cst_78 : f32 to vector<16x1xf32>
    %132 = arith.divf %130, %131 : vector<16x1xf32>
    %133 = vector.broadcast %132 : vector<16x1xf32> to vector<16x12xf32>
    %134 = arith.subf %116, %133 : vector<16x12xf32>
    %135 = arith.mulf %134, %134 : vector<16x12xf32>
    %cst_79 = arith.constant dense<0.000000e+00> : vector<16xf32>
    %136 = vector.multi_reduction <add>, %135, %cst_79 [1] : vector<16x12xf32> to vector<16xf32>
    %137 = vector.shape_cast %136 : vector<16xf32> to vector<16x1xf32>
    %cst_80 = arith.constant 1.200000e+01 : f32
    %138 = vector.broadcast %cst_80 : f32 to vector<16x1xf32>
    %139 = arith.divf %137, %138 : vector<16x1xf32>
    %140 = vector.broadcast %132 : vector<16x1xf32> to vector<16x12xf32>
    %141 = arith.subf %116, %140 : vector<16x12xf32>
    %cst_81 = arith.constant 9.99999974E-6 : f32
    %142 = vector.broadcast %cst_81 : f32 to vector<16x1xf32>
    %143 = arith.addf %139, %142 : vector<16x1xf32>
    %144 = math.rsqrt %143 : vector<16x1xf32>
    %145 = vector.broadcast %144 : vector<16x1xf32> to vector<16x12xf32>
    %146 = arith.mulf %141, %145 : vector<16x12xf32>
    %c0_82 = arith.constant 0 : index
    %c0_83 = arith.constant 0 : index
    %147 = vector.load %arg20[%c0_82, %c0_83] : memref<1x12xf32, #tpu.memory_space<vmem>>, vector<1x12xf32>
    %148 = vector.broadcast %147 : vector<1x12xf32> to vector<16x12xf32>
    %149 = arith.mulf %146, %148 : vector<16x12xf32>
    %c0_84 = arith.constant 0 : index
    %c0_85 = arith.constant 0 : index
    %150 = vector.load %arg21[%c0_84, %c0_85] : memref<1x12xf32, #tpu.memory_space<vmem>>, vector<1x12xf32>
    %151 = vector.broadcast %150 : vector<1x12xf32> to vector<16x12xf32>
    %152 = arith.addf %149, %151 : vector<16x12xf32>
    %153 = tpu.concatenate %152, %128 in 1 : vector<16x12xf32>, vector<16x9xf32> -> vector<16x21xf32>
    %c0_86 = arith.constant 0 : index
    %c0_87 = arith.constant 0 : index
    %154 = vector.load %arg22[%c0_86, %c0_87] : memref<16x21xf32, #tpu.memory_space<vmem>>, vector<16x21xf32>
    tpu.vector_store %arg22[%c0_86, %c0_87], %153 {strides = array<i32>} : memref<16x21xf32, #tpu.memory_space<vmem>>, vector<16x21xf32>,
    return
  }
  func.func @transform_0(%arg0: i32) -> (i32, i32) {
    %c0_i32 = arith.constant 0 : i32
    %c0_i32_0 = arith.constant 0 : i32
    return %arg0, %c0_i32 : i32, i32
  }
  func.func @transform_1(%arg0: i32) -> (i32, i32) {
    %c0_i32 = arith.constant 0 : i32
    %c0_i32_0 = arith.constant 0 : i32
    %c0_i32_1 = arith.constant 0 : i32
    return %c0_i32, %c0_i32_0 : i32, i32
  }
  func.func @transform_2(%arg0: i32) -> (i32, i32) {
    %c0_i32 = arith.constant 0 : i32
    %c0_i32_0 = arith.constant 0 : i32
    %c0_i32_1 = arith.constant 0 : i32
    return %c0_i32, %c0_i32_0 : i32, i32
  }
  func.func @transform_3(%arg0: i32) -> (i32, i32) {
    %c0_i32 = arith.constant 0 : i32
    %c0_i32_0 = arith.constant 0 : i32
    %c0_i32_1 = arith.constant 0 : i32
    return %c0_i32, %c0_i32_0 : i32, i32
  }
  func.func @transform_4(%arg0: i32) -> (i32, i32) {
    %c0_i32 = arith.constant 0 : i32
    %c0_i32_0 = arith.constant 0 : i32
    %c0_i32_1 = arith.constant 0 : i32
    return %c0_i32, %c0_i32_0 : i32, i32
  }
  func.func @transform_5(%arg0: i32) -> (i32, i32) {
    %c0_i32 = arith.constant 0 : i32
    %c0_i32_0 = arith.constant 0 : i32
    %c0_i32_1 = arith.constant 0 : i32
    return %c0_i32, %c0_i32_0 : i32, i32
  }
  func.func @transform_6(%arg0: i32) -> (i32, i32) {
    %c0_i32 = arith.constant 0 : i32
    %c0_i32_0 = arith.constant 0 : i32
    %c0_i32_1 = arith.constant 0 : i32
    return %c0_i32, %c0_i32_0 : i32, i32
  }
  func.func @transform_7(%arg0: i32) -> (i32, i32) {
    %c0_i32 = arith.constant 0 : i32
    %c0_i32_0 = arith.constant 0 : i32
    %c0_i32_1 = arith.constant 0 : i32
    return %c0_i32, %c0_i32_0 : i32, i32
  }
  func.func @transform_8(%arg0: i32) -> (i32, i32) {
    %c0_i32 = arith.constant 0 : i32
    %c0_i32_0 = arith.constant 0 : i32
    %c0_i32_1 = arith.constant 0 : i32
    return %c0_i32, %c0_i32_0 : i32, i32
  }
  func.func @transform_9(%arg0: i32) -> (i32, i32) {
    %c0_i32 = arith.constant 0 : i32
    %c0_i32_0 = arith.constant 0 : i32
    %c0_i32_1 = arith.constant 0 : i32
    return %c0_i32, %c0_i32_0 : i32, i32
  }
  func.func @transform_10(%arg0: i32) -> (i32, i32) {
    %c0_i32 = arith.constant 0 : i32
    %c0_i32_0 = arith.constant 0 : i32
    %c0_i32_1 = arith.constant 0 : i32
    return %c0_i32, %c0_i32_0 : i32, i32
  }
  func.func @transform_11(%arg0: i32) -> (i32, i32) {
    %c0_i32 = arith.constant 0 : i32
    %c0_i32_0 = arith.constant 0 : i32
    %c0_i32_1 = arith.constant 0 : i32
    return %c0_i32, %c0_i32_0 : i32, i32
  }
  func.func @transform_12(%arg0: i32) -> (i32, i32) {
    %c0_i32 = arith.constant 0 : i32
    %c0_i32_0 = arith.constant 0 : i32
    %c0_i32_1 = arith.constant 0 : i32
    return %c0_i32, %c0_i32_0 : i32, i32
  }
  func.func @transform_13(%arg0: i32) -> (i32, i32) {
    %c0_i32 = arith.constant 0 : i32
    %c0_i32_0 = arith.constant 0 : i32
    %c0_i32_1 = arith.constant 0 : i32
    return %c0_i32, %c0_i32_0 : i32, i32
  }
  func.func @transform_14(%arg0: i32) -> (i32, i32) {
    %c0_i32 = arith.constant 0 : i32
    %c0_i32_0 = arith.constant 0 : i32
    %c0_i32_1 = arith.constant 0 : i32
    return %c0_i32, %c0_i32_0 : i32, i32
  }
  func.func @transform_15(%arg0: i32) -> (i32, i32) {
    %c0_i32 = arith.constant 0 : i32
    %c0_i32_0 = arith.constant 0 : i32
    %c0_i32_1 = arith.constant 0 : i32
    return %c0_i32, %c0_i32_0 : i32, i32
  }
  func.func @transform_16(%arg0: i32) -> (i32, i32) {
    %c0_i32 = arith.constant 0 : i32
    %c0_i32_0 = arith.constant 0 : i32
    %c0_i32_1 = arith.constant 0 : i32
    return %c0_i32, %c0_i32_0 : i32, i32
  }
  func.func @transform_17(%arg0: i32) -> (i32, i32) {
    %c0_i32 = arith.constant 0 : i32
    %c0_i32_0 = arith.constant 0 : i32
    %c0_i32_1 = arith.constant 0 : i32
    return %c0_i32, %c0_i32_0 : i32, i32
  }
  func.func @transform_18(%arg0: i32) -> (i32, i32) {
    %c0_i32 = arith.constant 0 : i32
    %c0_i32_0 = arith.constant 0 : i32
    %c0_i32_1 = arith.constant 0 : i32
    return %c0_i32, %c0_i32_0 : i32, i32
  }
  func.func @transform_19(%arg0: i32) -> (i32, i32) {
    %c0_i32 = arith.constant 0 : i32
    %c0_i32_0 = arith.constant 0 : i32
    %c0_i32_1 = arith.constant 0 : i32
    return %c0_i32, %c0_i32_0 : i32, i32
  }
  func.func @transform_20(%arg0: i32) -> (i32, i32) {
    %c0_i32 = arith.constant 0 : i32
    %c0_i32_0 = arith.constant 0 : i32
    %c0_i32_1 = arith.constant 0 : i32
    return %c0_i32, %c0_i32_0 : i32, i32
  }
  func.func @transform_21(%arg0: i32) -> (i32, i32) {
    %c0_i32 = arith.constant 0 : i32
    %c0_i32_0 = arith.constant 0 : i32
    return %arg0, %c0_i32 : i32, i32
  }
}

module attributes {stable_mosaic.version = 11 : i64} {
  func.func @_gvp_cell_kernel(%arg0: i32, %arg1: memref<8x15xf32, #tpu.memory_space<vmem>>, %arg2: memref<15x16xbf16, #tpu.memory_space<vmem>>, %arg3: memref<15x12xbf16, #tpu.memory_space<vmem>>, %arg4: memref<4x16xbf16, #tpu.memory_space<vmem>>, %arg5: memref<1x16xf32, #tpu.memory_space<vmem>>, %arg6: memref<12x12xbf16, #tpu.memory_space<vmem>>, %arg7: memref<12x4xf32, #tpu.memory_space<vmem>>, %arg8: memref<12x4xf32, #tpu.memory_space<vmem>>, %arg9: memref<4x12xf32, #tpu.memory_space<vmem>>, %arg10: memref<1x16xf32, #tpu.memory_space<vmem>>, %arg11: memref<1x16xf32, #tpu.memory_space<vmem>>, %arg12: memref<8x28xf32, #tpu.memory_space<vmem>>) attributes {dimension_semantics = [#tpu.dimension_semantics<parallel>], iteration_bounds = array<i64: 1>, scalar_prefetch = 0 : i64, scratch_operands = 0 : i64, tpu.core_type = #tpu.core_type<tc>, window_params = [{transform_indices = @transform_0, window_bounds = array<i64: 8, 15>}, {pipeline_mode = #tpu.pipeline_mode<synchronous>, transform_indices = @transform_1, window_bounds = array<i64: 15, 16>}, {pipeline_mode = #tpu.pipeline_mode<synchronous>, transform_indices = @transform_2, window_bounds = array<i64: 15, 12>}, {pipeline_mode = #tpu.pipeline_mode<synchronous>, transform_indices = @transform_3, window_bounds = array<i64: 4, 16>}, {pipeline_mode = #tpu.pipeline_mode<synchronous>, transform_indices = @transform_4, window_bounds = array<i64: 1, 16>}, {pipeline_mode = #tpu.pipeline_mode<synchronous>, transform_indices = @transform_5, window_bounds = array<i64: 12, 12>}, {pipeline_mode = #tpu.pipeline_mode<synchronous>, transform_indices = @transform_6, window_bounds = array<i64: 12, 4>}, {pipeline_mode = #tpu.pipeline_mode<synchronous>, transform_indices = @transform_7, window_bounds = array<i64: 12, 4>}, {pipeline_mode = #tpu.pipeline_mode<synchronous>, transform_indices = @transform_8, window_bounds = array<i64: 4, 12>}, {pipeline_mode = #tpu.pipeline_mode<synchronous>, transform_indices = @transform_9, window_bounds = array<i64: 1, 16>}, {pipeline_mode = #tpu.pipeline_mode<synchronous>, transform_indices = @transform_10, window_bounds = array<i64: 1, 16>}, {transform_indices = @transform_11, window_bounds = array<i64: 8, 28>}]} {
    %c0 = arith.constant 0 : index
    %c0_0 = arith.constant 0 : index
    %0 = vector.load %arg1[%c0, %c0_0] : memref<8x15xf32, #tpu.memory_space<vmem>>, vector<8x15xf32>
    %c0_1 = arith.constant 0 : index
    %c0_2 = arith.constant 0 : index
    %1 = vector.load %arg3[%c0_1, %c0_2] : memref<15x12xbf16, #tpu.memory_space<vmem>>, vector<15x12xbf16>
    %2 = arith.truncf %0 : vector<8x15xf32> to vector<8x15xbf16>
    %cst = arith.constant dense<0.000000e+00> : vector<8x12xf32>
    %3 = tpu.matmul %2, %1, %cst {dimension_numbers = #tpu.dot_dimension_numbers<[1], [0], [0], [1], [0, 0, 1, 1], [], []>} : vector<8x15xbf16>, vector<15x12xbf16>, vector<8x12xf32> -> vector<8x12xf32>
    %c0_3 = arith.constant 0 : index
    %c0_4 = arith.constant 0 : index
    %4 = vector.load %arg2[%c0_3, %c0_4] : memref<15x16xbf16, #tpu.memory_space<vmem>>, vector<15x16xbf16>
    %5 = arith.truncf %0 : vector<8x15xf32> to vector<8x15xbf16>
    %cst_5 = arith.constant dense<0.000000e+00> : vector<8x16xf32>
    %6 = tpu.matmul %5, %4, %cst_5 {dimension_numbers = #tpu.dot_dimension_numbers<[1], [0], [0], [1], [0, 0, 1, 1], [], []>} : vector<8x15xbf16>, vector<15x16xbf16>, vector<8x16xf32> -> vector<8x16xf32>
    %7 = arith.mulf %3, %3 : vector<8x12xf32>
    %c0_6 = arith.constant 0 : index
    %c0_7 = arith.constant 0 : index
    %8 = vector.load %arg7[%c0_6, %c0_7] : memref<12x4xf32, #tpu.memory_space<vmem>>, vector<12x4xf32>
    %cst_8 = arith.constant dense<0.000000e+00> : vector<8x4xf32>
    %9 = tpu.matmul %7, %8, %cst_8 {dimension_numbers = #tpu.dot_dimension_numbers<[1], [0], [0], [1], [0, 0, 1, 1], [], []>} : vector<8x12xf32>, vector<12x4xf32>, vector<8x4xf32> -> vector<8x4xf32>
    %cst_9 = arith.constant 9.99999993E-9 : f32
    %10 = vector.broadcast %cst_9 : f32 to vector<8x4xf32>
    %11 = arith.maximumf %9, %10 : vector<8x4xf32>
    %12 = math.sqrt %11 : vector<8x4xf32>
    %c0_10 = arith.constant 0 : index
    %c0_11 = arith.constant 0 : index
    %13 = vector.load %arg4[%c0_10, %c0_11] : memref<4x16xbf16, #tpu.memory_space<vmem>>, vector<4x16xbf16>
    %14 = arith.truncf %12 : vector<8x4xf32> to vector<8x4xbf16>
    %cst_12 = arith.constant dense<0.000000e+00> : vector<8x16xf32>
    %15 = tpu.matmul %14, %13, %cst_12 {dimension_numbers = #tpu.dot_dimension_numbers<[1], [0], [0], [1], [0, 0, 1, 1], [], []>} : vector<8x4xbf16>, vector<4x16xbf16>, vector<8x16xf32> -> vector<8x16xf32>
    %16 = arith.addf %6, %15 : vector<8x16xf32>
    %c0_13 = arith.constant 0 : index
    %c0_14 = arith.constant 0 : index
    %17 = vector.load %arg5[%c0_13, %c0_14] : memref<1x16xf32, #tpu.memory_space<vmem>>, vector<1x16xf32>
    %18 = vector.broadcast %17 : vector<1x16xf32> to vector<8x16xf32>
    %19 = arith.addf %16, %18 : vector<8x16xf32>
    %c0_15 = arith.constant 0 : index
    %c0_16 = arith.constant 0 : index
    %20 = vector.load %arg6[%c0_15, %c0_16] : memref<12x12xbf16, #tpu.memory_space<vmem>>, vector<12x12xbf16>
    %21 = arith.truncf %3 : vector<8x12xf32> to vector<8x12xbf16>
    %cst_17 = arith.constant dense<0.000000e+00> : vector<8x12xf32>
    %22 = tpu.matmul %21, %20, %cst_17 {dimension_numbers = #tpu.dot_dimension_numbers<[1], [0], [0], [1], [0, 0, 1, 1], [], []>} : vector<8x12xbf16>, vector<12x12xbf16>, vector<8x12xf32> -> vector<8x12xf32>
    %23 = arith.mulf %22, %22 : vector<8x12xf32>
    %c0_18 = arith.constant 0 : index
    %c0_19 = arith.constant 0 : index
    %24 = vector.load %arg8[%c0_18, %c0_19] : memref<12x4xf32, #tpu.memory_space<vmem>>, vector<12x4xf32>
    %cst_20 = arith.constant dense<0.000000e+00> : vector<8x4xf32>
    %25 = tpu.matmul %23, %24, %cst_20 {dimension_numbers = #tpu.dot_dimension_numbers<[1], [0], [0], [1], [0, 0, 1, 1], [], []>} : vector<8x12xf32>, vector<12x4xf32>, vector<8x4xf32> -> vector<8x4xf32>
    %cst_21 = arith.constant 9.99999993E-9 : f32
    %26 = vector.broadcast %cst_21 : f32 to vector<8x4xf32>
    %27 = arith.maximumf %25, %26 : vector<8x4xf32>
    %cst_22 = arith.constant dense<0.000000e+00> : vector<8xf32>
    %28 = vector.multi_reduction <add>, %27, %cst_22 [1] : vector<8x4xf32> to vector<8xf32>
    %29 = vector.shape_cast %28 : vector<8xf32> to vector<8x1xf32>
    %cst_23 = arith.constant 4.000000e+00 : f32
    %30 = vector.broadcast %cst_23 : f32 to vector<8x1xf32>
    %31 = arith.divf %29, %30 : vector<8x1xf32>
    %32 = math.rsqrt %31 : vector<8x1xf32>
    %33 = vector.broadcast %32 : vector<8x1xf32> to vector<8x12xf32>
    %34 = arith.mulf %22, %33 : vector<8x12xf32>
    %cst_24 = arith.constant dense<0.000000e+00> : vector<8xf32>
    %35 = vector.multi_reduction <add>, %19, %cst_24 [1] : vector<8x16xf32> to vector<8xf32>
    %36 = vector.shape_cast %35 : vector<8xf32> to vector<8x1xf32>
    %cst_25 = arith.constant 1.600000e+01 : f32
    %37 = vector.broadcast %cst_25 : f32 to vector<8x1xf32>
    %38 = arith.divf %36, %37 : vector<8x1xf32>
    %39 = vector.broadcast %38 : vector<8x1xf32> to vector<8x16xf32>
    %40 = arith.subf %19, %39 : vector<8x16xf32>
    %41 = arith.mulf %40, %40 : vector<8x16xf32>
    %cst_26 = arith.constant dense<0.000000e+00> : vector<8xf32>
    %42 = vector.multi_reduction <add>, %41, %cst_26 [1] : vector<8x16xf32> to vector<8xf32>
    %43 = vector.shape_cast %42 : vector<8xf32> to vector<8x1xf32>
    %cst_27 = arith.constant 1.600000e+01 : f32
    %44 = vector.broadcast %cst_27 : f32 to vector<8x1xf32>
    %45 = arith.divf %43, %44 : vector<8x1xf32>
    %46 = vector.broadcast %38 : vector<8x1xf32> to vector<8x16xf32>
    %47 = arith.subf %19, %46 : vector<8x16xf32>
    %cst_28 = arith.constant 9.99999974E-6 : f32
    %48 = vector.broadcast %cst_28 : f32 to vector<8x1xf32>
    %49 = arith.addf %45, %48 : vector<8x1xf32>
    %50 = math.rsqrt %49 : vector<8x1xf32>
    %51 = vector.broadcast %50 : vector<8x1xf32> to vector<8x16xf32>
    %52 = arith.mulf %47, %51 : vector<8x16xf32>
    %c0_29 = arith.constant 0 : index
    %c0_30 = arith.constant 0 : index
    %53 = vector.load %arg10[%c0_29, %c0_30] : memref<1x16xf32, #tpu.memory_space<vmem>>, vector<1x16xf32>
    %54 = vector.broadcast %53 : vector<1x16xf32> to vector<8x16xf32>
    %55 = arith.mulf %52, %54 : vector<8x16xf32>
    %c0_31 = arith.constant 0 : index
    %c0_32 = arith.constant 0 : index
    %56 = vector.load %arg11[%c0_31, %c0_32] : memref<1x16xf32, #tpu.memory_space<vmem>>, vector<1x16xf32>
    %57 = vector.broadcast %56 : vector<1x16xf32> to vector<8x16xf32>
    %58 = arith.addf %55, %57 : vector<8x16xf32>
    %59 = tpu.concatenate %58, %34 in 1 : vector<8x16xf32>, vector<8x12xf32> -> vector<8x28xf32>
    %c0_33 = arith.constant 0 : index
    %c0_34 = arith.constant 0 : index
    %60 = vector.load %arg12[%c0_33, %c0_34] : memref<8x28xf32, #tpu.memory_space<vmem>>, vector<8x28xf32>
    tpu.vector_store %arg12[%c0_33, %c0_34], %59 {strides = array<i32>} : memref<8x28xf32, #tpu.memory_space<vmem>>, vector<8x28xf32>,
    return
  }
  func.func @transform_0(%arg0: i32) -> (i32, i32) {
    %c0_i32 = arith.constant 0 : i32
    %c0_i32_0 = arith.constant 0 : i32
    return %arg0, %c0_i32 : i32, i32
  }
  func.func @transform_1(%arg0: i32) -> (i32, i32) {
    %c0_i32 = arith.constant 0 : i32
    %c0_i32_0 = arith.constant 0 : i32
    %c0_i32_1 = arith.constant 0 : i32
    return %c0_i32, %c0_i32_0 : i32, i32
  }
  func.func @transform_2(%arg0: i32) -> (i32, i32) {
    %c0_i32 = arith.constant 0 : i32
    %c0_i32_0 = arith.constant 0 : i32
    %c0_i32_1 = arith.constant 0 : i32
    return %c0_i32, %c0_i32_0 : i32, i32
  }
  func.func @transform_3(%arg0: i32) -> (i32, i32) {
    %c0_i32 = arith.constant 0 : i32
    %c0_i32_0 = arith.constant 0 : i32
    %c0_i32_1 = arith.constant 0 : i32
    return %c0_i32, %c0_i32_0 : i32, i32
  }
  func.func @transform_4(%arg0: i32) -> (i32, i32) {
    %c0_i32 = arith.constant 0 : i32
    %c0_i32_0 = arith.constant 0 : i32
    %c0_i32_1 = arith.constant 0 : i32
    return %c0_i32, %c0_i32_0 : i32, i32
  }
  func.func @transform_5(%arg0: i32) -> (i32, i32) {
    %c0_i32 = arith.constant 0 : i32
    %c0_i32_0 = arith.constant 0 : i32
    %c0_i32_1 = arith.constant 0 : i32
    return %c0_i32, %c0_i32_0 : i32, i32
  }
  func.func @transform_6(%arg0: i32) -> (i32, i32) {
    %c0_i32 = arith.constant 0 : i32
    %c0_i32_0 = arith.constant 0 : i32
    %c0_i32_1 = arith.constant 0 : i32
    return %c0_i32, %c0_i32_0 : i32, i32
  }
  func.func @transform_7(%arg0: i32) -> (i32, i32) {
    %c0_i32 = arith.constant 0 : i32
    %c0_i32_0 = arith.constant 0 : i32
    %c0_i32_1 = arith.constant 0 : i32
    return %c0_i32, %c0_i32_0 : i32, i32
  }
  func.func @transform_8(%arg0: i32) -> (i32, i32) {
    %c0_i32 = arith.constant 0 : i32
    %c0_i32_0 = arith.constant 0 : i32
    %c0_i32_1 = arith.constant 0 : i32
    return %c0_i32, %c0_i32_0 : i32, i32
  }
  func.func @transform_9(%arg0: i32) -> (i32, i32) {
    %c0_i32 = arith.constant 0 : i32
    %c0_i32_0 = arith.constant 0 : i32
    %c0_i32_1 = arith.constant 0 : i32
    return %c0_i32, %c0_i32_0 : i32, i32
  }
  func.func @transform_10(%arg0: i32) -> (i32, i32) {
    %c0_i32 = arith.constant 0 : i32
    %c0_i32_0 = arith.constant 0 : i32
    %c0_i32_1 = arith.constant 0 : i32
    return %c0_i32, %c0_i32_0 : i32, i32
  }
  func.func @transform_11(%arg0: i32) -> (i32, i32) {
    %c0_i32 = arith.constant 0 : i32
    %c0_i32_0 = arith.constant 0 : i32
    return %arg0, %c0_i32 : i32, i32
  }
}

module attributes {stable_mosaic.version = 11 : i64} {
  func.func @_gvp_cell_kernel(%arg0: i32, %arg1: memref<16x28xf32, #tpu.memory_space<vmem>>, %arg2: memref<16x21xf32, #tpu.memory_space<vmem>>, %arg3: memref<28x16xbf16, #tpu.memory_space<vmem>>, %arg4: memref<21x16xbf16, #tpu.memory_space<vmem>>, %arg5: memref<28x21xbf16, #tpu.memory_space<vmem>>, %arg6: memref<21x21xbf16, #tpu.memory_space<vmem>>, %arg7: memref<7x16xbf16, #tpu.memory_space<vmem>>, %arg8: memref<1x16xf32, #tpu.memory_space<vmem>>, %arg9: memref<21x12xbf16, #tpu.memory_space<vmem>>, %arg10: memref<21x7xf32, #tpu.memory_space<vmem>>, %arg11: memref<12x4xf32, #tpu.memory_space<vmem>>, %arg12: memref<4x12xf32, #tpu.memory_space<vmem>>, %arg13: memref<1x16xf32, #tpu.memory_space<vmem>>, %arg14: memref<1x16xf32, #tpu.memory_space<vmem>>, %arg15: memref<16x16xbf16, #tpu.memory_space<vmem>>, %arg16: memref<12x12xbf16, #tpu.memory_space<vmem>>, %arg17: memref<4x16xbf16, #tpu.memory_space<vmem>>, %arg18: memref<1x16xf32, #tpu.memory_space<vmem>>, %arg19: memref<12x12xbf16, #tpu.memory_space<vmem>>, %arg20: memref<12x4xf32, #tpu.memory_space<vmem>>, %arg21: memref<12x4xf32, #tpu.memory_space<vmem>>, %arg22: memref<4x12xf32, #tpu.memory_space<vmem>>, %arg23: memref<1x16xf32, #tpu.memory_space<vmem>>, %arg24: memref<1x16xf32, #tpu.memory_space<vmem>>, %arg25: memref<16x28xf32, #tpu.memory_space<vmem>>) attributes {dimension_semantics = [#tpu.dimension_semantics<parallel>], iteration_bounds = array<i64: 1>, scalar_prefetch = 0 : i64, scratch_operands = 0 : i64, tpu.core_type = #tpu.core_type<tc>, window_params = [{transform_indices = @transform_0, window_bounds = array<i64: 16, 28>}, {transform_indices = @transform_1, window_bounds = array<i64: 16, 21>}, {pipeline_mode = #tpu.pipeline_mode<synchronous>, transform_indices = @transform_2, window_bounds = array<i64: 28, 16>}, {pipeline_mode = #tpu.pipeline_mode<synchronous>, transform_indices = @transform_3, window_bounds = array<i64: 21, 16>}, {pipeline_mode = #tpu.pipeline_mode<synchronous>, transform_indices = @transform_4, window_bounds = array<i64: 28, 21>}, {pipeline_mode = #tpu.pipeline_mode<synchronous>, transform_indices = @transform_5, window_bounds = array<i64: 21, 21>}, {pipeline_mode = #tpu.pipeline_mode<synchronous>, transform_indices = @transform_6, window_bounds = array<i64: 7, 16>}, {pipeline_mode = #tpu.pipeline_mode<synchronous>, transform_indices = @transform_7, window_bounds = array<i64: 1, 16>}, {pipeline_mode = #tpu.pipeline_mode<synchronous>, transform_indices = @transform_8, window_bounds = array<i64: 21, 12>}, {pipeline_mode = #tpu.pipeline_mode<synchronous>, transform_indices = @transform_9, window_bounds = array<i64: 21, 7>}, {pipeline_mode = #tpu.pipeline_mode<synchronous>, transform_indices = @transform_10, window_bounds = array<i64: 12, 4>}, {pipeline_mode = #tpu.pipeline_mode<synchronous>, transform_indices = @transform_11, window_bounds = array<i64: 4, 12>}, {pipeline_mode = #tpu.pipeline_mode<synchronous>, transform_indices = @transform_12, window_bounds = array<i64: 1, 16>}, {pipeline_mode = #tpu.pipeline_mode<synchronous>, transform_indices = @transform_13, window_bounds = array<i64: 1, 16>}, {pipeline_mode = #tpu.pipeline_mode<synchronous>, transform_indices = @transform_14, window_bounds = array<i64: 16, 16>}, {pipeline_mode = #tpu.pipeline_mode<synchronous>, transform_indices = @transform_15, window_bounds = array<i64: 12, 12>}, {pipeline_mode = #tpu.pipeline_mode<synchronous>, transform_indices = @transform_16, window_bounds = array<i64: 4, 16>}, {pipeline_mode = #tpu.pipeline_mode<synchronous>, transform_indices = @transform_17, window_bounds = array<i64: 1, 16>}, {pipeline_mode = #tpu.pipeline_mode<synchronous>, transform_indices = @transform_18, window_bounds = array<i64: 12, 12>}, {pipeline_mode = #tpu.pipeline_mode<synchronous>, transform_indices = @transform_19, window_bounds = array<i64: 12, 4>}, {pipeline_mode = #tpu.pipeline_mode<synchronous>, transform_indices = @transform_20, window_bounds = array<i64: 12, 4>}, {pipeline_mode = #tpu.pipeline_mode<synchronous>, transform_indices = @transform_21, window_bounds = array<i64: 4, 12>}, {pipeline_mode = #tpu.pipeline_mode<synchronous>, transform_indices = @transform_22, window_bounds = array<i64: 1, 16>}, {pipeline_mode = #tpu.pipeline_mode<synchronous>, transform_indices = @transform_23, window_bounds = array<i64: 1, 16>}, {transform_indices = @transform_24, window_bounds = array<i64: 16, 28>}]} {
    %c0 = arith.constant 0 : index
    %c0_0 = arith.constant 0 : index
    %0 = vector.load %arg1[%c0, %c0_0] : memref<16x28xf32, #tpu.memory_space<vmem>>, vector<16x28xf32>
    %c0_1 = arith.constant 0 : index
    %c0_2 = arith.constant 0 : index
    %1 = vector.load %arg2[%c0_1, %c0_2] : memref<16x21xf32, #tpu.memory_space<vmem>>, vector<16x21xf32>
    %c0_3 = arith.constant 0 : index
    %c0_4 = arith.constant 0 : index
    %2 = vector.load %arg5[%c0_3, %c0_4] : memref<28x21xbf16, #tpu.memory_space<vmem>>, vector<28x21xbf16>
    %3 = arith.truncf %0 : vector<16x28xf32> to vector<16x28xbf16>
    %cst = arith.constant dense<0.000000e+00> : vector<16x21xf32>
    %4 = tpu.matmul %3, %2, %cst {dimension_numbers = #tpu.dot_dimension_numbers<[1], [0], [0], [1], [0, 0, 1, 1], [], []>} : vector<16x28xbf16>, vector<28x21xbf16>, vector<16x21xf32> -> vector<16x21xf32>
    %c0_5 = arith.constant 0 : index
    %c0_6 = arith.constant 0 : index
    %5 = vector.load %arg3[%c0_5, %c0_6] : memref<28x16xbf16, #tpu.memory_space<vmem>>, vector<28x16xbf16>
    %6 = arith.truncf %0 : vector<16x28xf32> to vector<16x28xbf16>
    %cst_7 = arith.constant dense<0.000000e+00> : vector<16x16xf32>
    %7 = tpu.matmul %6, %5, %cst_7 {dimension_numbers = #tpu.dot_dimension_numbers<[1], [0], [0], [1], [0, 0, 1, 1], [], []>} : vector<16x28xbf16>, vector<28x16xbf16>, vector<16x16xf32> -> vector<16x16xf32>
    %c0_8 = arith.constant 0 : index
    %c0_9 = arith.constant 0 : index
    %8 = vector.load %arg6[%c0_8, %c0_9] : memref<21x21xbf16, #tpu.memory_space<vmem>>, vector<21x21xbf16>
    %9 = arith.truncf %1 : vector<16x21xf32> to vector<16x21xbf16>
    %cst_10 = arith.constant dense<0.000000e+00> : vector<16x21xf32>
    %10 = tpu.matmul %9, %8, %cst_10 {dimension_numbers = #tpu.dot_dimension_numbers<[1], [0], [0], [1], [0, 0, 1, 1], [], []>} : vector<16x21xbf16>, vector<21x21xbf16>, vector<16x21xf32> -> vector<16x21xf32>
    %11 = arith.addf %4, %10 : vector<16x21xf32>
    %c0_11 = arith.constant 0 : index
    %c0_12 = arith.constant 0 : index
    %12 = vector.load %arg4[%c0_11, %c0_12] : memref<21x16xbf16, #tpu.memory_space<vmem>>, vector<21x16xbf16>
    %13 = arith.truncf %1 : vector<16x21xf32> to vector<16x21xbf16>
    %cst_13 = arith.constant dense<0.000000e+00> : vector<16x16xf32>
    %14 = tpu.matmul %13, %12, %cst_13 {dimension_numbers = #tpu.dot_dimension_numbers<[1], [0], [0], [1], [0, 0, 1, 1], [], []>} : vector<16x21xbf16>, vector<21x16xbf16>, vector<16x16xf32> -> vector<16x16xf32>
    %15 = arith.addf %7, %14 : vector<16x16xf32>
    %16 = arith.mulf %11, %11 : vector<16x21xf32>
    %c0_14 = arith.constant 0 : index
    %c0_15 = arith.constant 0 : index
    %17 = vector.load %arg10[%c0_14, %c0_15] : memref<21x7xf32, #tpu.memory_space<vmem>>, vector<21x7xf32>
    %cst_16 = arith.constant dense<0.000000e+00> : vector<16x7xf32>
    %18 = tpu.matmul %16, %17, %cst_16 {dimension_numbers = #tpu.dot_dimension_numbers<[1], [0], [0], [1], [0, 0, 1, 1], [], []>} : vector<16x21xf32>, vector<21x7xf32>, vector<16x7xf32> -> vector<16x7xf32>
    %cst_17 = arith.constant 9.99999993E-9 : f32
    %19 = vector.broadcast %cst_17 : f32 to vector<16x7xf32>
    %20 = arith.maximumf %18, %19 : vector<16x7xf32>
    %21 = math.sqrt %20 : vector<16x7xf32>
    %c0_18 = arith.constant 0 : index
    %c0_19 = arith.constant 0 : index
    %22 = vector.load %arg7[%c0_18, %c0_19] : memref<7x16xbf16, #tpu.memory_space<vmem>>, vector<7x16xbf16>
    %23 = arith.truncf %21 : vector<16x7xf32> to vector<16x7xbf16>
    %cst_20 = arith.constant dense<0.000000e+00> : vector<16x16xf32>
    %24 = tpu.matmul %23, %22, %cst_20 {dimension_numbers = #tpu.dot_dimension_numbers<[1], [0], [0], [1], [0, 0, 1, 1], [], []>} : vector<16x7xbf16>, vector<7x16xbf16>, vector<16x16xf32> -> vector<16x16xf32>
    %25 = arith.addf %15, %24 : vector<16x16xf32>
    %c0_21 = arith.constant 0 : index
    %c0_22 = arith.constant 0 : index
    %26 = vector.load %arg8[%c0_21, %c0_22] : memref<1x16xf32, #tpu.memory_space<vmem>>, vector<1x16xf32>
    %27 = vector.broadcast %26 : vector<1x16xf32> to vector<16x16xf32>
    %28 = arith.addf %25, %27 : vector<16x16xf32>
    %c0_23 = arith.constant 0 : index
    %c0_24 = arith.constant 0 : index
    %29 = vector.load %arg9[%c0_23, %c0_24] : memref<21x12xbf16, #tpu.memory_space<vmem>>, vector<21x12xbf16>
    %30 = arith.truncf %11 : vector<16x21xf32> to vector<16x21xbf16>
    %cst_25 = arith.constant dense<0.000000e+00> : vector<16x12xf32>
    %31 = tpu.matmul %30, %29, %cst_25 {dimension_numbers = #tpu.dot_dimension_numbers<[1], [0], [0], [1], [0, 0, 1, 1], [], []>} : vector<16x21xbf16>, vector<21x12xbf16>, vector<16x12xf32> -> vector<16x12xf32>
    %32 = arith.mulf %31, %31 : vector<16x12xf32>
    %c0_26 = arith.constant 0 : index
    %c0_27 = arith.constant 0 : index
    %33 = vector.load %arg11[%c0_26, %c0_27] : memref<12x4xf32, #tpu.memory_space<vmem>>, vector<12x4xf32>
    %cst_28 = arith.constant dense<0.000000e+00> : vector<16x4xf32>
    %34 = tpu.matmul %32, %33, %cst_28 {dimension_numbers = #tpu.dot_dimension_numbers<[1], [0], [0], [1], [0, 0, 1, 1], [], []>} : vector<16x12xf32>, vector<12x4xf32>, vector<16x4xf32> -> vector<16x4xf32>
    %cst_29 = arith.constant 9.99999993E-9 : f32
    %35 = vector.broadcast %cst_29 : f32 to vector<16x4xf32>
    %36 = arith.maximumf %34, %35 : vector<16x4xf32>
    %37 = math.sqrt %36 : vector<16x4xf32>
    %38 = arith.negf %37 : vector<16x4xf32>
    %39 = math.exp %38 : vector<16x4xf32>
    %cst_30 = arith.constant 1.000000e+00 : f32
    %40 = vector.broadcast %cst_30 : f32 to vector<16x4xf32>
    %41 = arith.addf %40, %39 : vector<16x4xf32>
    %42 = arith.divf %40, %41 : vector<16x4xf32>
    %c0_31 = arith.constant 0 : index
    %c0_32 = arith.constant 0 : index
    %43 = vector.load %arg12[%c0_31, %c0_32] : memref<4x12xf32, #tpu.memory_space<vmem>>, vector<4x12xf32>
    %cst_33 = arith.constant dense<0.000000e+00> : vector<16x12xf32>
    %44 = tpu.matmul %42, %43, %cst_33 {dimension_numbers = #tpu.dot_dimension_numbers<[1], [0], [0], [1], [0, 0, 1, 1], [], []>} : vector<16x4xf32>, vector<4x12xf32>, vector<16x12xf32> -> vector<16x12xf32>
    %45 = arith.mulf %31, %44 : vector<16x12xf32>
    %cst_34 = arith.constant 0.000000e+00 : f32
    %cst_35 = arith.constant 6.000000e+00 : f32
    %46 = vector.broadcast %cst_34 : f32 to vector<16x16xf32>
    %47 = arith.maximumf %46, %28 : vector<16x16xf32>
    %48 = vector.broadcast %cst_35 : f32 to vector<16x16xf32>
    %49 = arith.minimumf %48, %47 : vector<16x16xf32>
    %50 = arith.mulf %45, %45 : vector<16x12xf32>
    %c0_36 = arith.constant 0 : index
    %c0_37 = arith.constant 0 : index
    %51 = vector.load %arg11[%c0_36, %c0_37] : memref<12x4xf32, #tpu.memory_space<vmem>>, vector<12x4xf32>
    %cst_38 = arith.constant dense<0.000000e+00> : vector<16x4xf32>
    %52 = tpu.matmul %50, %51, %cst_38 {dimension_numbers = #tpu.dot_dimension_numbers<[1], [0], [0], [1], [0, 0, 1, 1], [], []>} : vector<16x12xf32>, vector<12x4xf32>, vector<16x4xf32> -> vector<16x4xf32>
    %cst_39 = arith.constant 9.99999993E-9 : f32
    %53 = vector.broadcast %cst_39 : f32 to vector<16x4xf32>
    %54 = arith.maximumf %52, %53 : vector<16x4xf32>
    %cst_40 = arith.constant dense<0.000000e+00> : vector<16xf32>
    %55 = vector.multi_reduction <add>, %54, %cst_40 [1] : vector<16x4xf32> to vector<16xf32>
    %56 = vector.shape_cast %55 : vector<16xf32> to vector<16x1xf32>
    %cst_41 = arith.constant 4.000000e+00 : f32
    %57 = vector.broadcast %cst_41 : f32 to vector<16x1xf32>
    %58 = arith.divf %56, %57 : vector<16x1xf32>
    %59 = math.rsqrt %58 : vector<16x1xf32>
    %60 = vector.broadcast %59 : vector<16x1xf32> to vector<16x12xf32>
    %61 = arith.mulf %45, %60 : vector<16x12xf32>
    %cst_42 = arith.constant dense<0.000000e+00> : vector<16xf32>
    %62 = vector.multi_reduction <add>, %49, %cst_42 [1] : vector<16x16xf32> to vector<16xf32>
    %63 = vector.shape_cast %62 : vector<16xf32> to vector<16x1xf32>
    %cst_43 = arith.constant 1.600000e+01 : f32
    %64 = vector.broadcast %cst_43 : f32 to vector<16x1xf32>
    %65 = arith.divf %63, %64 : vector<16x1xf32>
    %66 = vector.broadcast %65 : vector<16x1xf32> to vector<16x16xf32>
    %67 = arith.subf %49, %66 : vector<16x16xf32>
    %68 = arith.mulf %67, %67 : vector<16x16xf32>
    %cst_44 = arith.constant dense<0.000000e+00> : vector<16xf32>
    %69 = vector.multi_reduction <add>, %68, %cst_44 [1] : vector<16x16xf32> to vector<16xf32>
    %70 = vector.shape_cast %69 : vector<16xf32> to vector<16x1xf32>
    %cst_45 = arith.constant 1.600000e+01 : f32
    %71 = vector.broadcast %cst_45 : f32 to vector<16x1xf32>
    %72 = arith.divf %70, %71 : vector<16x1xf32>
    %73 = vector.broadcast %65 : vector<16x1xf32> to vector<16x16xf32>
    %74 = arith.subf %49, %73 : vector<16x16xf32>
    %cst_46 = arith.constant 9.99999974E-6 : f32
    %75 = vector.broadcast %cst_46 : f32 to vector<16x1xf32>
    %76 = arith.addf %72, %75 : vector<16x1xf32>
    %77 = math.rsqrt %76 : vector<16x1xf32>
    %78 = vector.broadcast %77 : vector<16x1xf32> to vector<16x16xf32>
    %79 = arith.mulf %74, %78 : vector<16x16xf32>
    %c0_47 = arith.constant 0 : index
    %c0_48 = arith.constant 0 : index
    %80 = vector.load %arg13[%c0_47, %c0_48] : memref<1x16xf32, #tpu.memory_space<vmem>>, vector<1x16xf32>
    %81 = vector.broadcast %80 : vector<1x16xf32> to vector<16x16xf32>
    %82 = arith.mulf %79, %81 : vector<16x16xf32>
    %c0_49 = arith.constant 0 : index
    %c0_50 = arith.constant 0 : index
    %83 = vector.load %arg14[%c0_49, %c0_50] : memref<1x16xf32, #tpu.memory_space<vmem>>, vector<1x16xf32>
    %84 = vector.broadcast %83 : vector<1x16xf32> to vector<16x16xf32>
    %85 = arith.addf %82, %84 : vector<16x16xf32>
    %c0_51 = arith.constant 0 : index
    %c0_52 = arith.constant 0 : index
    %86 = vector.load %arg16[%c0_51, %c0_52] : memref<12x12xbf16, #tpu.memory_space<vmem>>, vector<12x12xbf16>
    %87 = arith.truncf %61 : vector<16x12xf32> to vector<16x12xbf16>
    %cst_53 = arith.constant dense<0.000000e+00> : vector<16x12xf32>
    %88 = tpu.matmul %87, %86, %cst_53 {dimension_numbers = #tpu.dot_dimension_numbers<[1], [0], [0], [1], [0, 0, 1, 1], [], []>} : vector<16x12xbf16>, vector<12x12xbf16>, vector<16x12xf32> -> vector<16x12xf32>
    %c0_54 = arith.constant 0 : index
    %c0_55 = arith.constant 0 : index
    %89 = vector.load %arg15[%c0_54, %c0_55] : memref<16x16xbf16, #tpu.memory_space<vmem>>, vector<16x16xbf16>
    %90 = arith.truncf %85 : vector<16x16xf32> to vector<16x16xbf16>
    %cst_56 = arith.constant dense<0.000000e+00> : vector<16x16xf32>
    %91 = tpu.matmul %90, %89, %cst_56 {dimension_numbers = #tpu.dot_dimension_numbers<[1], [0], [0], [1], [0, 0, 1, 1], [], []>} : vector<16x16xbf16>, vector<16x16xbf16>, vector<16x16xf32> -> vector<16x16xf32>
    %92 = arith.mulf %88, %88 : vector<16x12xf32>
    %c0_57 = arith.constant 0 : index
    %c0_58 = arith.constant 0 : index
    %93 = vector.load %arg20[%c0_57, %c0_58] : memref<12x4xf32, #tpu.memory_space<vmem>>, vector<12x4xf32>
    %cst_59 = arith.constant dense<0.000000e+00> : vector<16x4xf32>
    %94 = tpu.matmul %92, %93, %cst_59 {dimension_numbers = #tpu.dot_dimension_numbers<[1], [0], [0], [1], [0, 0, 1, 1], [], []>} : vector<16x12xf32>, vector<12x4xf32>, vector<16x4xf32> -> vector<16x4xf32>
    %cst_60 = arith.constant 9.99999993E-9 : f32
    %95 = vector.broadcast %cst_60 : f32 to vector<16x4xf32>
    %96 = arith.maximumf %94, %95 : vector<16x4xf32>
    %97 = math.sqrt %96 : vector<16x4xf32>
    %c0_61 = arith.constant 0 : index
    %c0_62 = arith.constant 0 : index
    %98 = vector.load %arg17[%c0_61, %c0_62] : memref<4x16xbf16, #tpu.memory_space<vmem>>, vector<4x16xbf16>
    %99 = arith.truncf %97 : vector<16x4xf32> to vector<16x4xbf16>
    %cst_63 = arith.constant dense<0.000000e+00> : vector<16x16xf32>
    %100 = tpu.matmul %99, %98, %cst_63 {dimension_numbers = #tpu.dot_dimension_numbers<[1], [0], [0], [1], [0, 0, 1, 1], [], []>} : vector<16x4xbf16>, vector<4x16xbf16>, vector<16x16xf32> -> vector<16x16xf32>
    %101 = arith.addf %91, %100 : vector<16x16xf32>
    %c0_64 = arith.constant 0 : index
    %c0_65 = arith.constant 0 : index
    %102 = vector.load %arg18[%c0_64, %c0_65] : memref<1x16xf32, #tpu.memory_space<vmem>>, vector<1x16xf32>
    %103 = vector.broadcast %102 : vector<1x16xf32> to vector<16x16xf32>
    %104 = arith.addf %101, %103 : vector<16x16xf32>
    %c0_66 = arith.constant 0 : index
    %c0_67 = arith.constant 0 : index
    %105 = vector.load %arg19[%c0_66, %c0_67] : memref<12x12xbf16, #tpu.memory_space<vmem>>, vector<12x12xbf16>
    %106 = arith.truncf %88 : vector<16x12xf32> to vector<16x12xbf16>
    %cst_68 = arith.constant dense<0.000000e+00> : vector<16x12xf32>
    %107 = tpu.matmul %106, %105, %cst_68 {dimension_numbers = #tpu.dot_dimension_numbers<[1], [0], [0], [1], [0, 0, 1, 1], [], []>} : vector<16x12xbf16>, vector<12x12xbf16>, vector<16x12xf32> -> vector<16x12xf32>
    %108 = arith.mulf %107, %107 : vector<16x12xf32>
    %c0_69 = arith.constant 0 : index
    %c0_70 = arith.constant 0 : index
    %109 = vector.load %arg21[%c0_69, %c0_70] : memref<12x4xf32, #tpu.memory_space<vmem>>, vector<12x4xf32>
    %cst_71 = arith.constant dense<0.000000e+00> : vector<16x4xf32>
    %110 = tpu.matmul %108, %109, %cst_71 {dimension_numbers = #tpu.dot_dimension_numbers<[1], [0], [0], [1], [0, 0, 1, 1], [], []>} : vector<16x12xf32>, vector<12x4xf32>, vector<16x4xf32> -> vector<16x4xf32>
    %cst_72 = arith.constant 9.99999993E-9 : f32
    %111 = vector.broadcast %cst_72 : f32 to vector<16x4xf32>
    %112 = arith.maximumf %110, %111 : vector<16x4xf32>
    %113 = math.sqrt %112 : vector<16x4xf32>
    %114 = arith.negf %113 : vector<16x4xf32>
    %115 = math.exp %114 : vector<16x4xf32>
    %cst_73 = arith.constant 1.000000e+00 : f32
    %116 = vector.broadcast %cst_73 : f32 to vector<16x4xf32>
    %117 = arith.addf %116, %115 : vector<16x4xf32>
    %118 = arith.divf %116, %117 : vector<16x4xf32>
    %c0_74 = arith.constant 0 : index
    %c0_75 = arith.constant 0 : index
    %119 = vector.load %arg22[%c0_74, %c0_75] : memref<4x12xf32, #tpu.memory_space<vmem>>, vector<4x12xf32>
    %cst_76 = arith.constant dense<0.000000e+00> : vector<16x12xf32>
    %120 = tpu.matmul %118, %119, %cst_76 {dimension_numbers = #tpu.dot_dimension_numbers<[1], [0], [0], [1], [0, 0, 1, 1], [], []>} : vector<16x4xf32>, vector<4x12xf32>, vector<16x12xf32> -> vector<16x12xf32>
    %121 = arith.mulf %107, %120 : vector<16x12xf32>
    %cst_77 = arith.constant 0.000000e+00 : f32
    %cst_78 = arith.constant 6.000000e+00 : f32
    %122 = vector.broadcast %cst_77 : f32 to vector<16x16xf32>
    %123 = arith.maximumf %122, %104 : vector<16x16xf32>
    %124 = vector.broadcast %cst_78 : f32 to vector<16x16xf32>
    %125 = arith.minimumf %124, %123 : vector<16x16xf32>
    %126 = arith.mulf %121, %121 : vector<16x12xf32>
    %c0_79 = arith.constant 0 : index
    %c0_80 = arith.constant 0 : index
    %127 = vector.load %arg21[%c0_79, %c0_80] : memref<12x4xf32, #tpu.memory_space<vmem>>, vector<12x4xf32>
    %cst_81 = arith.constant dense<0.000000e+00> : vector<16x4xf32>
    %128 = tpu.matmul %126, %127, %cst_81 {dimension_numbers = #tpu.dot_dimension_numbers<[1], [0], [0], [1], [0, 0, 1, 1], [], []>} : vector<16x12xf32>, vector<12x4xf32>, vector<16x4xf32> -> vector<16x4xf32>
    %cst_82 = arith.constant 9.99999993E-9 : f32
    %129 = vector.broadcast %cst_82 : f32 to vector<16x4xf32>
    %130 = arith.maximumf %128, %129 : vector<16x4xf32>
    %cst_83 = arith.constant dense<0.000000e+00> : vector<16xf32>
    %131 = vector.multi_reduction <add>, %130, %cst_83 [1] : vector<16x4xf32> to vector<16xf32>
    %132 = vector.shape_cast %131 : vector<16xf32> to vector<16x1xf32>
    %cst_84 = arith.constant 4.000000e+00 : f32
    %133 = vector.broadcast %cst_84 : f32 to vector<16x1xf32>
    %134 = arith.divf %132, %133 : vector<16x1xf32>
    %135 = math.rsqrt %134 : vector<16x1xf32>
    %136 = vector.broadcast %135 : vector<16x1xf32> to vector<16x12xf32>
    %137 = arith.mulf %121, %136 : vector<16x12xf32>
    %cst_85 = arith.constant dense<0.000000e+00> : vector<16xf32>
    %138 = vector.multi_reduction <add>, %125, %cst_85 [1] : vector<16x16xf32> to vector<16xf32>
    %139 = vector.shape_cast %138 : vector<16xf32> to vector<16x1xf32>
    %cst_86 = arith.constant 1.600000e+01 : f32
    %140 = vector.broadcast %cst_86 : f32 to vector<16x1xf32>
    %141 = arith.divf %139, %140 : vector<16x1xf32>
    %142 = vector.broadcast %141 : vector<16x1xf32> to vector<16x16xf32>
    %143 = arith.subf %125, %142 : vector<16x16xf32>
    %144 = arith.mulf %143, %143 : vector<16x16xf32>
    %cst_87 = arith.constant dense<0.000000e+00> : vector<16xf32>
    %145 = vector.multi_reduction <add>, %144, %cst_87 [1] : vector<16x16xf32> to vector<16xf32>
    %146 = vector.shape_cast %145 : vector<16xf32> to vector<16x1xf32>
    %cst_88 = arith.constant 1.600000e+01 : f32
    %147 = vector.broadcast %cst_88 : f32 to vector<16x1xf32>
    %148 = arith.divf %146, %147 : vector<16x1xf32>
    %149 = vector.broadcast %141 : vector<16x1xf32> to vector<16x16xf32>
    %150 = arith.subf %125, %149 : vector<16x16xf32>
    %cst_89 = arith.constant 9.99999974E-6 : f32
    %151 = vector.broadcast %cst_89 : f32 to vector<16x1xf32>
    %152 = arith.addf %148, %151 : vector<16x1xf32>
    %153 = math.rsqrt %152 : vector<16x1xf32>
    %154 = vector.broadcast %153 : vector<16x1xf32> to vector<16x16xf32>
    %155 = arith.mulf %150, %154 : vector<16x16xf32>
    %c0_90 = arith.constant 0 : index
    %c0_91 = arith.constant 0 : index
    %156 = vector.load %arg23[%c0_90, %c0_91] : memref<1x16xf32, #tpu.memory_space<vmem>>, vector<1x16xf32>
    %157 = vector.broadcast %156 : vector<1x16xf32> to vector<16x16xf32>
    %158 = arith.mulf %155, %157 : vector<16x16xf32>
    %c0_92 = arith.constant 0 : index
    %c0_93 = arith.constant 0 : index
    %159 = vector.load %arg24[%c0_92, %c0_93] : memref<1x16xf32, #tpu.memory_space<vmem>>, vector<1x16xf32>
    %160 = vector.broadcast %159 : vector<1x16xf32> to vector<16x16xf32>
    %161 = arith.addf %158, %160 : vector<16x16xf32>
    %162 = tpu.concatenate %161, %137 in 1 : vector<16x16xf32>, vector<16x12xf32> -> vector<16x28xf32>
    %c0_94 = arith.constant 0 : index
    %c0_95 = arith.constant 0 : index
    %163 = vector.load %arg25[%c0_94, %c0_95] : memref<16x28xf32, #tpu.memory_space<vmem>>, vector<16x28xf32>
    tpu.vector_store %arg25[%c0_94, %c0_95], %162 {strides = array<i32>} : memref<16x28xf32, #tpu.memory_space<vmem>>, vector<16x28xf32>,
    return
  }
  func.func @transform_0(%arg0: i32) -> (i32, i32) {
    %c0_i32 = arith.constant 0 : i32
    %c0_i32_0 = arith.constant 0 : i32
    return %arg0, %c0_i32 : i32, i32
  }
  func.func @transform_1(%arg0: i32) -> (i32, i32) {
    %c0_i32 = arith.constant 0 : i32
    %c0_i32_0 = arith.constant 0 : i32
    return %arg0, %c0_i32 : i32, i32
  }
  func.func @transform_2(%arg0: i32) -> (i32, i32) {
    %c0_i32 = arith.constant 0 : i32
    %c0_i32_0 = arith.constant 0 : i32
    %c0_i32_1 = arith.constant 0 : i32
    return %c0_i32, %c0_i32_0 : i32, i32
  }
  func.func @transform_3(%arg0: i32) -> (i32, i32) {
    %c0_i32 = arith.constant 0 : i32
    %c0_i32_0 = arith.constant 0 : i32
    %c0_i32_1 = arith.constant 0 : i32
    return %c0_i32, %c0_i32_0 : i32, i32
  }
  func.func @transform_4(%arg0: i32) -> (i32, i32) {
    %c0_i32 = arith.constant 0 : i32
    %c0_i32_0 = arith.constant 0 : i32
    %c0_i32_1 = arith.constant 0 : i32
    return %c0_i32, %c0_i32_0 : i32, i32
  }
  func.func @transform_5(%arg0: i32) -> (i32, i32) {
    %c0_i32 = arith.constant 0 : i32
    %c0_i32_0 = arith.constant 0 : i32
    %c0_i32_1 = arith.constant 0 : i32
    return %c0_i32, %c0_i32_0 : i32, i32
  }
  func.func @transform_6(%arg0: i32) -> (i32, i32) {
    %c0_i32 = arith.constant 0 : i32
    %c0_i32_0 = arith.constant 0 : i32
    %c0_i32_1 = arith.constant 0 : i32
    return %c0_i32, %c0_i32_0 : i32, i32
  }
  func.func @transform_7(%arg0: i32) -> (i32, i32) {
    %c0_i32 = arith.constant 0 : i32
    %c0_i32_0 = arith.constant 0 : i32
    %c0_i32_1 = arith.constant 0 : i32
    return %c0_i32, %c0_i32_0 : i32, i32
  }
  func.func @transform_8(%arg0: i32) -> (i32, i32) {
    %c0_i32 = arith.constant 0 : i32
    %c0_i32_0 = arith.constant 0 : i32
    %c0_i32_1 = arith.constant 0 : i32
    return %c0_i32, %c0_i32_0 : i32, i32
  }
  func.func @transform_9(%arg0: i32) -> (i32, i32) {
    %c0_i32 = arith.constant 0 : i32
    %c0_i32_0 = arith.constant 0 : i32
    %c0_i32_1 = arith.constant 0 : i32
    return %c0_i32, %c0_i32_0 : i32, i32
  }
  func.func @transform_10(%arg0: i32) -> (i32, i32) {
    %c0_i32 = arith.constant 0 : i32
    %c0_i32_0 = arith.constant 0 : i32
    %c0_i32_1 = arith.constant 0 : i32
    return %c0_i32, %c0_i32_0 : i32, i32
  }
  func.func @transform_11(%arg0: i32) -> (i32, i32) {
    %c0_i32 = arith.constant 0 : i32
    %c0_i32_0 = arith.constant 0 : i32
    %c0_i32_1 = arith.constant 0 : i32
    return %c0_i32, %c0_i32_0 : i32, i32
  }
  func.func @transform_12(%arg0: i32) -> (i32, i32) {
    %c0_i32 = arith.constant 0 : i32
    %c0_i32_0 = arith.constant 0 : i32
    %c0_i32_1 = arith.constant 0 : i32
    return %c0_i32, %c0_i32_0 : i32, i32
  }
  func.func @transform_13(%arg0: i32) -> (i32, i32) {
    %c0_i32 = arith.constant 0 : i32
    %c0_i32_0 = arith.constant 0 : i32
    %c0_i32_1 = arith.constant 0 : i32
    return %c0_i32, %c0_i32_0 : i32, i32
  }
  func.func @transform_14(%arg0: i32) -> (i32, i32) {
    %c0_i32 = arith.constant 0 : i32
    %c0_i32_0 = arith.constant 0 : i32
    %c0_i32_1 = arith.constant 0 : i32
    return %c0_i32, %c0_i32_0 : i32, i32
  }
  func.func @transform_15(%arg0: i32) -> (i32, i32) {
    %c0_i32 = arith.constant 0 : i32
    %c0_i32_0 = arith.constant 0 : i32
    %c0_i32_1 = arith.constant 0 : i32
    return %c0_i32, %c0_i32_0 : i32, i32
  }
  func.func @transform_16(%arg0: i32) -> (i32, i32) {
    %c0_i32 = arith.constant 0 : i32
    %c0_i32_0 = arith.constant 0 : i32
    %c0_i32_1 = arith.constant 0 : i32
    return %c0_i32, %c0_i32_0 : i32, i32
  }
  func.func @transform_17(%arg0: i32) -> (i32, i32) {
    %c0_i32 = arith.constant 0 : i32
    %c0_i32_0 = arith.constant 0 : i32
    %c0_i32_1 = arith.constant 0 : i32
    return %c0_i32, %c0_i32_0 : i32, i32
  }
  func.func @transform_18(%arg0: i32) -> (i32, i32) {
    %c0_i32 = arith.constant 0 : i32
    %c0_i32_0 = arith.constant 0 : i32
    %c0_i32_1 = arith.constant 0 : i32
    return %c0_i32, %c0_i32_0 : i32, i32
  }
  func.func @transform_19(%arg0: i32) -> (i32, i32) {
    %c0_i32 = arith.constant 0 : i32
    %c0_i32_0 = arith.constant 0 : i32
    %c0_i32_1 = arith.constant 0 : i32
    return %c0_i32, %c0_i32_0 : i32, i32
  }
  func.func @transform_20(%arg0: i32) -> (i32, i32) {
    %c0_i32 = arith.constant 0 : i32
    %c0_i32_0 = arith.constant 0 : i32
    %c0_i32_1 = arith.constant 0 : i32
    return %c0_i32, %c0_i32_0 : i32, i32
  }
  func.func @transform_21(%arg0: i32) -> (i32, i32) {
    %c0_i32 = arith.constant 0 : i32
    %c0_i32_0 = arith.constant 0 : i32
    %c0_i32_1 = arith.constant 0 : i32
    return %c0_i32, %c0_i32_0 : i32, i32
  }
  func.func @transform_22(%arg0: i32) -> (i32, i32) {
    %c0_i32 = arith.constant 0 : i32
    %c0_i32_0 = arith.constant 0 : i32
    %c0_i32_1 = arith.constant 0 : i32
    return %c0_i32, %c0_i32_0 : i32, i32
  }
  func.func @transform_23(%arg0: i32) -> (i32, i32) {
    %c0_i32 = arith.constant 0 : i32
    %c0_i32_0 = arith.constant 0 : i32
    %c0_i32_1 = arith.constant 0 : i32
    return %c0_i32, %c0_i32_0 : i32, i32
  }
  func.func @transform_24(%arg0: i32) -> (i32, i32) {
    %c0_i32 = arith.constant 0 : i32
    %c0_i32_0 = arith.constant 0 : i32
    return %arg0, %c0_i32 : i32, i32
  }
}

module attributes {stable_mosaic.version = 11 : i64} {
  func.func @_aggregate_kernel(%arg0: i32, %arg1: i32, %arg2: memref<1x16xi32, #tpu.memory_space<vmem>>, %arg3: memref<8x1xf32, #tpu.memory_space<vmem>>, %arg4: memref<16x28xf32, #tpu.memory_space<vmem>>, %arg5: memref<8x28xf32, #tpu.memory_space<vmem>>, %arg6: memref<8x28xf32, #tpu.memory_space<vmem>>, %arg7: memref<8x28xf32, #tpu.memory_space<vmem>>) attributes {dimension_semantics = [#tpu.dimension_semantics<parallel>, #tpu.dimension_semantics<arbitrary>], iteration_bounds = array<i64: 1, 1>, scalar_prefetch = 0 : i64, scratch_operands = 1 : i64, tpu.core_type = #tpu.core_type<tc>, window_params = [{transform_indices = @transform_0, window_bounds = array<i64: 1, 16>}, {transform_indices = @transform_1, window_bounds = array<i64: 8, 1>}, {transform_indices = @transform_2, window_bounds = array<i64: 16, 28>}, {transform_indices = @transform_3, window_bounds = array<i64: 8, 28>}, {transform_indices = @transform_4, window_bounds = array<i64: 8, 28>}]} {
    %c0_i32 = arith.constant 0 : i32
    %0 = arith.cmpi eq, %arg1, %c0_i32 : i32
    %1 = arith.extui %0 : i1 to i32
    %c0_i32_0 = arith.constant 0 : i32
    %2 = arith.cmpi ne, %1, %c0_i32_0 : i32
    scf.if %2 {
      %cst_10 = arith.constant 0.000000e+00 : f32
      %22 = vector.broadcast %cst_10 : f32 to vector<8x28xf32>
      %c0_11 = arith.constant 0 : index
      %c0_12 = arith.constant 0 : index
      %23 = vector.load %arg7[%c0_11, %c0_12] : memref<8x28xf32, #tpu.memory_space<vmem>>, vector<8x28xf32>
      tpu.vector_store %arg7[%c0_11, %c0_12], %22 {strides = array<i32>} : memref<8x28xf32, #tpu.memory_space<vmem>>, vector<8x28xf32>,
    } else {
    }
    %c8_i32 = arith.constant 8 : i32
    %3 = arith.muli %arg0, %c8_i32 : i32
    %4 = tpu.iota {dimensions = array<i32: 0>} : vector<8x16xi32>
    %5 = vector.broadcast %3 : i32 to vector<8x16xi32>
    %6 = arith.addi %5, %4 : vector<8x16xi32>
    %c0 = arith.constant 0 : index
    %c0_1 = arith.constant 0 : index
    %7 = vector.load %arg2[%c0, %c0_1] : memref<1x16xi32, #tpu.memory_space<vmem>>, vector<1x16xi32>
    %8 = vector.broadcast %7 : vector<1x16xi32> to vector<8x16xi32>
    %9 = arith.cmpi eq, %6, %8 : vector<8x16xi32>
    %10 = arith.extui %9 : vector<8x16xi1> to vector<8x16xi32>
    %11 = arith.sitofp %10 : vector<8x16xi32> to vector<8x16xf32>
    %12 = arith.truncf %11 : vector<8x16xf32> to vector<8x16xbf16>
    %c0_2 = arith.constant 0 : index
    %c0_3 = arith.constant 0 : index
    %13 = vector.load %arg4[%c0_2, %c0_3] : memref<16x28xf32, #tpu.memory_space<vmem>>, vector<16x28xf32>
    %14 = arith.truncf %13 : vector<16x28xf32> to vector<16x28xbf16>
    %c0_4 = arith.constant 0 : index
    %c0_5 = arith.constant 0 : index
    %15 = vector.load %arg7[%c0_4, %c0_5] : memref<8x28xf32, #tpu.memory_space<vmem>>, vector<8x28xf32>
    %cst = arith.constant dense<0.000000e+00> : vector<8x28xf32>
    %16 = tpu.matmul %12, %14, %cst {dimension_numbers = #tpu.dot_dimension_numbers<[1], [0], [0], [1], [0, 0, 1, 1], [], []>} : vector<8x16xbf16>, vector<16x28xbf16>, vector<8x28xf32> -> vector<8x28xf32>
    %17 = arith.addf %15, %16 : vector<8x28xf32>
    %c0_6 = arith.constant 0 : index
    %c0_7 = arith.constant 0 : index
    %18 = vector.load %arg7[%c0_6, %c0_7] : memref<8x28xf32, #tpu.memory_space<vmem>>, vector<8x28xf32>
    tpu.vector_store %arg7[%c0_6, %c0_7], %17 {strides = array<i32>} : memref<8x28xf32, #tpu.memory_space<vmem>>, vector<8x28xf32>,
    %c0_i32_8 = arith.constant 0 : i32
    %19 = arith.cmpi eq, %arg1, %c0_i32_8 : i32
    %20 = arith.extui %19 : i1 to i32
    %c0_i32_9 = arith.constant 0 : i32
    %21 = arith.cmpi ne, %20, %c0_i32_9 : i32
    scf.if %21 {
      %22 = tpu.iota {dimensions = array<i32: 1>} : vector<8x28xi32>
      %c16_i32 = arith.constant 16 : i32
      %23 = vector.broadcast %c16_i32 : i32 to vector<8x28xi32>
      %24 = arith.cmpi slt, %22, %23 : vector<8x28xi32>
      %c0_10 = arith.constant 0 : index
      %c0_11 = arith.constant 0 : index
      %25 = vector.load %arg3[%c0_10, %c0_11] : memref<8x1xf32, #tpu.memory_space<vmem>>, vector<8x1xf32>
      %cst_12 = arith.constant 1.000000e+00 : f32
      %26 = vector.shape_cast %25 : vector<8x1xf32> to vector<8x1xf32>
      %27 = vector.broadcast %26 : vector<8x1xf32> to vector<8x28xf32>
      %28 = vector.broadcast %cst_12 : f32 to vector<8x28xf32>
      %29 = arith.select %24, %27, %28 : vector<8x28xi1>, vector<8x28xf32>
      %c0_13 = arith.constant 0 : index
      %c0_14 = arith.constant 0 : index
      %30 = vector.load %arg5[%c0_13, %c0_14] : memref<8x28xf32, #tpu.memory_space<vmem>>, vector<8x28xf32>
      %c0_15 = arith.constant 0 : index
      %c0_16 = arith.constant 0 : index
      %31 = vector.load %arg7[%c0_15, %c0_16] : memref<8x28xf32, #tpu.memory_space<vmem>>, vector<8x28xf32>
      %32 = arith.mulf %29, %31 : vector<8x28xf32>
      %33 = arith.addf %30, %32 : vector<8x28xf32>
      %c0_17 = arith.constant 0 : index
      %c0_18 = arith.constant 0 : index
      %34 = vector.load %arg6[%c0_17, %c0_18] : memref<8x28xf32, #tpu.memory_space<vmem>>, vector<8x28xf32>
      tpu.vector_store %arg6[%c0_17, %c0_18], %33 {strides = array<i32>} : memref<8x28xf32, #tpu.memory_space<vmem>>, vector<8x28xf32>,
    } else {
    }
    return
  }
  func.func @transform_0(%arg0: i32, %arg1: i32) -> (i32, i32) {
    %c0_i32 = arith.constant 0 : i32
    %c0_i32_0 = arith.constant 0 : i32
    return %c0_i32, %arg1 : i32, i32
  }
  func.func @transform_1(%arg0: i32, %arg1: i32) -> (i32, i32) {
    %c0_i32 = arith.constant 0 : i32
    %c0_i32_0 = arith.constant 0 : i32
    return %arg0, %c0_i32 : i32, i32
  }
  func.func @transform_2(%arg0: i32, %arg1: i32) -> (i32, i32) {
    %c0_i32 = arith.constant 0 : i32
    %c0_i32_0 = arith.constant 0 : i32
    return %arg1, %c0_i32 : i32, i32
  }
  func.func @transform_3(%arg0: i32, %arg1: i32) -> (i32, i32) {
    %c0_i32 = arith.constant 0 : i32
    %c0_i32_0 = arith.constant 0 : i32
    return %arg0, %c0_i32 : i32, i32
  }
  func.func @transform_4(%arg0: i32, %arg1: i32) -> (i32, i32) {
    %c0_i32 = arith.constant 0 : i32
    %c0_i32_0 = arith.constant 0 : i32
    return %arg0, %c0_i32 : i32, i32
  }
}

</mosaic_0001>

<bundles_post_ra>
// kernel: tile.169
= control target key start
LH: loop header
LB: loop body
LE: loop exit
PB: predicated region body
PF: predicated region fallthrough
CT: control target
= control target key end

     0   :  { %vm16_vm0 = vcmask 23552   ;;  %s42_s12 = smov 3   ;;  %vm22_vm1 = vcmask 72752   ;;  %vm28_vm2 = vcmask 48152   ;;  %s65_s0 = inlined_call_operand.vmem [shape: f32[3,3,3], index: 0, kind: input, shape index: {}]   ;;  %s66_s1 = inlined_call_operand.vmem [shape: f32[9,3], index: 1, kind: output, shape index: {}]  }
   0x1   :  { %v37_v0 = vld [vmem:[%s65_s0 + $0x8] sm:$0xf]  ;;  %v38_v1 = vld [vmem:[%s65_s0 + $0x4] sm:$0xf]  ;;  %v13_v2 = vld [vmem:[%s65_s0] sm:$0xf] }
   0x2   :  { %8 = vst [vmem:[#allocation1 + $0x10] sm:$0xf] %v37_v0  ;;  %12 = vst [vmem:[#allocation1 + $0x8] sm:$0xf] %v38_v1  ;;  %s41_s0 = smov 6  }
   0x3   :  { %14 = vst [vmem:[#allocation1] sm:$0xf] %v13_v2 }
   0xa   :  { %v19_v3 = vld [vmem:[#allocation1 + $0x2] ss:$8 sm:$0x7]   ;;  %v15_v4 = vld [vmem:[#allocation1] ss:$8 sm:$0x7]  }
   0xb   :  { %20 = vrot.lane.b32.xlu0 %v19_v3, %s41_s0  ;;  %v25_v5 = vld [vmem:[#allocation1 + $0x1] ss:$8 sm:$0x7]   ;;  %17 = vst.msk [vmem:[#allocation0] sm:$0x7] %vm16_vm0, %v15_v4  }
   0xf   :  { %26 = vrot.lane.b32.xlu0 %v25_v5, %s42_s12 }
  0x7d   :  { %v21_v6 = vpop.permute.xlu0 %20  }
  0x7e   :  { %23 = vst.msk [vmem:[#allocation0] sm:$0x7] %vm22_vm1, %v21_v6  }
  0x81   :  { %v27_v7 = vpop.permute.xlu0 %26  }
  0x82   :  { %29 = vst.msk [vmem:[#allocation0] sm:$0x7] %vm28_vm2, %v27_v7  }
  0x89   :  { %v33_v8 = vld [vmem:[#allocation0] sm:$0xf] }
  0x8a   :  { %35 = vst [vmem:[%s66_s1] sm:$0xf] %v33_v8 }

// kernel: tile.179
= control target key start
LH: loop header
LB: loop body
LE: loop exit
PB: predicated region body
PF: predicated region fallthrough
CT: control target
= control target key end

     0   :  { %vm16_vm0 = vcmask 23552   ;;  %s42_s12 = smov 3   ;;  %vm22_vm1 = vcmask 72752   ;;  %vm28_vm2 = vcmask 48152   ;;  %s65_s0 = inlined_call_operand.vmem [shape: f32[3,3,3], index: 0, kind: input, shape index: {}]   ;;  %s66_s1 = inlined_call_operand.vmem [shape: f32[3,9], index: 1, kind: output, shape index: {}]  }
   0x1   :  { %v37_v0 = vld [vmem:[%s65_s0 + $0x8] sm:$0xf]  ;;  %v38_v1 = vld [vmem:[%s65_s0 + $0x4] sm:$0xf]  ;;  %v13_v2 = vld [vmem:[%s65_s0] sm:$0xf] }
   0x2   :  { %8 = vst [vmem:[#allocation1 + $0x10] sm:$0xf] %v37_v0  ;;  %12 = vst [vmem:[#allocation1 + $0x8] sm:$0xf] %v38_v1  ;;  %s41_s0 = smov 6  }
   0x3   :  { %14 = vst [vmem:[#allocation1] sm:$0xf] %v13_v2 }
   0xa   :  { %v19_v3 = vld [vmem:[#allocation1 + $0x2] ss:$8 sm:$0x7]   ;;  %v15_v4 = vld [vmem:[#allocation1] ss:$8 sm:$0x7]  }
   0xb   :  { %20 = vrot.lane.b32.xlu0 %v19_v3, %s41_s0  ;;  %v25_v5 = vld [vmem:[#allocation1 + $0x1] ss:$8 sm:$0x7]   ;;  %17 = vst.msk [vmem:[#allocation0] sm:$0x7] %vm16_vm0, %v15_v4  }
   0xf   :  { %26 = vrot.lane.b32.xlu0 %v25_v5, %s42_s12 }
  0x7d   :  { %v21_v6 = vpop.permute.xlu0 %20  }
  0x7e   :  { %23 = vst.msk [vmem:[#allocation0] sm:$0x7] %vm22_vm1, %v21_v6  }
  0x81   :  { %v27_v7 = vpop.permute.xlu0 %26  }
  0x82   :  { %29 = vst.msk [vmem:[#allocation0] sm:$0x7] %vm28_vm2, %v27_v7  }
  0x89   :  { %v33_v8 = vld [vmem:[#allocation0] sm:$0xf] }
  0x8a   :  { %35 = vst [vmem:[%s66_s1] sm:$0xf] %v33_v8 }

// kernel: tile.154
= control target key start
LH: loop header
LB: loop body
LE: loop exit
PB: predicated region body
PF: predicated region fallthrough
CT: control target
= control target key end

     0   :  { %vm21_vm0 = vcmask 31744   ;;  %s49_s14 = smov 4   ;;  %vm27_vm1 = vcmask 97344   ;;  %vm33_vm2 = vcmask 64544   ;;  %s75_s0 = inlined_call_operand.vmem [shape: f32[3,4,4], index: 0, kind: input, shape index: {}]   ;;  %s76_s1 = inlined_call_operand.vmem [shape: f32[12,4], index: 1, kind: output, shape index: {}]  }
   0x1   :  { %v43_v0 = vld [vmem:[%s75_s0 + $0xc] sm:$0xf]  ;;  %v44_v1 = vld [vmem:[%s75_s0 + $0x8] sm:$0xf]  ;;  %v45_v2 = vld [vmem:[%s75_s0 + $0x4] sm:$0xf] }
   0x2   :  { %8 = vst [vmem:[#allocation1 + $0x18] sm:$0xf] %v43_v0  ;;  %13 = vst [vmem:[#allocation1 + $0x10] sm:$0xf] %v44_v1  ;;  %v18_v3 = vld [vmem:[%s75_s0] sm:$0xf] }
   0x3   :  { %17 = vst [vmem:[#allocation1 + $0x8] sm:$0xf] %v45_v2  ;;  %19 = vst [vmem:[#allocation1] sm:$0xf] %v18_v3  ;;  %s48_s0 = smov 8  }
   0xa   :  { %v24_v4 = vld [vmem:[#allocation1 + $0x2] ss:$8 sm:$0xf]   ;;  %v20_v5 = vld [vmem:[#allocation1] ss:$8 sm:$0xf]  }
   0xb   :  { %25 = vrot.lane.b32.xlu0 %v24_v4, %s48_s0  ;;  %v30_v6 = vld [vmem:[#allocation1 + $0x1] ss:$8 sm:$0xf]   ;;  %22 = vst.msk [vmem:[#allocation0] sm:$0xf] %vm21_vm0, %v20_v5  }
   0xf   :  { %31 = vrot.lane.b32.xlu0 %v30_v6, %s49_s14 }
  0x7d   :  { %v26_v7 = vpop.permute.xlu0 %25  }
  0x7e   :  { %28 = vst.msk [vmem:[#allocation0] sm:$0xf] %vm27_vm1, %v26_v7  }
  0x81   :  { %v32_v8 = vpop.permute.xlu0 %31  }
  0x82   :  { %34 = vst.msk [vmem:[#allocation0] sm:$0xf] %vm33_vm2, %v32_v8  }
  0x89   :  { %v38_v9 = vld [vmem:[#allocation0] sm:$0xf] }
  0x8a   :  { %40 = vst [vmem:[%s76_s1] sm:$0xf] %v38_v9 }

// kernel: tile.164
= control target key start
LH: loop header
LB: loop body
LE: loop exit
PB: predicated region body
PF: predicated region fallthrough
CT: control target
= control target key end

     0   :  { %vm21_vm0 = vcmask 31744   ;;  %s49_s14 = smov 4   ;;  %vm27_vm1 = vcmask 97344   ;;  %vm33_vm2 = vcmask 64544   ;;  %s75_s0 = inlined_call_operand.vmem [shape: f32[4,3,4], index: 0, kind: input, shape index: {}]   ;;  %s76_s1 = inlined_call_operand.vmem [shape: f32[4,12], index: 1, kind: output, shape index: {}]  }
   0x1   :  { %v43_v0 = vld [vmem:[%s75_s0 + $0xc] sm:$0xf]  ;;  %v44_v1 = vld [vmem:[%s75_s0 + $0x8] sm:$0xf]  ;;  %v45_v2 = vld [vmem:[%s75_s0 + $0x4] sm:$0xf] }
   0x2   :  { %8 = vst [vmem:[#allocation1 + $0x18] sm:$0xf] %v43_v0  ;;  %13 = vst [vmem:[#allocation1 + $0x10] sm:$0xf] %v44_v1  ;;  %v18_v3 = vld [vmem:[%s75_s0] sm:$0xf] }
   0x3   :  { %17 = vst [vmem:[#allocation1 + $0x8] sm:$0xf] %v45_v2  ;;  %19 = vst [vmem:[#allocation1] sm:$0xf] %v18_v3  ;;  %s48_s0 = smov 8  }
   0xa   :  { %v24_v4 = vld [vmem:[#allocation1 + $0x2] ss:$8 sm:$0xf]   ;;  %v20_v5 = vld [vmem:[#allocation1] ss:$8 sm:$0xf]  }
   0xb   :  { %25 = vrot.lane.b32.xlu0 %v24_v4, %s48_s0  ;;  %v30_v6 = vld [vmem:[#allocation1 + $0x1] ss:$8 sm:$0xf]   ;;  %22 = vst.msk [vmem:[#allocation0] sm:$0xf] %vm21_vm0, %v20_v5  }
   0xf   :  { %31 = vrot.lane.b32.xlu0 %v30_v6, %s49_s14 }
  0x7d   :  { %v26_v7 = vpop.permute.xlu0 %25  }
  0x7e   :  { %28 = vst.msk [vmem:[#allocation0] sm:$0xf] %vm27_vm1, %v26_v7  }
  0x81   :  { %v32_v8 = vpop.permute.xlu0 %31  }
  0x82   :  { %34 = vst.msk [vmem:[#allocation0] sm:$0xf] %vm33_vm2, %v32_v8  }
  0x89   :  { %v38_v9 = vld [vmem:[#allocation0] sm:$0xf] }
  0x8a   :  { %40 = vst [vmem:[%s76_s1] sm:$0xf] %v38_v9 }

// kernel: gvpgnn_forward.9
= control target key start
LH: loop header
LB: loop body
LE: loop exit
PB: predicated region body
PF: predicated region fallthrough
CT: control target
= control target key end

     0   :  { %vm53_vm0 = vcmask 1046528   ;;  %v644_v0 = vmov 0.0   ;;  %vm645_vm1 = vmmov 0   ;;  %vm49_vm2 = vcmask 113664   ;;  %s794_s8 = inlined_call_operand.vmem [shape: f32[3,9], index: 8, kind: input, shape index: {}]   ;;  %s795_s1 = inlined_call_operand.vmem [shape: bf16[14,12], index: 1, kind: input, shape index: {}]   ;;  %s796_s2 = inlined_call_operand.vmem [shape: bf16[14,9], index: 2, kind: input, shape index: {}]   ;;  %s797_s0 = inlined_call_operand.vmem [shape: f32[16,14], index: 0, kind: input, shape index: {}]   ;;  %s798_s6 = inlined_call_operand.vmem [shape: f32[9,3], index: 6, kind: input, shape index: {}, may-alias: {6,7}]   ;;  %s799_s3 = inlined_call_operand.vmem [shape: bf16[3,12], index: 3, kind: input, shape index: {}]   ;;  %s800_s5 = inlined_call_operand.vmem [shape: bf16[9,9], index: 5, kind: input, shape index: {}]   ;;  %s801_s7 = inlined_call_operand.vmem [shape: f32[9,3], index: 7, kind: input, shape index: {}, may-alias: {6,7}]   ;;  %s802_s4 = inlined_call_operand.vmem [shape: f32[1,12], index: 4, kind: input, shape index: {}]   ;;  %s803_s9 = inlined_call_operand.vmem [shape: f32[1,12], index: 9, kind: input, shape index: {}]   ;;  %s804_s10 = inlined_call_operand.vmem [shape: f32[1,12], index: 10, kind: input, shape index: {}]   ;;  %s805_s11 = inlined_call_operand.vmem [shape: f32[16,21], index: 11, kind: output, shape index: {}]  }
   0x1   :  { %574 = vmatprep.subr.bf16.mxu0 %v644_v0  ;;  %v629_v1 = vld [vmem:[%s796_s2] sm:$0x7f]   ;;  %576 = vmatprep.mubr.msk.bf16.mxu0 %vm645_vm1, %v644_v0  ;;  %v40_v5 = vld [vmem:[%s797_s0 + $0x8] sm:$0xff]  ;;  %vm111_vm3 = vcmask 1040384   ;;  %vm646_vm4 = vmmov 1   ;;  %vm104_vm6 = vcmask 72704  }
   0x2   :  { %v630_v2 = vld [vmem:[%s795_s1] sm:$0x7f]   ;;  %v55_v3 = vsel %vm53_vm0, %v629_v1, 0  ;;  %v103_v9 = vld [vmem:[%s798_s6 + $0x8] sm:$0x1]  ;;  %vm734_vm5 = vmpackc.low %vm111_vm3, %vm646_vm4  ;;  %vm212_vm7 = vcmask 1041408  }
   0x3   :  { %v39_v4 = vld [vmem:[%s797_s0] sm:$0xff]  ;;  %575 = vmatpush3.bf16.msra.mxu0 %v55_v3  ;;  %v265_v7 = vsel %vm53_vm0, %v630_v2, 0  ;;  %v647_v19 = vmov 65535   ;;  %vm328_vm8 = vcmask 1043456   ;;  %vm329_vm9 = vcmask 1044480  }
   0x4   :  { %v43_v6 = vpack.c.bf16 %v40_v5, %v39_v4  ;;  %593 = vmatprep.subr.bf16.mxu0 %v644_v0  ;;  %v102_v8 = vld [vmem:[%s798_s6] sm:$0xff]  ;;  %v213_v20 = vsel %vm111_vm3, 4294967295, %v647_v19  ;;  %v330_v24 = vsel %vm328_vm8, 4294967295, %v647_v19  ;;  %vm208_vm14 = vcmask 23552   ;;  %v379_v48 = vld [vmem:[%s801_s7 + $0x8] sm:$0x1] }
   0x5   :  { %v612_v10 = vpack.c.bf16 %v103_v9, %v102_v8  ;;  %v214_v21 = vsel %vm212_vm7, %v213_v20, 0  ;;  %v206_v22 = vld [vmem:[%s799_s3] sm:$0x3]  ;;  %v331_v26 = vsel %vm329_vm9, %v330_v24, 0  ;;  %vm479_vm15 = vcmask 97280  }
   0x6   :  { %577 = vmatmul.mubr.msk.bf16.vlgmr.msra.gmra.mrb[0].mxu0 %vm49_vm2, %v43_v6  ;;  %v216_v23 = vand.u32 %v214_v21, %v206_v22  ;;  %v631_v25 = vld [vmem:[%s800_s5] sm:$0x1f]   ;;  %vm535_vm0 = vcmask 171008  }
   0x7   :  { %594 = vmatpush3.bf16.msra.mxu0 %v265_v7  ;;  %595 = vmatprep.mubr.msk.bf16.mxu0 %vm645_vm1, %v644_v0  ;;  %v333_v27 = vand.u32 %v631_v25, %v331_v26  ;;  %v378_v47 = vld [vmem:[%s801_s7] sm:$0xff] }
   0x8   :  { %614 = vmatprep.subr.msk.bf16.mxu1 %vm734_vm5, %v612_v10  ;;  %v618_v49 = vpack.c.bf16 %v379_v48, %v378_v47  ;;  %v550_v51 = vld [vmem:[%s802_s4] ss:$0 sm:$0xff]  ;;  %s648_s4 = smov 12  }
   0x9   :  { %617 = vmatpush3.bf16.msk.msra.mxu1 %vm734_vm5, %v612_v10 }
   0xa   :  { %587 = vmatprep.subr.bf16.mxu1 %v644_v0  ;;  %620 = vmatprep.subr.msk.bf16.mxu0 %vm734_vm5, %v618_v49 }
   0xe   :  { %596 = vmatmul.mubr.msk.bf16.vlgmr.msra.gmra.mrb[4].mxu0 %vm49_vm2, %v43_v6 }
   0xf   :  { %623 = vmatpush3.bf16.msk.msra.mxu0 %vm734_vm5, %v618_v49 }
  0xd9   :  { %v91_v12 = vpop.f32.mrb[0].mxu0 }
  0xda   :  { %v578_v13 = vpop.f32.mrb[1].mxu0  ;;  %v100_v14 = vmul.f32 %v91_v12, %v91_v12 }
  0xdb   :  { %v94_v15 = vpop.f32.mrb[2].mxu0 }
  0xdc   :  { %v101_v16 = vmul.f32 %v94_v15, %v94_v15  ;;  %v319_v17 = vpack.c.bf16 %v94_v15, %v91_v12  ;;  %v579_v18 = vpop.f32.mrb[3].mxu0  ;;  %584 = vmatprep.mubr.msk.f32.mxu1 %vm104_vm6, %v100_v14 }
  0xde   :  { %585 = vmatmul.mubr.msk.f32.vlgmr.msra.gmra.mrb[0].mxu1 %vm104_vm6, %v101_v16 }
  0xdf   :  { %589 = vmatprep.mubr.msk.bf16.mxu1 %vm645_vm1, %v644_v0  ;;  %588 = vmatpush3.bf16.msra.mxu1 %v216_v23 }
  0xe0   :  { %599 = vmatprep.subr.bf16.mxu1 %v644_v0 }
  0xe1   :  { %v301_v43 = vpop.f32.mrb[4].mxu0 }
  0xe2   :  { %v597_v44 = vpop.f32.mrb[5].mxu0 }
  0xe3   :  { %v304_v45 = vpop.f32.mrb[6].mxu0 }
  0xe4   :  { %v598_v46 = vpop.f32.mrb[7].mxu0 }
 0x1b1   :  { %v586_v28 = vpop.f32.mrb[0].mxu1 }
 0x1b2   :  { %v191_v29 = vmax.f32 %v586_v28, 1e-08  ;;  %v181_v30 = vpop.f32.mrb[1].mxu1 }
 0x1b3   :  { %v190_v31 = vmax.f32 %v181_v30, 1e-08 }
 0x1b4   :  { %632 = vrsqrt.f32 %v191_v29  ;;  %vm201_vm10 = vcmp.eq.f32.partialorder %v191_v29, inf  ;;  %v204_v36 = vand.u32 2147483648, %v191_v29  ;;  %vm203_vm12 = vcmp.eq.f32.partialorder %v191_v29, 0.0 }
 0x1b5   :  { %634 = vrsqrt.f32 %v190_v31  ;;  %vm194_vm11 = vcmp.eq.f32.partialorder %v190_v31, inf  ;;  %v197_v37 = vand.u32 2147483648, %v190_v31  ;;  %vm196_vm13 = vcmp.eq.f32.partialorder %v190_v31, 0.0 }
 0x1be   :  { %v633_v32 = vpop.eup %632 }
 0x1bf   :  { %v635_v33 = vpop.eup %634  ;;  %v200_v34 = vmul.f32 %v633_v32, %v191_v29 }
 0x1c0   :  { %v193_v35 = vmul.f32 %v635_v33, %v190_v31 }
 0x1c1   :  { %v202_v38 = vsel %vm201_vm10, %v191_v29, %v200_v34 }
 0x1c2   :  { %v195_v39 = vsel %vm194_vm11, %v190_v31, %v193_v35  ;;  %v205_v40 = vsel %vm203_vm12, %v204_v36, %v202_v38  ;;  %v556_v36 = vld [vmem:[%s803_s9] ss:$0 sm:$0xff] }
 0x1c3   :  { %v198_v41 = vsel %vm196_vm13, %v197_v37, %v195_v39  ;;  %v557_v39 = vld [vmem:[%s804_s10] ss:$0 sm:$0xff] }
 0x1c4   :  { %v207_v42 = vpack.c.bf16 %v205_v40, %v198_v41 }
 0x1c6   :  { %590 = vmatmul.mubr.msk.bf16.vlgmr.msra.gmra.mrb[4].mxu1 %vm208_vm14, %v207_v42 }
 0x1c7   :  { %600 = vmatpush3.bf16.msra.mxu1 %v333_v27  ;;  %601 = vmatprep.mubr.msk.bf16.mxu1 %vm645_vm1, %v644_v0 }
 0x1ce   :  { %602 = vmatmul.mubr.msk.bf16.vlgmr.msra.gmra.mrb[8].mxu1 %vm104_vm6, %v319_v17 }
 0x299   :  { %v252_v50 = vpop.f32.mrb[4].mxu1 }
 0x29a   :  { %v302_v52 = vadd.f32 %v301_v43, %v252_v50  ;;  %v591_v53 = vpop.f32.mrb[5].mxu1 }
 0x29b   :  { %v255_v54 = vpop.f32.mrb[6].mxu1 }
 0x29c   :  { %v305_v55 = vadd.f32 %v304_v45, %v255_v54  ;;  %v592_v56 = vpop.f32.mrb[7].mxu1  ;;  %v315_v57 = vadd.f32 %v550_v51, %v302_v52 }
 0x29e   :  { %v480_v58 = vsel %vm479_vm15, %v315_v57, 0.0  ;;  %v316_v59 = vadd.f32 %v550_v51, %v305_v55 }
 0x29f   :  { %481 = vadd.xlane.f32.xlu0 %v480_v58 }
 0x2a0   :  { %v483_v63 = vsel %vm479_vm15, %v316_v59, 0.0 }
 0x2a1   :  { %v369_v60 = vpop.f32.mrb[8].mxu1 }
 0x2a2   :  { %v376_v61 = vmul.f32 %v369_v60, %v369_v60  ;;  %v603_v62 = vpop.f32.mrb[9].mxu1 }
 0x2a3   :  { %v372_v0 = vpop.f32.mrb[10].mxu1  ;;  %484 = vadd.xlane.f32.xlu0 %v483_v63 }
 0x2a4   :  { %v377_v1 = vmul.f32 %v372_v0, %v372_v0  ;;  %v604_v2 = vpop.f32.mrb[11].mxu1  ;;  %609 = vmatprep.mubr.msk.f32.mxu0 %vm104_vm6, %v376_v61 }
 0x2a6   :  { %610 = vmatmul.mubr.msk.f32.vlgmr.msra.gmra.mrb[8].mxu0 %vm104_vm6, %v377_v1 }
 0x32c   :  { %v482_v3 = vpop.xlane.xlu0 %481 }
 0x32d   :  { %v487_v4 = vmul.f32 0.083333336, %v482_v3 }
 0x32f   :  { %v489_v5 = vsub.f32 %v315_v57, %v487_v4 }
 0x330   :  { %v485_v8 = vpop.xlane.xlu0 %484 }
 0x331   :  { %v491_v6 = vmul.f32 %v489_v5, %v489_v5  ;;  %v488_v9 = vmul.f32 0.083333336, %v485_v8 }
 0x333   :  { %v493_v7 = vsel %vm479_vm15, %v491_v6, 0.0  ;;  %v490_v13 = vsub.f32 %v316_v59, %v488_v9 }
 0x334   :  { %494 = vadd.xlane.f32.xlu0 %v493_v7 }
 0x335   :  { %v492_v17 = vmul.f32 %v490_v13, %v490_v13 }
 0x337   :  { %v496_v18 = vsel %vm479_vm15, %v492_v17, 0.0 }
 0x379   :  { %v611_v10 = vpop.f32.mrb[8].mxu0 }
 0x37a   :  { %v455_v11 = vpop.f32.mrb[9].mxu0  ;;  %v465_v14 = vmax.f32 %v611_v10, 1e-08 }
 0x37b   :  { %v464_v12 = vmax.f32 %v455_v11, 1e-08 }
 0x37c   :  { %v469_v16 = vsel %vm208_vm14, %v465_v14, 0.0 }
 0x37d   :  { %v466_v15 = vsel %vm208_vm14, %v464_v12, 0.0 }
 0x37e   :  { %467 = vadd.xlane.f32.xlu1 %v466_v15 }
 0x382   :  { %470 = vadd.xlane.f32.xlu1 %v469_v16 }
 0x386   :  { %497 = vadd.xlane.f32.xlu1 %v496_v18 }
 0x3c1   :  { %v495_v27 = vpop.xlane.xlu0 %494 }
 0x3c2   :  { %v499_v28 = vmul.f32 0.083333336, %v495_v27 }
 0x3c4   :  { %v501_v30 = vadd.f32 1e-05, %v499_v28 }
 0x40b   :  { %v468_v19 = vpop.xlane.xlu1 %467 }
 0x40c   :  { %v473_v20 = vmul.f32 0.33333334, %v468_v19 }
 0x40e   :  { %636 = vrsqrt.f32 %v473_v20 }
 0x40f   :  { %v471_v21 = vpop.xlane.xlu1 %470 }
 0x410   :  { %v474_v22 = vmul.f32 0.33333334, %v471_v21 }
 0x412   :  { %638 = vrsqrt.f32 %v474_v22 }
 0x413   :  { %v498_v29 = vpop.xlane.xlu1 %497  ;;  %640 = vrsqrt.f32 %v501_v30 }
 0x414   :  { %v500_v31 = vmul.f32 0.083333336, %v498_v29 }
 0x416   :  { %v502_v32 = vadd.f32 1e-05, %v500_v31 }
 0x418   :  { %v637_v23 = vpop.eup %636  ;;  %642 = vrsqrt.f32 %v502_v32 }
 0x419   :  { %v477_v24 = vmul.f32 %v637_v23, %v369_v60 }
 0x41b   :  { %527 = vrot.lane.b32.xlu0 %v477_v24, %s648_s4 }
 0x41c   :  { %v639_v25 = vpop.eup %638 }
 0x41d   :  { %v478_v26 = vmul.f32 %v639_v25, %v372_v0  ;;  %v641_v33 = vpop.eup %640 }
 0x41e   :  { %v505_v34 = vmul.f32 %v641_v33, %v489_v5 }
 0x41f   :  { %529 = vrot.lane.b32.xlu1 %v478_v26, %s648_s4 }
 0x420   :  { %v514_v37 = vmul.f32 %v556_v36, %v505_v34 }
 0x422   :  { %v643_v35 = vpop.eup %642  ;;  %v523_v40 = vadd.f32 %v557_v39, %v514_v37 }
 0x423   :  { %v506_v38 = vmul.f32 %v643_v35, %v490_v13 }
 0x425   :  { %v515_v41 = vmul.f32 %v556_v36, %v506_v38 }
 0x427   :  { %v524_v44 = vadd.f32 %v557_v39, %v515_v41 }
 0x48d   :  { %v528_v42 = vpop.permute.xlu0 %527 }
 0x48e   :  { %v533_v43 = vsel %vm479_vm15, %v523_v40, %v528_v42 }
 0x48f   :  { %536 = vst.msk [vmem:[%s805_s11] sm:$0xff] %vm535_vm0, %v533_v43 }
 0x491   :  { %v530_v45 = vpop.permute.xlu1 %529 }
 0x492   :  { %v534_v46 = vsel %vm479_vm15, %v524_v44, %v530_v45 }
 0x493   :  { %537 = vst.msk [vmem:[%s805_s11 + $0x8] sm:$0xff] %vm535_vm0, %v534_v46 }

// kernel: tile.214
= control target key start
LH: loop header
LB: loop body
LE: loop exit
PB: predicated region body
PF: predicated region fallthrough
CT: control target
= control target key end

     0   :  { %vm37_vm0 = vcmask 1046532   ;;  %vm39_vm1 = vcmask 56320   ;;  %s75_s22 = smov 7   ;;  %vm49_vm2 = vcmask 171120   ;;  %vm59_vm3 = vcmask 113720   ;;  %s116_s0 = inlined_call_operand.vmem [shape: f32[3,7,7], index: 0, kind: input, shape index: {}]   ;;  %s117_s1 = inlined_call_operand.vmem [shape: f32[21,7], index: 1, kind: output, shape index: {}]  }
   0x1   :  { %v66_v0 = vld [vmem:[%s116_s0 + $0x18] sm:$0xf]  ;;  %v67_v1 = vld [vmem:[%s116_s0 + $0x14] sm:$0xf]  ;;  %v68_v2 = vld [vmem:[%s116_s0 + $0x10] sm:$0xf] }
   0x2   :  { %8 = vst [vmem:[#allocation0 + $0x30] sm:$0xf] %v66_v0  ;;  %13 = vst [vmem:[#allocation0 + $0x28] sm:$0xf] %v67_v1  ;;  %v69_v3 = vld [vmem:[%s116_s0 + $0xc] sm:$0xf] }
   0x3   :  { %18 = vst [vmem:[#allocation0 + $0x20] sm:$0xf] %v68_v2  ;;  %v70_v4 = vld [vmem:[%s116_s0 + $0x8] sm:$0xf]  ;;  %v71_v5 = vld [vmem:[%s116_s0 + $0x4] sm:$0xf] }
   0x4   :  { %23 = vst [vmem:[#allocation0 + $0x18] sm:$0xf] %v69_v3  ;;  %28 = vst [vmem:[#allocation0 + $0x10] sm:$0xf] %v70_v4  ;;  %v33_v6 = vld [vmem:[%s116_s0] sm:$0xf] }
   0x5   :  { %32 = vst [vmem:[#allocation0 + $0x8] sm:$0xf] %v71_v5  ;;  %34 = vst [vmem:[#allocation0] sm:$0xf] %v33_v6  ;;  %s74_s0 = smov 14  }
   0xa   :  { %v44_v7 = vld [vmem:[#allocation0 + $0x2] ss:$8 sm:$0x70]   ;;  %v36_v8 = vld [vmem:[#allocation0] ss:$8 sm:$0x70]  }
   0xb   :  { %v54_v9 = vld [vmem:[#allocation0 + $0x1] ss:$8 sm:$0x70]  }
   0xc   :  { %v35_v10 = vld [vmem:[#allocation0] ss:$8 sm:$0xf]   ;;  %v42_v11 = vld [vmem:[#allocation0 + $0x2] ss:$8 sm:$0xf]  }
   0xd   :  { %v46_v12 = vsel %vm37_vm0, %v44_v7, %v42_v11  ;;  %v38_v13 = vsel %vm37_vm0, %v36_v8, %v35_v10  ;;  %v52_v14 = vld [vmem:[#allocation0 + $0x1] ss:$8 sm:$0xf]  }
   0xe   :  { %47 = vrot.lane.b32.xlu0 %v46_v12, %s74_s0  ;;  %40 = vst.msk [vmem:[%s117_s1] sm:$0x7f] %vm39_vm1, %v38_v13   ;;  %v56_v15 = vsel %vm37_vm0, %v54_v9, %v52_v14 }
  0x12   :  { %57 = vrot.lane.b32.xlu0 %v56_v15, %s75_s22 }
  0x80   :  { %v48_v16 = vpop.permute.xlu0 %47  }
  0x81   :  { %50 = vst.msk [vmem:[%s117_s1] sm:$0x7f] %vm49_vm2, %v48_v16  }
  0x84   :  { %v58_v17 = vpop.permute.xlu0 %57  }
  0x85   :  { %60 = vst.msk [vmem:[%s117_s1] sm:$0x7f] %vm59_vm3, %v58_v17  }

// kernel: gvpgnn_forward.10
= control target key start
LH: loop header
LB: loop body
LE: loop exit
PB: predicated region body
PF: predicated region fallthrough
CT: control target
= control target key end

     0   :  { %vm88_vm0 = vcmask 1041408   ;;  %vm89_vm1 = vcmask 1042432   ;;  %v1760_v0 = vmov 0.0   ;;  %v1761_v2 = vmov 65535   ;;  %s2095_s2 = inlined_call_operand.vmem [shape: bf16[21,9], index: 2, kind: input, shape index: {}]   ;;  %s2096_s0 = inlined_call_operand.vmem [shape: f32[16,21], index: 0, kind: input, shape index: {}]   ;;  %s2097_s1 = inlined_call_operand.vmem [shape: bf16[21,12], index: 1, kind: input, shape index: {}]   ;;  %s2098_s6 = inlined_call_operand.vmem [shape: f32[9,3], index: 6, kind: input, shape index: {}, may-alias: {6,7,16,17}]   ;;  %s2099_s3 = inlined_call_operand.vmem [shape: bf16[3,12], index: 3, kind: input, shape index: {}]   ;;  %s2100_s5 = inlined_call_operand.vmem [shape: bf16[9,9], index: 5, kind: input, shape index: {}]   ;;  %s2101_s7 = inlined_call_operand.vmem [shape: f32[9,3], index: 7, kind: input, shape index: {}, may-alias: {6,7,16,17}]   ;;  %s2102_s4 = inlined_call_operand.vmem [shape: f32[1,12], index: 4, kind: input, shape index: {}]   ;;  %s2103_s8 = inlined_call_operand.vmem [shape: f32[3,9], index: 8, kind: input, shape index: {}, may-alias: {8,18}]   ;;  %s2104_s12 = inlined_call_operand.vmem [shape: bf16[9,9], index: 12, kind: input, shape index: {}]   ;;  %s2105_s11 = inlined_call_operand.vmem [shape: bf16[12,12], index: 11, kind: input, shape index: {}]   ;;  %s2106_s9 = inlined_call_operand.vmem [shape: f32[1,12], index: 9, kind: input, shape index: {}]   ;;  %s2107_s10 = inlined_call_operand.vmem [shape: f32[1,12], index: 10, kind: input, shape index: {}]   ;;  %s2108_s16 = inlined_call_operand.vmem [shape: f32[9,3], index: 16, kind: input, shape index: {}, may-alias: {6,7,16,17}]   ;;  %s2109_s13 = inlined_call_operand.vmem [shape: bf16[3,12], index: 13, kind: input, shape index: {}]   ;;  %s2110_s15 = inlined_call_operand.vmem [shape: bf16[9,9], index: 15, kind: input, shape index: {}]   ;;  %s2111_s17 = inlined_call_operand.vmem [shape: f32[9,3], index: 17, kind: input, shape index: {}, may-alias: {6,7,16,17}]   ;;  %s2112_s14 = inlined_call_operand.vmem [shape: f32[1,12], index: 14, kind: input, shape index: {}]   ;;  %s2113_s18 = inlined_call_operand.vmem [shape: f32[3,9], index: 18, kind: input, shape index: {}, may-alias: {8,18}]   ;;  %s2114_s19 = inlined_call_operand.vmem [shape: f32[1,12], index: 19, kind: input, shape index: {}]   ;;  %s2115_s20 = inlined_call_operand.vmem [shape: f32[1,12], index: 20, kind: input, shape index: {}]   ;;  %s2116_s21 = inlined_call_operand.vmem [shape: f32[16,21], index: 21, kind: output, shape index: {}]  }
   0x1   :  { %2121 = sst [smem:[#allocation2_spill]] %s2095_s2  ;;  %1559 = vmatprep.subr.bf16.mxu0 %v1760_v0  ;;  %v90_v3 = vsel %vm88_vm0, 4294967295, %v1761_v2  ;;  %vm150_vm2 = vcmask 1040384   ;;  %vm1762_vm3 = vmmov 0   ;;  %vm84_vm4 = vcmask 171008   ;;  %v420_v51 = vld [vmem:[%s2101_s7] sm:$0xff] }
   0x2   :  { %2122 = sst [smem:[#allocation3_spill]] %s2096_s0  ;;  %s2127_s26 = sld [smem:[#allocation2_spill]]  ;;  %v91_v5 = vsel %vm89_vm1, %v90_v3, 0  ;;  %v251_v7 = vsel %vm150_vm2, 4294967295, %v1761_v2  ;;  %1563 = vmatprep.mubr.msk.bf16.mxu0 %vm1762_vm3, %v1760_v0  ;;  %vm1763_vm5 = vmmov 1   ;;  %vm143_vm7 = vcmask 72704  }
   0x3   :  { %2123 = sst [smem:[#allocation4_spill]] %s2097_s1  ;;  %s2128_s2 = sld [smem:[#allocation3_spill]]  ;;  %v1892_v9 = vsel %vm88_vm0, %v251_v7, 0  ;;  %vm1902_vm6 = vmpackc.low %vm150_vm2, %vm1763_vm5  ;;  %vm370_vm8 = vcmask 1043456   ;;  %vm371_vm9 = vcmask 1044480   ;;  %vm247_vm14 = vcmask 23552  }
   0x4   :  { %2124 = sst [smem:[#allocation5_spill]] %s2098_s6  ;;  %v372_v32 = vsel %vm370_vm8, 4294967295, %v1761_v2  ;;  %v421_v52 = vld [vmem:[%s2101_s7 + $0x8] sm:$0x1]  ;;  %v1471_v55 = vld [vmem:[%s2102_s4] ss:$0 sm:$0xff] }
   0x5   :  { %2125 = sst [smem:[#allocation6_spill]] %s2099_s3  ;;  %s2131_s23 = sld [smem:[#allocation5_spill]]  ;;  %v1937_v39 = vsel %vm371_vm9, %v372_v32, 0  ;;  %v1669_v53 = vpack.c.bf16 %v421_v52, %v420_v51  ;;  %vm723_vm15 = vcmask 97280   ;;  %vm988_vm9 = vcmask 1045504  }
   0x6   :  { %2126 = sst [smem:[#allocation7_spill]] %s2100_s5 }
   0x7   :  { %s2134_s5 = sld [smem:[#allocation7_spill]] }
   0x8   :  { %v1704_v1 = vld [vmem:[%s2127_s26] sm:$0xff]   ;;  %v1705_v4 = vld [vmem:[%s2127_s26 + $0x8] ss:$0 sps:$4 sm:$0x77]   ;;  %s2132_s26 = sld [smem:[#allocation4_spill]] }
   0x9   :  { %1560 = vmatpush3.bf16.msra.mxu0 %v1704_v1  ;;  %v93_v6 = vand.u32 %v1705_v4, %v91_v5  ;;  %v69_v8 = vld [vmem:[%s2128_s2] sm:$0xff]  ;;  %v70_v10 = vld [vmem:[%s2128_s2 + $0x8] sm:$0xff]  ;;  %s2133_s2 = sld [smem:[#allocation6_spill]] }
   0xa   :  { %1561 = vmatprep.subr.bf16.mxu0 %v1760_v0  ;;  %v74_v11 = vpack.c.bf16 %v70_v10, %v69_v8 }
   0xb   :  { %v141_v13 = vld [vmem:[%s2131_s23] sm:$0xff]  ;;  %v142_v14 = vld [vmem:[%s2131_s23 + $0x8] sm:$0x1] }
   0xc   :  { %v1663_v15 = vpack.c.bf16 %v142_v14, %v141_v13  ;;  %v534_v14 = vld [vmem:[%s2103_s8] sm:$0x7] }
   0xd   :  { %1562 = vmatpush3.bf16.msra.mxu0 %v93_v6  ;;  %v1708_v36 = vld [vmem:[%s2134_s5] sm:$0x1f]  }
   0xe   :  { %1580 = vmatprep.subr.bf16.mxu0 %v1760_v0  ;;  %1665 = vmatprep.subr.msk.bf16.mxu1 %vm1902_vm6, %v1663_v15  ;;  %v1706_v23 = vld [vmem:[%s2132_s26 + $0x8] ss:$0 sps:$4 sm:$0x77]   ;;  %v1707_v24 = vld [vmem:[%s2132_s26] sm:$0xff]   ;;  %v375_v45 = vand.u32 %v1708_v36, %v1937_v39 }
   0xf   :  { %1668 = vmatpush3.bf16.msk.msra.mxu1 %vm1902_vm6, %v1663_v15  ;;  %v307_v25 = vand.u32 %v1706_v23, %v91_v5  ;;  %v245_v26 = vld [vmem:[%s2133_s2] sm:$0x3] }
  0x10   :  { %1564 = vmatmul.mubr.msk.bf16.vlgmr.msra.gmra.mrb[0].mxu0 %vm84_vm4, %v74_v11  ;;  %1574 = vmatprep.subr.bf16.mxu1 %v1760_v0  ;;  %v254_v27 = vand.u32 %v1892_v9, %v245_v26 }
  0x11   :  { %1584 = vmatprep.mubr.msk.bf16.mxu0 %vm1762_vm3, %v1760_v0  ;;  %1581 = vmatpush3.bf16.msra.mxu0 %v1707_v24 }
  0x12   :  { %1582 = vmatprep.subr.bf16.mxu0 %v1760_v0 }
  0x15   :  { %1583 = vmatpush3.bf16.msra.mxu0 %v307_v25 }
  0x16   :  { %1671 = vmatprep.subr.msk.bf16.mxu0 %vm1902_vm6, %v1669_v53 }
  0x18   :  { %1585 = vmatmul.mubr.msk.bf16.vlgmr.msra.gmra.mrb[4].mxu0 %vm84_vm4, %v74_v11 }
  0x19   :  { %1674 = vmatpush3.bf16.msk.msra.mxu0 %vm1902_vm6, %v1669_v53 }
  0x1a   :  { %1677 = vmatprep.subr.msk.bf16.mxu0 %vm1902_vm6, %v1669_v53 }
  0xe3   :  { %v129_v16 = vpop.f32.mrb[0].mxu0 }
  0xe4   :  { %v1565_v17 = vpop.f32.mrb[1].mxu0  ;;  %v139_v18 = vmul.f32 %v129_v16, %v129_v16 }
  0xe5   :  { %v132_v19 = vpop.f32.mrb[2].mxu0 }
  0xe6   :  { %v140_v20 = vmul.f32 %v132_v19, %v132_v19  ;;  %v361_v21 = vpack.c.bf16 %v132_v19, %v129_v16  ;;  %v1566_v22 = vpop.f32.mrb[3].mxu0  ;;  %1571 = vmatprep.mubr.msk.f32.mxu1 %vm143_vm7, %v139_v18 }
  0xe8   :  { %1572 = vmatmul.mubr.msk.f32.vlgmr.msra.gmra.mrb[0].mxu1 %vm143_vm7, %v140_v20 }
  0xe9   :  { %1576 = vmatprep.mubr.msk.bf16.mxu1 %vm1762_vm3, %v1760_v0  ;;  %1575 = vmatpush3.bf16.msra.mxu1 %v254_v27 }
  0xea   :  { %1588 = vmatprep.subr.bf16.mxu1 %v1760_v0 }
  0xeb   :  { %v343_v47 = vpop.f32.mrb[4].mxu0 }
  0xec   :  { %v1586_v48 = vpop.f32.mrb[5].mxu0 }
  0xed   :  { %v346_v49 = vpop.f32.mrb[6].mxu0 }
  0xee   :  { %v1587_v50 = vpop.f32.mrb[7].mxu0 }
 0x1bb   :  { %v1573_v28 = vpop.f32.mrb[0].mxu1 }
 0x1bc   :  { %v230_v29 = vmax.f32 %v1573_v28, 1e-08  ;;  %v220_v30 = vpop.f32.mrb[1].mxu1 }
 0x1bd   :  { %v229_v31 = vmax.f32 %v220_v30, 1e-08 }
 0x1be   :  { %1712 = vrsqrt.f32 %v230_v29  ;;  %vm240_vm10 = vcmp.eq.f32.partialorder %v230_v29, inf  ;;  %v243_v38 = vand.u32 2147483648, %v230_v29  ;;  %vm242_vm12 = vcmp.eq.f32.partialorder %v230_v29, 0.0 }
 0x1bf   :  { %1714 = vrsqrt.f32 %v229_v31  ;;  %vm233_vm11 = vcmp.eq.f32.partialorder %v229_v31, inf  ;;  %v236_v40 = vand.u32 2147483648, %v229_v31  ;;  %vm235_vm13 = vcmp.eq.f32.partialorder %v229_v31, 0.0 }
 0x1c8   :  { %v1713_v33 = vpop.eup %1712 }
 0x1c9   :  { %v1715_v34 = vpop.eup %1714  ;;  %v239_v35 = vmul.f32 %v1713_v33, %v230_v29 }
 0x1ca   :  { %v232_v37 = vmul.f32 %v1715_v34, %v229_v31 }
 0x1cb   :  { %v241_v41 = vsel %vm240_vm10, %v230_v29, %v239_v35 }
 0x1cc   :  { %v234_v42 = vsel %vm233_vm11, %v229_v31, %v232_v37  ;;  %v244_v43 = vsel %vm242_vm12, %v243_v38, %v241_v41 }
 0x1cd   :  { %v237_v44 = vsel %vm235_vm13, %v236_v40, %v234_v42 }
 0x1ce   :  { %v246_v46 = vpack.c.bf16 %v244_v43, %v237_v44 }
 0x1d0   :  { %1577 = vmatmul.mubr.msk.bf16.vlgmr.msra.gmra.mrb[4].mxu1 %vm247_vm14, %v246_v46 }
 0x1d1   :  { %1589 = vmatpush3.bf16.msra.mxu1 %v375_v45  ;;  %1590 = vmatprep.mubr.msk.bf16.mxu1 %vm1762_vm3, %v1760_v0 }
 0x1d2   :  { %1601 = vmatprep.subr.msk.mxu1 %vm89_vm1, %v534_v14 }
 0x1d8   :  { %1591 = vmatmul.mubr.msk.bf16.vlgmr.msra.gmra.mrb[8].mxu1 %vm143_vm7, %v361_v21 }
 0x1d9   :  { %1602 = vmatpush3.msk.msra.mxu1 %vm89_vm1, %v534_v14 }
 0x1da   :  { %1613 = vmatprep.subr.bf16.mxu1 %v1760_v0 }
 0x2a3   :  { %v290_v54 = vpop.f32.mrb[4].mxu1 }
 0x2a4   :  { %v344_v56 = vadd.f32 %v343_v47, %v290_v54  ;;  %v1578_v57 = vpop.f32.mrb[5].mxu1 }
 0x2a5   :  { %v293_v58 = vpop.f32.mrb[6].mxu1 }
 0x2a6   :  { %v357_v59 = vadd.f32 %v1471_v55, %v344_v56  ;;  %v347_v60 = vadd.f32 %v346_v49, %v293_v58  ;;  %v1579_v61 = vpop.f32.mrb[7].mxu1 }
 0x2a8   :  { %v358_v62 = vadd.f32 %v1471_v55, %v347_v60  ;;  %v621_v63 = vmax.f32 %v357_v59, 0.0  ;;  %v1709_v60 = vld [vmem:[%s2104_s12] sm:$0x1f]  }
 0x2a9   :  { %v781_v61 = vand.u32 %v1709_v60, %v1937_v39 }
 0x2aa   :  { %v1959_v1 = vmin.f32 %v621_v63, 6.0  ;;  %v622_v2 = vmax.f32 %v358_v62, 0.0 }
 0x2ab   :  { %v1961_v3 = vpop.f32.mrb[8].mxu1 }
 0x2ac   :  { %v418_v4 = vmul.f32 %v1961_v3, %v1961_v3  ;;  %v1592_v5 = vpop.f32.mrb[9].mxu1  ;;  %v724_v6 = vsel %vm723_vm15, %v1959_v1, 0.0  ;;  %v624_v7 = vmin.f32 %v622_v2, 6.0 }
 0x2ad   :  { %v414_v8 = vpop.f32.mrb[10].mxu1  ;;  %725 = vadd.xlane.f32.xlu1 %v724_v6 }
 0x2ae   :  { %v419_v10 = vmul.f32 %v414_v8, %v414_v8  ;;  %v1593_v11 = vpop.f32.mrb[11].mxu1  ;;  %1598 = vmatprep.mubr.msk.f32.mxu0 %vm143_vm7, %v418_v4  ;;  %v727_v13 = vsel %vm723_vm15, %v624_v7, 0.0 }
 0x2b0   :  { %1599 = vmatmul.mubr.msk.f32.vlgmr.msra.gmra.mrb[8].mxu0 %vm143_vm7, %v419_v10 }
 0x2b1   :  { %728 = vadd.xlane.f32.xlu1 %v727_v13  ;;  %1680 = vmatpush3.bf16.msk.msra.mxu0 %vm1902_vm6, %v1669_v53  ;;  %v1710_v13 = vld [vmem:[%s2105_s11] sm:$0x3f]  }
 0x33a   :  { %v726_v15 = vpop.xlane.xlu1 %725 }
 0x33b   :  { %v731_v50 = vmul.f32 0.083333336, %v726_v15 }
 0x33d   :  { %v733_v54 = vsub.f32 %v1959_v1, %v731_v50 }
 0x33e   :  { %v729_v16 = vpop.xlane.xlu1 %728 }
 0x33f   :  { %v732_v17 = vmul.f32 0.083333336, %v729_v16  ;;  %v735_v58 = vmul.f32 %v733_v54, %v733_v54 }
 0x341   :  { %v1978_v18 = vsub.f32 %v624_v7, %v732_v17  ;;  %v737_v59 = vsel %vm723_vm15, %v735_v58, 0.0 }
 0x343   :  { %v736_v19 = vmul.f32 %v1978_v18, %v1978_v18 }
 0x345   :  { %v740_v20 = vsel %vm723_vm15, %v736_v19, 0.0 }
 0x346   :  { %741 = vadd.xlane.f32.xlu1 %v740_v20  ;;  %v990_v20 = vsel %vm988_vm9, %v1710_v13, 0 }
 0x383   :  { %v1600_v21 = vpop.f32.mrb[8].mxu0 }
 0x384   :  { %v507_v22 = vmax.f32 %v1600_v21, 1e-08  ;;  %v497_v23 = vpop.f32.mrb[9].mxu0  ;;  %v1485_v21 = vld [vmem:[%s2106_s9] ss:$0 sm:$0xff] }
 0x385   :  { %v506_v24 = vmax.f32 %v497_v23, 1e-08 }
 0x386   :  { %1716 = vrsqrt.f32 %v507_v22  ;;  %vm517_vm0 = vcmp.eq.f32.partialorder %v507_v22, inf  ;;  %v520_v28 = vand.u32 2147483648, %v507_v22  ;;  %vm519_vm2 = vcmp.eq.f32.partialorder %v507_v22, 0.0 }
 0x387   :  { %1718 = vrsqrt.f32 %v506_v24  ;;  %vm510_vm5 = vcmp.eq.f32.partialorder %v506_v24, inf  ;;  %v513_v31 = vand.u32 2147483648, %v506_v24  ;;  %vm512_vm8 = vcmp.eq.f32.partialorder %v506_v24, 0.0 }
 0x390   :  { %v1717_v25 = vpop.eup %1716 }
 0x391   :  { %v1719_v26 = vpop.eup %1718  ;;  %v516_v27 = vmul.f32 %v1717_v25, %v507_v22  ;;  %v1486_v25 = vld [vmem:[%s2107_s10] ss:$0 sm:$0xff] }
 0x392   :  { %v509_v29 = vmul.f32 %v1719_v26, %v506_v24 }
 0x393   :  { %v518_v30 = vsel %vm517_vm0, %v507_v22, %v516_v27 }
 0x394   :  { %v521_v32 = vsel %vm519_vm2, %v520_v28, %v518_v30  ;;  %v511_v33 = vsel %vm510_vm5, %v506_v24, %v509_v29  ;;  %v829_v29 = vld [vmem:[%s2108_s16] sm:$0xff]  ;;  %v830_v30 = vld [vmem:[%s2108_s16 + $0x8] sm:$0x1] }
 0x395   :  { %v1478_v34 = vmul.f32 -1.442695, %v521_v32  ;;  %v514_v35 = vsel %vm512_vm8, %v513_v31, %v511_v33  ;;  %v1681_v31 = vpack.c.bf16 %v830_v30, %v829_v29 }
 0x396   :  { %v1477_v36 = vmul.f32 -1.442695, %v514_v35 }
 0x397   :  { %1720 = vpow2.f32 %v1478_v34  ;;  %1683 = vmatprep.subr.msk.bf16.mxu0 %vm1902_vm6, %v1681_v31 }
 0x398   :  { %1722 = vpow2.f32 %v1477_v36 }
 0x3a1   :  { %v1721_v37 = vpop.eup %1720 }
 0x3a2   :  { %v1723_v38 = vpop.eup %1722  ;;  %v529_v40 = vadd.f32 1.0, %v1721_v37 }
 0x3a3   :  { %v528_v41 = vadd.f32 1.0, %v1723_v38 }
 0x3a5   :  { %1724 = vrcp.f32 %v528_v41 }
 0x3a6   :  { %1726 = vrcp.f32 %v529_v40 }
 0x3af   :  { %v1725_v42 = vpop.eup %1724 }
 0x3b0   :  { %v1727_v43 = vpop.eup %1726  ;;  %1603 = vmatprep.mubr.msk.f32.mxu1 %vm247_vm14, %v1725_v42 }
 0x3b1   :  { %1604 = vmatmul.mubr.msk.f32.vlgmr.msra.gmra.mrb[2].mxu1 %vm247_vm14, %v1727_v43 }
 0x3b2   :  { %1615 = vmatprep.mubr.msk.bf16.mxu1 %vm1762_vm3, %v1760_v0  ;;  %1614 = vmatpush3.bf16.msra.mxu1 %v781_v61 }
 0x3b3   :  { %1632 = vmatprep.subr.bf16.mxu1 %v1760_v0 }
 0x3d3   :  { %v742_v62 = vpop.xlane.xlu1 %741 }
 0x3d4   :  { %v744_v63 = vmul.f32 0.083333336, %v742_v62  ;;  %v1099_v62 = vld [vmem:[%s2111_s17] sm:$0xff] }
 0x484   :  { %v1605_v44 = vpop.f32.mrb[2].mxu1 }
 0x485   :  { %v620_v45 = vmul.f32 %v1605_v44, %v414_v8  ;;  %v610_v46 = vpop.f32.mrb[3].mxu1  ;;  %v931_v44 = vld [vmem:[%s2109_s13] sm:$0x3] }
 0x486   :  { %v619_v47 = vmul.f32 %v610_v46, %v1961_v3  ;;  %v746_v3 = vadd.f32 1e-05, %v744_v63  ;;  %v1100_v63 = vld [vmem:[%s2111_s17 + $0x8] sm:$0x1] }
 0x487   :  { %v626_v49 = vmul.f32 %v620_v45, %v620_v45 }
 0x488   :  { %v625_v48 = vmul.f32 %v619_v47, %v619_v47 }
 0x48a   :  { %1610 = vmatprep.mubr.msk.f32.mxu0 %vm143_vm7, %v625_v48 }
 0x48b   :  { %1611 = vmatmul.mubr.msk.f32.vlgmr.msra.gmra.mrb[10].mxu0 %vm143_vm7, %v626_v49 }
 0x48c   :  { %1686 = vmatpush3.bf16.msk.msra.mxu0 %vm1902_vm6, %v1681_v31 }
 0x48d   :  { %1626 = vmatprep.subr.bf16.mxu0 %v1760_v0 }
 0x55e   :  { %v1612_v51 = vpop.f32.mrb[10].mxu0 }
 0x55f   :  { %v699_v52 = vpop.f32.mrb[11].mxu0  ;;  %v709_v55 = vmax.f32 %v1612_v51, 1e-08 }
 0x560   :  { %v708_v53 = vmax.f32 %v699_v52, 1e-08 }
 0x561   :  { %v713_v57 = vsel %vm247_vm14, %v709_v55, 0.0 }
 0x562   :  { %v710_v56 = vsel %vm247_vm14, %v708_v53, 0.0  ;;  %v1711_v53 = vld [vmem:[%s2110_s15] sm:$0x1f]  }
 0x563   :  { %711 = vadd.xlane.f32.xlu0 %v710_v56  ;;  %v1054_v60 = vand.u32 %v1711_v53, %v1937_v39  ;;  %v1495_v39 = vld [vmem:[%s2112_s14] ss:$0 sm:$0xff] }
 0x567   :  { %714 = vadd.xlane.f32.xlu0 %v713_v57 }
 0x56b   :  { %738 = vadd.xlane.f32.xlu0 %v737_v59 }
 0x5f0   :  { %v712_v1 = vpop.xlane.xlu0 %711 }
 0x5f1   :  { %v717_v2 = vmul.f32 0.33333334, %v712_v1  ;;  %v1687_v1 = vpack.c.bf16 %v1100_v63, %v1099_v62 }
 0x5f3   :  { %1728 = vrsqrt.f32 %v717_v2 }
 0x5f4   :  { %v715_v4 = vpop.xlane.xlu0 %714  ;;  %1730 = vrsqrt.f32 %v746_v3 }
 0x5f5   :  { %v718_v5 = vmul.f32 0.33333334, %v715_v4 }
 0x5f7   :  { %1732 = vrsqrt.f32 %v718_v5 }
 0x5f8   :  { %v739_v6 = vpop.xlane.xlu0 %738 }
 0x5f9   :  { %v743_v7 = vmul.f32 0.083333336, %v739_v6 }
 0x5fb   :  { %v745_v8 = vadd.f32 1e-05, %v743_v7 }
 0x5fd   :  { %1734 = vrsqrt.f32 %v745_v8  ;;  %v1729_v10 = vpop.eup %1728 }
 0x5fe   :  { %v1731_v11 = vpop.eup %1730  ;;  %v721_v15 = vmul.f32 %v1729_v10, %v619_v47 }
 0x5ff   :  { %v750_v17 = vmul.f32 %v1731_v11, %v1978_v18 }
 0x601   :  { %v1733_v14 = vpop.eup %1732  ;;  %v759_v23 = vmul.f32 %v1485_v21, %v750_v17 }
 0x602   :  { %v722_v16 = vmul.f32 %v1733_v14, %v620_v45  ;;  %v937_v45 = vand.u32 %v931_v44, %v1892_v9 }
 0x603   :  { %v768_v27 = vadd.f32 %v1486_v25, %v759_v23  ;;  %v1213_v23 = vld [vmem:[%s2113_s18] sm:$0x7]  ;;  %s1764_s18 = smov 12  }
 0x604   :  { %v771_v19 = vpack.c.bf16 %v722_v16, %v721_v15 }
 0x606   :  { %1616 = vmatmul.mubr.msk.bf16.vlgmr.msra.gmra.mrb[12].mxu1 %vm143_vm7, %v771_v19 }
 0x607   :  { %v1735_v22 = vpop.eup %1734  ;;  %1633 = vmatpush3.bf16.msra.mxu1 %v990_v20  ;;  %1634 = vmatprep.mubr.msk.bf16.mxu1 %vm1762_vm3, %v1760_v0 }
 0x608   :  { %v749_v24 = vmul.f32 %v1735_v22, %v733_v54  ;;  %1689 = vmatprep.subr.msk.bf16.mxu1 %vm1902_vm6, %v1687_v1 }
 0x60a   :  { %v758_v18 = vmul.f32 %v1485_v21, %v749_v24 }
 0x60c   :  { %v767_v26 = vadd.f32 %v1486_v25, %v758_v18 }
 0x60e   :  { %v826_v28 = vpack.c.bf16 %v768_v27, %v767_v26 }
 0x610   :  { %1635 = vmatmul.mubr.msk.bf16.vlgmr.msra.gmra.mrb[16].mxu1 %vm723_vm15, %v826_v28 }
 0x611   :  { %1692 = vmatpush3.bf16.msk.msra.mxu1 %vm1902_vm6, %v1687_v1 }
 0x612   :  { %1651 = vmatprep.subr.msk.mxu1 %vm89_vm1, %v1213_v23 }
 0x6d9   :  { %v817_v32 = vpop.f32.mrb[12].mxu1 }
 0x6da   :  { %v827_v33 = vmul.f32 %v817_v32, %v817_v32  ;;  %v1617_v34 = vpop.f32.mrb[13].mxu1 }
 0x6db   :  { %v820_v35 = vpop.f32.mrb[14].mxu1 }
 0x6dc   :  { %v828_v36 = vmul.f32 %v820_v35, %v820_v35  ;;  %v1044_v37 = vpack.c.bf16 %v820_v35, %v817_v32  ;;  %v1618_v38 = vpop.f32.mrb[15].mxu1  ;;  %1623 = vmatprep.mubr.msk.f32.mxu0 %vm143_vm7, %v827_v33 }
 0x6de   :  { %1624 = vmatmul.mubr.msk.f32.vlgmr.msra.gmra.mrb[12].mxu0 %vm143_vm7, %v828_v36 }
 0x6df   :  { %1628 = vmatprep.mubr.msk.bf16.mxu0 %vm1762_vm3, %v1760_v0  ;;  %1627 = vmatpush3.bf16.msra.mxu0 %v937_v45 }
 0x6e0   :  { %1638 = vmatprep.subr.bf16.mxu0 %v1760_v0 }
 0x6e3   :  { %v1026_v40 = vpop.f32.mrb[16].mxu1 }
 0x6e4   :  { %v1636_v41 = vpop.f32.mrb[17].mxu1 }
 0x6e5   :  { %v1029_v42 = vpop.f32.mrb[18].mxu1 }
 0x6e6   :  { %v1637_v43 = vpop.f32.mrb[19].mxu1 }
 0x7b1   :  { %v1625_v46 = vpop.f32.mrb[12].mxu0 }
 0x7b2   :  { %v916_v47 = vmax.f32 %v1625_v46, 1e-08  ;;  %v906_v48 = vpop.f32.mrb[13].mxu0 }
 0x7b3   :  { %v915_v49 = vmax.f32 %v906_v48, 1e-08 }
 0x7b4   :  { %1736 = vrsqrt.f32 %v916_v47  ;;  %vm926_vm10 = vcmp.eq.f32.partialorder %v916_v47, inf  ;;  %v929_v55 = vand.u32 2147483648, %v916_v47  ;;  %vm928_vm12 = vcmp.eq.f32.partialorder %v916_v47, 0.0 }
 0x7b5   :  { %1738 = vrsqrt.f32 %v915_v49  ;;  %vm919_vm11 = vcmp.eq.f32.partialorder %v915_v49, inf  ;;  %v922_v9 = vand.u32 2147483648, %v915_v49  ;;  %vm921_vm13 = vcmp.eq.f32.partialorder %v915_v49, 0.0 }
 0x7be   :  { %v1737_v50 = vpop.eup %1736 }
 0x7bf   :  { %v1739_v51 = vpop.eup %1738  ;;  %v925_v52 = vmul.f32 %v1737_v50, %v916_v47 }
 0x7c0   :  { %v918_v54 = vmul.f32 %v1739_v51, %v915_v49 }
 0x7c1   :  { %v927_v56 = vsel %vm926_vm10, %v916_v47, %v925_v52 }
 0x7c2   :  { %v920_v57 = vsel %vm919_vm11, %v915_v49, %v918_v54  ;;  %v930_v58 = vsel %vm928_vm12, %v929_v55, %v927_v56 }
 0x7c3   :  { %v923_v59 = vsel %vm921_vm13, %v922_v9, %v920_v57 }
 0x7c4   :  { %v932_v61 = vpack.c.bf16 %v930_v58, %v923_v59 }
 0x7c6   :  { %1629 = vmatmul.mubr.msk.bf16.vlgmr.msra.gmra.mrb[16].mxu0 %vm247_vm14, %v932_v61 }
 0x7c7   :  { %1639 = vmatpush3.bf16.msra.mxu0 %v1054_v60  ;;  %1640 = vmatprep.mubr.msk.bf16.mxu0 %vm1762_vm3, %v1760_v0 }
 0x7c8   :  { %1695 = vmatprep.subr.msk.bf16.mxu0 %vm1902_vm6, %v1687_v1 }
 0x7ce   :  { %1641 = vmatmul.mubr.msk.bf16.vlgmr.msra.gmra.mrb[20].mxu0 %vm143_vm7, %v1044_v37 }
 0x7cf   :  { %1698 = vmatpush3.bf16.msk.msra.mxu0 %vm1902_vm6, %v1687_v1 }
 0x899   :  { %v973_v0 = vpop.f32.mrb[16].mxu0 }
 0x89a   :  { %v1027_v2 = vadd.f32 %v1026_v40, %v973_v0  ;;  %v1630_v3 = vpop.f32.mrb[17].mxu0 }
 0x89b   :  { %v976_v4 = vpop.f32.mrb[18].mxu0 }
 0x89c   :  { %v1040_v5 = vadd.f32 %v1495_v39, %v1027_v2  ;;  %v1030_v6 = vadd.f32 %v1029_v42, %v976_v4  ;;  %v1631_v7 = vpop.f32.mrb[19].mxu0 }
 0x89e   :  { %v1041_v8 = vadd.f32 %v1495_v39, %v1030_v6  ;;  %v1300_v10 = vmax.f32 %v1040_v5, 0.0 }
 0x8a0   :  { %v2058_v11 = vmin.f32 %v1300_v10, 6.0  ;;  %v1301_v13 = vmax.f32 %v1041_v8, 0.0 }
 0x8a1   :  { %v1090_v14 = vpop.f32.mrb[20].mxu0 }
 0x8a2   :  { %v1097_v15 = vmul.f32 %v1090_v14, %v1090_v14  ;;  %v1642_v12 = vpop.f32.mrb[21].mxu0  ;;  %v1401_v16 = vsel %vm723_vm15, %v2058_v11, 0.0  ;;  %v1303_v17 = vmin.f32 %v1301_v13, 6.0 }
 0x8a3   :  { %v1093_v19 = vpop.f32.mrb[22].mxu0  ;;  %1402 = vadd.xlane.f32.xlu0 %v1401_v16 }
 0x8a4   :  { %v1098_v20 = vmul.f32 %v1093_v19, %v1093_v19  ;;  %v1643_v21 = vpop.f32.mrb[23].mxu0  ;;  %1648 = vmatprep.mubr.msk.f32.mxu1 %vm143_vm7, %v1097_v15  ;;  %v1404_v22 = vsel %vm723_vm15, %v1303_v17, 0.0 }
 0x8a5   :  { %1405 = vadd.xlane.f32.xlu1 %v1404_v22  ;;  %v1509_v21 = vld [vmem:[%s2114_s19] ss:$0 sm:$0xff] }
 0x8a6   :  { %1649 = vmatmul.mubr.msk.f32.vlgmr.msra.gmra.mrb[20].mxu1 %vm143_vm7, %v1098_v20 }
 0x8a7   :  { %1652 = vmatpush3.msk.msra.mxu1 %vm89_vm1, %v1213_v23 }
 0x930   :  { %v1403_v53 = vpop.xlane.xlu0 %1402 }
 0x931   :  { %v1407_v55 = vmul.f32 0.083333336, %v1403_v53 }
 0x932   :  { %v1406_v52 = vpop.xlane.xlu1 %1405 }
 0x933   :  { %v1408_v54 = vmul.f32 0.083333336, %v1406_v52  ;;  %v1409_v56 = vsub.f32 %v2058_v11, %v1407_v55 }
 0x935   :  { %v1410_v9 = vsub.f32 %v1303_v17, %v1408_v54  ;;  %v1411_v1 = vmul.f32 %v1409_v56, %v1409_v56 }
 0x937   :  { %v1412_v62 = vmul.f32 %v1410_v9, %v1410_v9  ;;  %v1413_v39 = vsel %vm723_vm15, %v1411_v1, 0.0 }
 0x939   :  { %v1416_v0 = vsel %vm723_vm15, %v1412_v62, 0.0 }
 0x979   :  { %v1650_v24 = vpop.f32.mrb[20].mxu1 }
 0x97a   :  { %v1186_v25 = vmax.f32 %v1650_v24, 1e-08  ;;  %v1176_v18 = vpop.f32.mrb[21].mxu1  ;;  %v1510_v24 = vld [vmem:[%s2115_s20] ss:$0 sm:$0xff] }
 0x97b   :  { %v1185_v26 = vmax.f32 %v1176_v18, 1e-08 }
 0x97c   :  { %1740 = vrsqrt.f32 %v1186_v25  ;;  %vm1196_vm3 = vcmp.eq.f32.partialorder %v1186_v25, inf  ;;  %v1199_v30 = vand.u32 2147483648, %v1186_v25  ;;  %vm1198_vm6 = vcmp.eq.f32.partialorder %v1186_v25, 0.0 }
 0x97d   :  { %1742 = vrsqrt.f32 %v1185_v26  ;;  %vm1189_vm0 = vcmp.eq.f32.partialorder %v1185_v26, inf  ;;  %v1192_v33 = vand.u32 2147483648, %v1185_v26  ;;  %vm1191_vm2 = vcmp.eq.f32.partialorder %v1185_v26, 0.0 }
 0x986   :  { %v1741_v27 = vpop.eup %1740 }
 0x987   :  { %v1743_v28 = vpop.eup %1742  ;;  %v1195_v29 = vmul.f32 %v1741_v27, %v1186_v25 }
 0x988   :  { %v1188_v31 = vmul.f32 %v1743_v28, %v1185_v26 }
 0x989   :  { %v1197_v32 = vsel %vm1196_vm3, %v1186_v25, %v1195_v29 }
 0x98a   :  { %v1200_v34 = vsel %vm1198_vm6, %v1199_v30, %v1197_v32  ;;  %v1190_v35 = vsel %vm1189_vm0, %v1185_v26, %v1188_v31 }
 0x98b   :  { %v1502_v36 = vmul.f32 -1.442695, %v1200_v34  ;;  %v1193_v37 = vsel %vm1191_vm2, %v1192_v33, %v1190_v35 }
 0x98c   :  { %v1501_v38 = vmul.f32 -1.442695, %v1193_v37 }
 0x98d   :  { %1744 = vpow2.f32 %v1502_v36 }
 0x98e   :  { %1746 = vpow2.f32 %v1501_v38 }
 0x997   :  { %v1745_v40 = vpop.eup %1744 }
 0x998   :  { %v1747_v41 = vpop.eup %1746  ;;  %v1208_v42 = vadd.f32 1.0, %v1745_v40 }
 0x999   :  { %v1207_v43 = vadd.f32 1.0, %v1747_v41 }
 0x99b   :  { %1748 = vrcp.f32 %v1207_v43 }
 0x99c   :  { %1750 = vrcp.f32 %v1208_v42 }
 0x9a5   :  { %v1749_v44 = vpop.eup %1748 }
 0x9a6   :  { %v1751_v45 = vpop.eup %1750  ;;  %1653 = vmatprep.mubr.msk.f32.mxu1 %vm247_vm14, %v1749_v44 }
 0x9a7   :  { %1654 = vmatmul.mubr.msk.f32.vlgmr.msra.gmra.mrb[22].mxu1 %vm247_vm14, %v1751_v45 }
 0xa7a   :  { %v1655_v46 = vpop.f32.mrb[22].mxu1 }
 0xa7b   :  { %v1299_v47 = vmul.f32 %v1655_v46, %v1093_v19  ;;  %v1289_v48 = vpop.f32.mrb[23].mxu1 }
 0xa7c   :  { %v1298_v49 = vmul.f32 %v1289_v48, %v1090_v14 }
 0xa7d   :  { %v1305_v51 = vmul.f32 %v1299_v47, %v1299_v47 }
 0xa7e   :  { %v1304_v50 = vmul.f32 %v1298_v49, %v1298_v49 }
 0xa80   :  { %1660 = vmatprep.mubr.msk.f32.mxu0 %vm143_vm7, %v1304_v50 }
 0xa81   :  { %1661 = vmatmul.mubr.msk.f32.vlgmr.msra.gmra.mrb[14].mxu0 %vm143_vm7, %v1305_v51 }
 0xb54   :  { %v1662_v57 = vpop.f32.mrb[14].mxu0 }
 0xb55   :  { %v1388_v58 = vmax.f32 %v1662_v57, 1e-08  ;;  %v1378_v59 = vpop.f32.mrb[15].mxu0 }
 0xb56   :  { %v1387_v60 = vmax.f32 %v1378_v59, 1e-08 }
 0xb57   :  { %v1392_v61 = vsel %vm247_vm14, %v1388_v58, 0.0 }
 0xb58   :  { %1393 = vadd.xlane.f32.xlu1 %v1392_v61  ;;  %v1389_v63 = vsel %vm247_vm14, %v1387_v60, 0.0 }
 0xb59   :  { %1390 = vadd.xlane.f32.xlu0 %v1389_v63 }
 0xb5c   :  { %1417 = vadd.xlane.f32.xlu1 %v1416_v0 }
 0xb5d   :  { %1414 = vadd.xlane.f32.xlu0 %v1413_v39 }
 0xbe5   :  { %v1394_v2 = vpop.xlane.xlu1 %1393 }
 0xbe6   :  { %v1396_v3 = vmul.f32 0.33333334, %v1394_v2  ;;  %v1391_v4 = vpop.xlane.xlu0 %1390 }
 0xbe7   :  { %v1395_v5 = vmul.f32 0.33333334, %v1391_v4 }
 0xbe8   :  { %1752 = vrsqrt.f32 %v1396_v3 }
 0xbe9   :  { %1754 = vrsqrt.f32 %v1395_v5  ;;  %v1418_v11 = vpop.xlane.xlu1 %1417 }
 0xbea   :  { %v1415_v13 = vpop.xlane.xlu0 %1414  ;;  %v1420_v14 = vmul.f32 0.083333336, %v1418_v11 }
 0xbeb   :  { %v1419_v15 = vmul.f32 0.083333336, %v1415_v13 }
 0xbec   :  { %v1422_v12 = vadd.f32 1e-05, %v1420_v14 }
 0xbed   :  { %v1421_v16 = vadd.f32 1e-05, %v1419_v15 }
 0xbee   :  { %1756 = vrsqrt.f32 %v1422_v12 }
 0xbef   :  { %1758 = vrsqrt.f32 %v1421_v16 }
 0xbf2   :  { %v1753_v6 = vpop.eup %1752 }
 0xbf3   :  { %v1755_v7 = vpop.eup %1754  ;;  %v1400_v8 = vmul.f32 %v1753_v6, %v1299_v47 }
 0xbf4   :  { %v1399_v10 = vmul.f32 %v1755_v7, %v1298_v49 }
 0xbf5   :  { %1449 = vrot.lane.b32.xlu1 %v1400_v8, %s1764_s18 }
 0xbf6   :  { %1447 = vrot.lane.b32.xlu0 %v1399_v10, %s1764_s18 }
 0xbf8   :  { %v1757_v17 = vpop.eup %1756 }
 0xbf9   :  { %v1759_v19 = vpop.eup %1758  ;;  %v1426_v20 = vmul.f32 %v1757_v17, %v1410_v9 }
 0xbfa   :  { %v1425_v22 = vmul.f32 %v1759_v19, %v1409_v56 }
 0xbfb   :  { %v1435_v23 = vmul.f32 %v1509_v21, %v1426_v20 }
 0xbfc   :  { %v1434_v25 = vmul.f32 %v1509_v21, %v1425_v22 }
 0xbfd   :  { %v1444_v18 = vadd.f32 %v1510_v24, %v1435_v23 }
 0xbfe   :  { %v1443_v27 = vadd.f32 %v1510_v24, %v1434_v25 }
 0xc67   :  { %v1450_v26 = vpop.permute.xlu1 %1449 }
 0xc68   :  { %v1454_v28 = vsel %vm723_vm15, %v1444_v18, %v1450_v26  ;;  %v1448_v29 = vpop.permute.xlu0 %1447 }
 0xc69   :  { %1456 = vst.msk [vmem:[%s2116_s21 + $0x8] sm:$0xff] %vm84_vm4, %v1454_v28  ;;  %v1453_v30 = vsel %vm723_vm15, %v1443_v27, %v1448_v29 }
 0xc6a   :  { %1455 = vst.msk [vmem:[%s2116_s21] sm:$0xff] %vm84_vm4, %v1453_v30 }

// kernel: gvpgnn_forward.8
= control target key start
LH: loop header
LB: loop body
LE: loop exit
PB: predicated region body
PF: predicated region fallthrough
CT: control target
= control target key end

     0   :  { %vm52_vm0 = vcmask 1046528   ;;  %vm53_vm1 = vcmask 1047552   ;;  %v569_v0 = vmov 0.0   ;;  %v570_v2 = vmov 65535   ;;  %s706_s8 = inlined_call_operand.vmem [shape: f32[4,12], index: 8, kind: input, shape index: {}]   ;;  %s707_s1 = inlined_call_operand.vmem [shape: bf16[15,16], index: 1, kind: input, shape index: {}]   ;;  %s708_s2 = inlined_call_operand.vmem [shape: bf16[15,12], index: 2, kind: input, shape index: {}]   ;;  %s709_s0 = inlined_call_operand.vmem [shape: f32[8,15], index: 0, kind: input, shape index: {}]   ;;  %s710_s6 = inlined_call_operand.vmem [shape: f32[12,4], index: 6, kind: input, shape index: {}, may-alias: {6,7}]   ;;  %s711_s3 = inlined_call_operand.vmem [shape: bf16[4,16], index: 3, kind: input, shape index: {}]   ;;  %s712_s5 = inlined_call_operand.vmem [shape: bf16[12,12], index: 5, kind: input, shape index: {}]   ;;  %s713_s7 = inlined_call_operand.vmem [shape: f32[12,4], index: 7, kind: input, shape index: {}, may-alias: {6,7}]   ;;  %s714_s4 = inlined_call_operand.vmem [shape: f32[1,16], index: 4, kind: input, shape index: {}]   ;;  %s715_s9 = inlined_call_operand.vmem [shape: f32[1,16], index: 9, kind: input, shape index: {}]   ;;  %s716_s10 = inlined_call_operand.vmem [shape: f32[1,16], index: 10, kind: input, shape index: {}]   ;;  %s717_s11 = inlined_call_operand.vmem [shape: f32[8,28], index: 11, kind: output, shape index: {}]  }
   0x1   :  { %508 = vmatprep.subr.bf16.mxu0 %v569_v0  ;;  %v560_v1 = vld [vmem:[%s708_s2] sm:$0xff]   ;;  %v54_v3 = vsel %vm52_vm0, 4294967295, %v570_v2  ;;  %vm571_vm2 = vmmov 0   ;;  %v572_v9 = vmov 0.0|0.0   ;;  %vm48_vm3 = vcmask 121856  }
   0x2   :  { %v55_v4 = vsel %vm53_vm1, %v54_v3, 0  ;;  %v561_v5 = vld [vmem:[%s707_s1] sm:$0xff]   ;;  %510 = vmatprep.mubr.msk.bf16.mxu0 %vm571_vm2, %v569_v0  ;;  %546 = vmatprep.subr.bf16.mxu1 %v572_v9  ;;  %v103_v12 = vld [vmem:[%s710_s6 + $0x8] sm:$0xf]  ;;  %vm108_vm4 = vcmask 1043456   ;;  %vm573_vm5 = vmmov 1  }
   0x3   :  { %v57_v6 = vand.u32 %v560_v1, %v55_v4  ;;  %v39_v7 = vld [vmem:[%s709_s0] sm:$0xff]  ;;  %v246_v10 = vand.u32 %v561_v5, %v55_v4  ;;  %518 = vmatprep.mubr.msk.f32.mxu1 %vm571_vm2, %v569_v0  ;;  %vm660_vm6 = vmpackc.low %vm108_vm4, %vm573_vm5  ;;  %vm104_vm7 = vcmask 97280   ;;  %vm196_vm8 = vcmask 1041408   ;;  %v353_v39 = vld [vmem:[%s713_s7 + $0x8] sm:$0xf] }
   0x4   :  { %v42_v8 = vpack.c.bf16 %v39_v7, %v39_v7  ;;  %v102_v11 = vld [vmem:[%s710_s6] sm:$0xff]  ;;  %vm307_vm10 = vcmask 1045504   ;;  %vm192_vm12 = vcmask 31744   ;;  %vm438_vm13 = vcmask 130048  }
   0x5   :  { %509 = vmatpush3.bf16.msra.mxu0 %v57_v6  ;;  %v547_v13 = vpack.c.bf16 %v103_v12, %v102_v11  ;;  %v190_v20 = vld [vmem:[%s711_s3] sm:$0x3]  ;;  %vm474_vm14 = vcmask 228352  }
   0x6   :  { %527 = vmatprep.subr.bf16.mxu0 %v569_v0  ;;  %v198_v21 = vsel %vm196_vm8, %v190_v20, 0  ;;  %v562_v27 = vld [vmem:[%s712_s5] sm:$0x3f]  }
   0x7   :  { %549 = vmatpush3.bf16.msk.msra.mxu1 %vm660_vm6, %v547_v13  ;;  %v309_v32 = vsel %vm307_vm10, %v562_v27, 0  ;;  %v352_v38 = vld [vmem:[%s713_s7] sm:$0xff] }
   0x8   :  { %511 = vmatmul.mubr.msk.bf16.vlgmr.msra.gmra.mrb[0].mxu0 %vm48_vm3, %v42_v8  ;;  %521 = vmatprep.subr.bf16.mxu1 %v569_v0  ;;  %v551_v40 = vpack.c.bf16 %v353_v39, %v352_v38  ;;  %v487_v42 = vld [vmem:[%s714_s4] ss:$0 sm:$0xff]  ;;  %s574_s4 = smov 16  }
   0x9   :  { %528 = vmatpush3.bf16.msra.mxu0 %v246_v10  ;;  %529 = vmatprep.mubr.msk.bf16.mxu0 %vm571_vm2, %v569_v0  ;;  %v493_v10 = vld [vmem:[%s716_s10] ss:$0 sm:$0xff] }
   0xa   :  { %550 = vmatprep.subr.bf16.mxu0 %v572_v9 }
  0x10   :  { %530 = vmatmul.mubr.msk.bf16.vlgmr.msra.gmra.mrb[4].mxu0 %vm48_vm3, %v42_v8  ;;  %v492_v8 = vld [vmem:[%s715_s9] ss:$0 sm:$0xff] }
  0x11   :  { %543 = vmatprep.mubr.msk.f32.mxu0 %vm571_vm2, %v569_v0  ;;  %553 = vmatpush3.bf16.msk.msra.mxu0 %vm660_vm6, %v551_v40 }
  0xdb   :  { %v93_v15 = vpop.f32.mrb[0].mxu0 }
  0xdc   :  { %v101_v16 = vmul.f32 %v93_v15, %v93_v15  ;;  %v512_v17 = vpop.f32.mrb[1].mxu0  ;;  %v298_v33 = vpack.c.bf16 %v93_v15, %v93_v15 }
  0xdd   :  { %v96_v18 = vpop.f32.mrb[2].mxu0 }
  0xde   :  { %v513_v19 = vpop.f32.mrb[3].mxu0  ;;  %519 = vmatmul.mubr.msk.f32.vlgmr.msra.gmra.mrb[0].mxu1 %vm104_vm7, %v101_v16 }
  0xdf   :  { %523 = vmatprep.mubr.msk.bf16.mxu1 %vm571_vm2, %v569_v0  ;;  %522 = vmatpush3.bf16.msra.mxu1 %v198_v21 }
  0xe0   :  { %533 = vmatprep.subr.bf16.mxu1 %v569_v0 }
  0xe3   :  { %v282_v34 = vpop.f32.mrb[4].mxu0 }
  0xe4   :  { %v531_v35 = vpop.f32.mrb[5].mxu0 }
  0xe5   :  { %v285_v36 = vpop.f32.mrb[6].mxu0 }
  0xe6   :  { %v532_v37 = vpop.f32.mrb[7].mxu0 }
 0x1b1   :  { %v178_v22 = vpop.f32.mrb[0].mxu1 }
 0x1b2   :  { %v182_v23 = vmax.f32 %v178_v22, 1e-08  ;;  %v520_v24 = vpop.f32.mrb[1].mxu1 }
 0x1b4   :  { %563 = vrsqrt.f32 %v182_v23  ;;  %vm185_vm9 = vcmp.eq.f32.partialorder %v182_v23, inf  ;;  %v188_v28 = vand.u32 2147483648, %v182_v23  ;;  %vm187_vm11 = vcmp.eq.f32.partialorder %v182_v23, 0.0 }
 0x1be   :  { %v564_v25 = vpop.eup %563 }
 0x1bf   :  { %v184_v26 = vmul.f32 %v564_v25, %v182_v23 }
 0x1c1   :  { %v186_v29 = vsel %vm185_vm9, %v182_v23, %v184_v26 }
 0x1c2   :  { %v189_v30 = vsel %vm187_vm11, %v188_v28, %v186_v29 }
 0x1c3   :  { %v191_v31 = vpack.c.bf16 %v189_v30, %v189_v30 }
 0x1c5   :  { %524 = vmatmul.mubr.msk.bf16.vlgmr.msra.gmra.mrb[4].mxu1 %vm192_vm12, %v191_v31 }
 0x1c6   :  { %534 = vmatpush3.bf16.msra.mxu1 %v309_v32  ;;  %535 = vmatprep.mubr.msk.bf16.mxu1 %vm571_vm2, %v569_v0 }
 0x1cd   :  { %536 = vmatmul.mubr.msk.bf16.vlgmr.msra.gmra.mrb[8].mxu1 %vm104_vm7, %v298_v33 }
 0x298   :  { %v234_v41 = vpop.f32.mrb[4].mxu1 }
 0x299   :  { %v283_v43 = vadd.f32 %v282_v34, %v234_v41  ;;  %v525_v44 = vpop.f32.mrb[5].mxu1 }
 0x29a   :  { %v237_v45 = vpop.f32.mrb[6].mxu1 }
 0x29b   :  { %v526_v46 = vpop.f32.mrb[7].mxu1  ;;  %v295_v47 = vadd.f32 %v487_v42, %v283_v43 }
 0x29d   :  { %v439_v48 = vsel %vm438_vm13, %v295_v47, 0.0 }
 0x29e   :  { %440 = vadd.xlane.f32.xlu0 %v439_v48 }
 0x2a0   :  { %v345_v49 = vpop.f32.mrb[8].mxu1 }
 0x2a1   :  { %v351_v50 = vmul.f32 %v345_v49, %v345_v49  ;;  %v537_v51 = vpop.f32.mrb[9].mxu1 }
 0x2a2   :  { %v348_v52 = vpop.f32.mrb[10].mxu1 }
 0x2a3   :  { %v538_v53 = vpop.f32.mrb[11].mxu1  ;;  %544 = vmatmul.mubr.msk.f32.vlgmr.msra.gmra.mrb[8].mxu0 %vm104_vm7, %v351_v50 }
 0x32b   :  { %v441_v54 = vpop.xlane.xlu0 %440 }
 0x32c   :  { %v443_v55 = vmul.f32 0.0625, %v441_v54 }
 0x32e   :  { %v444_v56 = vsub.f32 %v295_v47, %v443_v55 }
 0x330   :  { %v445_v57 = vmul.f32 %v444_v56, %v444_v56 }
 0x332   :  { %v446_v58 = vsel %vm438_vm13, %v445_v57, 0.0 }
 0x333   :  { %447 = vadd.xlane.f32.xlu1 %v446_v58 }
 0x376   :  { %v426_v59 = vpop.f32.mrb[8].mxu0 }
 0x377   :  { %v430_v60 = vmax.f32 %v426_v59, 1e-08  ;;  %v545_v61 = vpop.f32.mrb[9].mxu0 }
 0x379   :  { %v431_v62 = vsel %vm192_vm12, %v430_v60, 0.0 }
 0x37a   :  { %432 = vadd.xlane.f32.xlu0 %v431_v62 }
 0x3c0   :  { %v448_v3 = vpop.xlane.xlu1 %447 }
 0x3c1   :  { %v449_v4 = vmul.f32 0.0625, %v448_v3 }
 0x3c3   :  { %v450_v5 = vadd.f32 1e-05, %v449_v4 }
 0x407   :  { %v433_v63 = vpop.xlane.xlu0 %432 }
 0x408   :  { %v435_v0 = vmul.f32 0.25, %v433_v63 }
 0x40a   :  { %565 = vrsqrt.f32 %v435_v0 }
 0x40b   :  { %567 = vrsqrt.f32 %v450_v5 }
 0x414   :  { %v566_v1 = vpop.eup %565 }
 0x415   :  { %v437_v2 = vmul.f32 %v566_v1, %v345_v49  ;;  %v568_v6 = vpop.eup %567 }
 0x416   :  { %v452_v7 = vmul.f32 %v568_v6, %v444_v56 }
 0x417   :  { %470 = vrot.lane.b32.xlu1 %v437_v2, %s574_s4 }
 0x418   :  { %v460_v9 = vmul.f32 %v492_v8, %v452_v7 }
 0x41a   :  { %v468_v11 = vadd.f32 %v493_v10, %v460_v9 }
 0x489   :  { %v471_v12 = vpop.permute.xlu1 %470 }
 0x48a   :  { %v473_v13 = vsel %vm438_vm13, %v468_v11, %v471_v12 }
 0x48b   :  { %475 = vst.msk [vmem:[%s717_s11] sm:$0xff] %vm474_vm14, %v473_v13 }

// kernel: gvpgnn_forward.12
= control target key start
LH: loop header
LB: loop body
LE: loop exit
PB: predicated region body
PF: predicated region fallthrough
CT: control target
= control target key end

     0   :  { %vm22_vm0 = vcmask 228352   ;;  %v25_v0 = vlaneseq  ;;  %v126_v1 = vmov 0.0   ;;  %vm127_vm1 = vmmov 0   ;;  %s175_s0 = inlined_call_operand.vmem [shape: s32[1,16], index: 0, kind: input, shape index: {}]   ;;  %s176_s2 = inlined_call_operand.vmem [shape: f32[16,28], index: 2, kind: input, shape index: {}]   ;;  %s177_s1 = inlined_call_operand.vmem [shape: f32[8,1], index: 1, kind: input, shape index: {}]   ;;  %s178_s3 = inlined_call_operand.vmem [shape: f32[8,28], index: 3, kind: input, shape index: {}]   ;;  %s179_s4 = inlined_call_operand.vmem [shape: f32[8,28], index: 4, kind: output, shape index: {}]  }
   0x1   :  { %23 = vst.msk [vmem:[#allocation2] sm:$0xff] %vm22_vm0, %v126_v1  ;;  %v111_v2 = vld [vmem:[%s175_s0] ss:$0 sm:$0xff]  ;;  %116 = vmatprep.subr.bf16.mxu0 %v126_v1  ;;  %v39_v4 = vld [vmem:[%s176_s2 + $0x8] sm:$0xff]  ;;  %118 = vmatprep.mubr.msk.bf16.mxu0 %vm127_vm1, %v126_v1  ;;  %v128_v7 = vmov 0   ;;  %vm42_vm3 = vcmask 130048  }
   0x2   :  { %v38_v3 = vld [vmem:[%s176_s2] sm:$0xff]  ;;  %v26_v5 = vshrl.u32 %v25_v0, 7  ;;  %125 = vset.pattern.permute.xlu0 %v128_v7  ;;  %v93_v15 = vand.u32 127, %v25_v0 }
   0x3   :  { %v40_v6 = vpack.c.bf16 %v39_v4, %v38_v3  ;;  %v95_v8 = vld [vmem:[%s177_s1] sm:$0xff] }
   0x4   :  { %98 = vperm.xlu0 %125, %v95_v8   ;;  %vm34_vm2 = vcmp.eq.s32.totalorder %v26_v5, %v111_v2  ;;  %vm94_vm4 = vcmp.lt.s32.totalorder %v93_v15, 16  ;;  %v102_v20 = vld [vmem:[%s178_s3] sm:$0xff] }
   0x5   :  { %117 = vmatpush3.bf16.msra.mxu0 %v40_v6  ;;  %v112_v9 = vsel %vm34_vm2, 1.0, %v126_v1 }
   0x6   :  { %v37_v10 = vpack.c.bf16 %v112_v9, %v112_v9 }
   0x8   :  { %119 = vmatmul.mubr.msk.bf16.vlgmr.msra.gmra.mrb[0].mxu0 %vm42_vm3, %v37_v10  ;;  %v41_v11 = vld [vmem:[#allocation2] sm:$0xff] }
  0x83   :  { %v99_v18 = vpop.permute.xlu0 %98 }
  0x84   :  { %v101_v19 = vsel %vm94_vm4, %v99_v18, 1.0 }
  0xdb   :  { %v80_v12 = vpop.f32.mrb[0].mxu0 }
  0xdc   :  { %v86_v13 = vadd.f32 %v80_v12, %v41_v11  ;;  %v120_v14 = vpop.f32.mrb[1].mxu0 }
  0xdd   :  { %v83_v16 = vpop.f32.mrb[2].mxu0 }
  0xde   :  { %88 = vst.msk [vmem:[#allocation2] sm:$0xff] %vm22_vm0, %v86_v13  ;;  %v121_v17 = vpop.f32.mrb[3].mxu0 }
  0xe5   :  { %v103_v21 = vld [vmem:[#allocation2] sm:$0xff] }
  0xe6   :  { %v104_v22 = vmul.f32 %v103_v21, %v101_v19 }
  0xe8   :  { %v105_v23 = vadd.f32 %v104_v22, %v102_v20 }
  0xea   :  { %106 = vst.msk [vmem:[%s179_s4] sm:$0xff] %vm22_vm0, %v105_v23 }

// kernel: gvpgnn_forward.11
= control target key start
LH: loop header
LB: loop body
LE: loop exit
PB: predicated region body
PF: predicated region fallthrough
CT: control target
= control target key end

     0   :  { %vm108_vm0 = vcmask 1041408   ;;  %vm109_vm1 = vcmask 1042432   ;;  %v1940_v0 = vmov 0.0   ;;  %v1941_v2 = vmov 65535   ;;  %s2318_s5 = inlined_call_operand.vmem [shape: bf16[21,21], index: 5, kind: input, shape index: {}]   ;;  %s2319_s1 = inlined_call_operand.vmem [shape: f32[16,21], index: 1, kind: input, shape index: {}]   ;;  %s2320_s4 = inlined_call_operand.vmem [shape: bf16[28,21], index: 4, kind: input, shape index: {}]   ;;  %s2321_s9 = inlined_call_operand.vmem [shape: f32[21,7], index: 9, kind: input, shape index: {}]   ;;  %s2322_s0 = inlined_call_operand.vmem [shape: f32[16,28], index: 0, kind: input, shape index: {}]   ;;  %s2323_s8 = inlined_call_operand.vmem [shape: bf16[21,12], index: 8, kind: input, shape index: {}]   ;;  %s2324_s3 = inlined_call_operand.vmem [shape: bf16[21,16], index: 3, kind: input, shape index: {}]   ;;  %s2325_s2 = inlined_call_operand.vmem [shape: bf16[28,16], index: 2, kind: input, shape index: {}]   ;;  %s2326_s6 = inlined_call_operand.vmem [shape: bf16[7,16], index: 6, kind: input, shape index: {}]   ;;  %s2327_s10 = inlined_call_operand.vmem [shape: f32[12,4], index: 10, kind: input, shape index: {}, may-alias: {10,19,20}]   ;;  %s2328_s11 = inlined_call_operand.vmem [shape: f32[4,12], index: 11, kind: input, shape index: {}, may-alias: {11,21}]   ;;  %s2329_s7 = inlined_call_operand.vmem [shape: f32[1,16], index: 7, kind: input, shape index: {}]   ;;  %s2330_s15 = inlined_call_operand.vmem [shape: bf16[12,12], index: 15, kind: input, shape index: {}]   ;;  %s2331_s14 = inlined_call_operand.vmem [shape: bf16[16,16], index: 14, kind: input, shape index: {}]   ;;  %s2332_s12 = inlined_call_operand.vmem [shape: f32[1,16], index: 12, kind: input, shape index: {}]   ;;  %s2333_s13 = inlined_call_operand.vmem [shape: f32[1,16], index: 13, kind: input, shape index: {}]   ;;  %s2334_s19 = inlined_call_operand.vmem [shape: f32[12,4], index: 19, kind: input, shape index: {}, may-alias: {10,19,20}]   ;;  %s2335_s16 = inlined_call_operand.vmem [shape: bf16[4,16], index: 16, kind: input, shape index: {}]   ;;  %s2336_s18 = inlined_call_operand.vmem [shape: bf16[12,12], index: 18, kind: input, shape index: {}]   ;;  %s2337_s20 = inlined_call_operand.vmem [shape: f32[12,4], index: 20, kind: input, shape index: {}, may-alias: {10,19,20}]   ;;  %s2338_s17 = inlined_call_operand.vmem [shape: f32[1,16], index: 17, kind: input, shape index: {}]   ;;  %s2339_s21 = inlined_call_operand.vmem [shape: f32[4,12], index: 21, kind: input, shape index: {}, may-alias: {11,21}]   ;;  %s2340_s22 = inlined_call_operand.vmem [shape: f32[1,16], index: 22, kind: input, shape index: {}]   ;;  %s2341_s23 = inlined_call_operand.vmem [shape: f32[1,16], index: 23, kind: input, shape index: {}]   ;;  %s2342_s24 = inlined_call_operand.vmem [shape: f32[16,28], index: 24, kind: output, shape index: {}]  }
   0x1   :  { %2351 = sst [smem:[#allocation2_spill]] %s2318_s5  ;;  %1712 = vmatprep.subr.bf16.mxu0 %v1940_v0  ;;  %v110_v3 = vsel %vm108_vm0, 4294967295, %v1941_v2  ;;  %1728 = vmatprep.subr.bf16.mxu1 %v1940_v0  ;;  %v2081_v6 = vsel %vm109_vm1, 4294967295, %v1941_v2  ;;  %vm1942_vm2 = vmmov 0   ;;  %vm104_vm3 = vcmask 171008   ;;  %v559_v40 = vld [vmem:[%s2327_s10] sm:$0xff] }
   0x2   :  { %2352 = sst [smem:[#allocation3_spill]] %s2319_s1  ;;  %s2360_s27 = sld [smem:[#allocation2_spill]]  ;;  %v2079_v5 = vsel %vm109_vm1, %v110_v3, 0  ;;  %1716 = vmatprep.mubr.msk.bf16.mxu0 %vm1942_vm2, %v1940_v0  ;;  %1732 = vmatprep.mubr.msk.bf16.mxu1 %vm1942_vm2, %v1940_v0  ;;  %vm171_vm4 = vcmask 1045504   ;;  %vm167_vm5 = vcmask 228352   ;;  %vm338_vm6 = vcmask 1044480  }
   0x3   :  { %2353 = sst [smem:[#allocation4_spill]] %s2320_s4  ;;  %s2361_s29 = sld [smem:[#allocation3_spill]]  ;;  %vm439_vm7 = vcmask 1043456   ;;  %v560_v41 = vld [vmem:[%s2327_s10 + $0x8] sm:$0xf]  ;;  %vm1943_vm8 = vmmov 1  }
   0x4   :  { %2354 = sst [smem:[#allocation5_spill]] %s2321_s9  ;;  %s2362_s25 = sld [smem:[#allocation4_spill]]  ;;  %v441_v38 = vsel %vm439_vm7, %v2081_v6, 0  ;;  %vm2173_vm9 = vmpackc.low %vm439_vm7, %vm1943_vm8  ;;  %v1840_v43 = vpack.c.bf16 %v560_v41, %v559_v40  ;;  %vm435_vm14 = vcmask 56320   ;;  %vm561_vm15 = vcmask 97280  }
   0x5   :  { %2355 = sst [smem:[#allocation6_spill]] %s2322_s0  ;;  %vm864_vm1 = vcmask 130048  }
   0x6   :  { %2356 = sst [smem:[#allocation7_spill]] %s2323_s8 }
   0x7   :  { %2357 = sst [smem:[#allocation8_spill]] %s2324_s3 }
   0x8   :  { %2358 = sst [smem:[#allocation9_spill]] %s2325_s2  ;;  %v1879_v1 = vld [vmem:[%s2360_s27] sm:$0xff]   ;;  %v1880_v4 = vld [vmem:[%s2360_s27 + $0x8] ss:$0 sps:$4 sm:$0x77]   ;;  %s2363_s27 = sld [smem:[#allocation5_spill]] }
   0x9   :  { %2359 = sst [smem:[#allocation10_spill]] %s2326_s6  ;;  %1713 = vmatpush3.bf16.msra.mxu0 %v1879_v1  ;;  %v80_v7 = vld [vmem:[%s2361_s29] sm:$0xff]  ;;  %v81_v8 = vld [vmem:[%s2361_s29 + $0x8] sm:$0xff]  ;;  %v113_v9 = vand.u32 %v1880_v4, %v2079_v5  ;;  %s2364_s29 = sld [smem:[#allocation6_spill]] }
   0xa   :  { %1714 = vmatprep.subr.bf16.mxu0 %v1940_v0  ;;  %v94_v10 = vpack.c.bf16 %v81_v8, %v80_v7  ;;  %v1881_v11 = vld [vmem:[%s2362_s25] sm:$0xff]   ;;  %v1882_v12 = vld [vmem:[%s2362_s25 + $0x8] sm:$0x3f]   ;;  %s2365_s1 = sld [smem:[#allocation8_spill]]  ;;  %s2366_s3 = sld [smem:[#allocation9_spill]] }
   0xb   :  { %v173_v15 = vsel %vm171_vm4, %v1882_v12, 0  ;;  %v674_v12 = vld [vmem:[%s2328_s11] sm:$0xf] }
   0xd   :  { %1715 = vmatpush3.bf16.msra.mxu0 %v113_v9 }
   0xe   :  { %1720 = vmatprep.subr.bf16.mxu0 %v1940_v0  ;;  %v329_v13 = vld [vmem:[%s2363_s27] sm:$0xff]  ;;  %v330_v14 = vld [vmem:[%s2363_s27 + $0x8] sm:$0xff]  ;;  %v331_v20 = vld [vmem:[%s2363_s27 + $0x10] sm:$0x1f] }
   0xf   :  { %v1836_v16 = vpack.c.bf16 %v330_v14, %v329_v13  ;;  %v78_v17 = vld [vmem:[%s2364_s29] sm:$0xff]  ;;  %v79_v18 = vld [vmem:[%s2364_s29 + $0x8] sm:$0xff]  ;;  %s2367_s29 = sld [smem:[#allocation7_spill]] }
  0x10   :  { %1717 = vmatmul.mubr.msk.bf16.vlgmr.msra.gmra.mrb[0].mxu0 %vm104_vm3, %v94_v10  ;;  %v86_v19 = vpack.c.bf16 %v79_v18, %v78_v17  ;;  %v1885_v21 = vld [vmem:[%s2365_s1] sm:$0xff]   ;;  %v1886_v22 = vld [vmem:[%s2365_s1 + $0x8] ss:$0 sps:$4 sm:$0x77]   ;;  %s2368_s1 = sld [smem:[#allocation10_spill]] }
  0x11   :  { %1721 = vmatpush3.bf16.msra.mxu0 %v1881_v11  ;;  %1724 = vmatprep.mubr.msk.bf16.mxu0 %vm1942_vm2, %v1940_v0  ;;  %v229_v23 = vand.u32 %v1886_v22, %v2079_v5  ;;  %v1887_v24 = vld [vmem:[%s2366_s3] sm:$0xff]   ;;  %v1888_v35 = vld [vmem:[%s2366_s3 + $0x8] sm:$0x3f]  }
  0x12   :  { %1722 = vmatprep.subr.bf16.mxu0 %v1940_v0  ;;  %1729 = vmatpush3.bf16.msra.mxu1 %v1885_v21  ;;  %v284_v36 = vsel %vm171_vm4, %v1888_v35, 0  ;;  %v1615_v14 = vld [vmem:[%s2329_s7] ss:$0 sm:$0xff] }
  0x13   :  { %1730 = vmatprep.subr.bf16.mxu1 %v1940_v0 }
  0x15   :  { %1723 = vmatpush3.bf16.msra.mxu0 %v173_v15  ;;  %v1883_v29 = vld [vmem:[%s2367_s29] sm:$0xff]   ;;  %v1884_v30 = vld [vmem:[%s2367_s29 + $0x8] ss:$0 sps:$4 sm:$0x77]  }
  0x16   :  { %1837 = vmatprep.subr.bf16.mxu0 %v1836_v16  ;;  %1731 = vmatpush3.bf16.msra.mxu1 %v229_v23  ;;  %v514_v34 = vand.u32 %v1884_v30, %v2079_v5  ;;  %v433_v37 = vld [vmem:[%s2368_s1] sm:$0xf] }
  0x17   :  { %1736 = vmatprep.subr.bf16.mxu1 %v1940_v0  ;;  %v443_v39 = vand.u32 %v441_v38, %v433_v37 }
  0x19   :  { %1733 = vmatmul.mubr.msk.bf16.vlgmr.msra.gmra.mrb[0].mxu1 %vm104_vm3, %v94_v10 }
  0x1a   :  { %1737 = vmatpush3.bf16.msra.mxu1 %v1887_v24  ;;  %1740 = vmatprep.mubr.msk.bf16.mxu1 %vm1942_vm2, %v1940_v0 }
  0x1b   :  { %1738 = vmatprep.subr.bf16.mxu1 %v1940_v0 }
  0x1c   :  { %1725 = vmatmul.mubr.msk.bf16.vlgmr.msra.gmra.mrb[0].mxu0 %vm167_vm5, %v86_v19 }
  0x1d   :  { %1839 = vmatpush3.bf16.msra.mxu0 %v1836_v16 }
  0x1e   :  { %1748 = vmatprep.subr.msk.mxu0 %vm338_vm6, %v331_v20  ;;  %1739 = vmatpush3.bf16.msra.mxu1 %v284_v36 }
  0x1f   :  { %1753 = vmatprep.subr.bf16.mxu1 %v1940_v0 }
  0x21   :  { %1749 = vmatpush3.msk.msra.mxu0 %vm338_vm6, %v331_v20  ;;  %1741 = vmatmul.mubr.msk.bf16.vlgmr.msra.gmra.mrb[4].mxu1 %vm167_vm5, %v86_v19 }
  0x22   :  { %1759 = vmatprep.subr.bf16.mxu0 %v1940_v0  ;;  %1755 = vmatprep.mubr.msk.bf16.mxu1 %vm1942_vm2, %v1940_v0 }
  0x23   :  { %1754 = vmatpush3.bf16.msra.mxu1 %v443_v39 }
  0x24   :  { %1842 = vmatprep.subr.msk.bf16.mxu1 %vm2173_vm9, %v1840_v43 }
  0xec   :  { %v265_v44 = vpop.f32.mrb[0].mxu1 }
  0xed   :  { %v1734_v45 = vpop.f32.mrb[1].mxu1 }
  0xee   :  { %v268_v46 = vpop.f32.mrb[2].mxu1 }
  0xef   :  { %v209_v25 = vpop.f32.mrb[0].mxu0  ;;  %v1735_v47 = vpop.f32.mrb[3].mxu1 }
  0xf0   :  { %v327_v26 = vmul.f32 %v209_v25, %v209_v25  ;;  %v1726_v27 = vpop.f32.mrb[1].mxu0 }
  0xf1   :  { %v212_v28 = vpop.f32.mrb[2].mxu0 }
  0xf2   :  { %v328_v31 = vmul.f32 %v212_v28, %v212_v28  ;;  %v500_v32 = vpack.c.bf16 %v212_v28, %v209_v25  ;;  %v1727_v33 = vpop.f32.mrb[3].mxu0  ;;  %1750 = vmatprep.mubr.msk.f32.mxu0 %vm104_vm3, %v327_v26 }
  0xf4   :  { %1751 = vmatmul.mubr.msk.f32.vlgmr.msra.gmra.mrb[4].mxu0 %vm104_vm3, %v328_v31  ;;  %v320_v6 = vpop.f32.mrb[4].mxu1 }
  0xf5   :  { %1760 = vmatpush3.bf16.msra.mxu0 %v1883_v29  ;;  %1763 = vmatprep.mubr.msk.bf16.mxu0 %vm1942_vm2, %v1940_v0  ;;  %v321_v7 = vadd.f32 %v320_v6, %v265_v44  ;;  %v1742_v8 = vpop.f32.mrb[5].mxu1 }
  0xf6   :  { %1761 = vmatprep.subr.bf16.mxu0 %v1940_v0  ;;  %v323_v9 = vpop.f32.mrb[6].mxu1 }
  0xf7   :  { %v324_v10 = vadd.f32 %v323_v9, %v268_v46  ;;  %v1743_v11 = vpop.f32.mrb[7].mxu1 }
  0xf9   :  { %1762 = vmatpush3.bf16.msra.mxu0 %v514_v34 }
  0xfa   :  { %1848 = vmatprep.subr.msk.bf16.mxu0 %vm2173_vm9, %v1840_v43 }
  0xfc   :  { %1764 = vmatmul.mubr.msk.bf16.vlgmr.msra.gmra.mrb[8].mxu0 %vm104_vm3, %v500_v32 }
  0xfd   :  { %1851 = vmatpush3.bf16.msk.msra.mxu0 %vm2173_vm9, %v1840_v43 }
 0x1c7   :  { %v1752_v48 = vpop.f32.mrb[4].mxu0 }
 0x1c8   :  { %v418_v49 = vmax.f32 %v1752_v48, 1e-08  ;;  %v408_v50 = vpop.f32.mrb[5].mxu0 }
 0x1c9   :  { %v417_v51 = vmax.f32 %v408_v50, 1e-08 }
 0x1ca   :  { %1892 = vrsqrt.f32 %v418_v49  ;;  %vm428_vm10 = vcmp.eq.f32.partialorder %v418_v49, inf  ;;  %v431_v60 = vand.u32 2147483648, %v418_v49  ;;  %vm430_vm12 = vcmp.eq.f32.partialorder %v418_v49, 0.0 }
 0x1cb   :  { %1894 = vrsqrt.f32 %v417_v51  ;;  %vm421_vm11 = vcmp.eq.f32.partialorder %v417_v51, inf  ;;  %v424_v61 = vand.u32 2147483648, %v417_v51  ;;  %vm423_vm13 = vcmp.eq.f32.partialorder %v417_v51, 0.0 }
 0x1cf   :  { %v2183_v52 = vpop.f32.mrb[8].mxu0 }
 0x1d0   :  { %v1765_v53 = vpop.f32.mrb[9].mxu0  ;;  %v557_v4 = vmul.f32 %v2183_v52, %v2183_v52 }
 0x1d1   :  { %v2185_v54 = vpop.f32.mrb[10].mxu0 }
 0x1d2   :  { %v1766_v55 = vpop.f32.mrb[11].mxu0  ;;  %v558_v5 = vmul.f32 %v2185_v54, %v2185_v54 }
 0x1d4   :  { %v1893_v56 = vpop.eup %1892 }
 0x1d5   :  { %v1895_v57 = vpop.eup %1894  ;;  %v427_v58 = vmul.f32 %v1893_v56, %v418_v49 }
 0x1d6   :  { %v420_v59 = vmul.f32 %v1895_v57, %v417_v51 }
 0x1d7   :  { %v429_v62 = vsel %vm428_vm10, %v418_v49, %v427_v58 }
 0x1d8   :  { %v422_v63 = vsel %vm421_vm11, %v417_v51, %v420_v59  ;;  %v432_v1 = vsel %vm430_vm12, %v431_v60, %v429_v62  ;;  %vm675_vm11 = vcmask 31744  }
 0x1d9   :  { %v425_v2 = vsel %vm423_vm13, %v424_v61, %v422_v63 }
 0x1da   :  { %v434_v3 = vpack.c.bf16 %v432_v1, %v425_v2 }
 0x1dc   :  { %1756 = vmatmul.mubr.msk.bf16.vlgmr.msra.gmra.mrb[8].mxu1 %vm435_vm14, %v434_v3 }
 0x1dd   :  { %1845 = vmatpush3.bf16.msk.msra.mxu1 %vm2173_vm9, %v1840_v43  ;;  %1771 = vmatprep.mubr.msk.f32.mxu1 %vm561_vm15, %v557_v4 }
 0x1de   :  { %1774 = vmatprep.subr.msk.mxu1 %vm439_vm7, %v674_v12 }
 0x1e4   :  { %1772 = vmatmul.mubr.msk.f32.vlgmr.msra.gmra.mrb[12].mxu1 %vm561_vm15, %v558_v5 }
 0x1e5   :  { %1775 = vmatpush3.msk.msra.mxu1 %vm439_vm7, %v674_v12 }
 0x1e6   :  { %1786 = vmatprep.subr.bf16.mxu1 %v1940_v0 }
 0x2af   :  { %v479_v13 = vpop.f32.mrb[8].mxu1 }
 0x2b0   :  { %v486_v15 = vadd.f32 %v479_v13, %v321_v7  ;;  %v1757_v16 = vpop.f32.mrb[9].mxu1 }
 0x2b1   :  { %v482_v17 = vpop.f32.mrb[10].mxu1 }
 0x2b2   :  { %v495_v18 = vadd.f32 %v1615_v14, %v486_v15  ;;  %v487_v19 = vadd.f32 %v482_v17, %v324_v10  ;;  %v1758_v20 = vpop.f32.mrb[11].mxu1  ;;  %v1889_v10 = vld [vmem:[%s2330_s15] sm:$0x3f]  }
 0x2b3   :  { %v922_v11 = vsel %vm171_vm4, %v1889_v10, 0  ;;  %v1237_v10 = vld [vmem:[%s2337_s20] sm:$0xff] }
 0x2b4   :  { %v496_v21 = vadd.f32 %v1615_v14, %v487_v19  ;;  %v762_v22 = vmax.f32 %v495_v18, 0.0 }
 0x2b6   :  { %v764_v23 = vmin.f32 %v762_v22, 6.0  ;;  %v763_v24 = vmax.f32 %v496_v21, 0.0 }
 0x2b7   :  { %v1773_v25 = vpop.f32.mrb[12].mxu1 }
 0x2b8   :  { %v647_v26 = vmax.f32 %v1773_v25, 1e-08  ;;  %v637_v27 = vpop.f32.mrb[13].mxu1  ;;  %v865_v28 = vsel %vm864_vm1, %v764_v23, 0.0  ;;  %v765_v29 = vmin.f32 %v763_v24, 6.0 }
 0x2b9   :  { %v646_v30 = vmax.f32 %v637_v27, 1e-08  ;;  %866 = vadd.xlane.f32.xlu1 %v865_v28  ;;  %v1890_v27 = vld [vmem:[%s2331_s14] sm:$0xff]  }
 0x2ba   :  { %1896 = vrsqrt.f32 %v647_v26  ;;  %v868_v31 = vsel %vm864_vm1, %v765_v29, 0.0  ;;  %vm657_vm3 = vcmp.eq.f32.partialorder %v647_v26, inf  ;;  %v660_v35 = vand.u32 2147483648, %v647_v26 }
 0x2bb   :  { %1898 = vrsqrt.f32 %v646_v30  ;;  %vm659_vm6 = vcmp.eq.f32.partialorder %v647_v26, 0.0  ;;  %vm650_vm8 = vcmp.eq.f32.partialorder %v646_v30, inf  ;;  %v653_v38 = vand.u32 2147483648, %v646_v30 }
 0x2bc   :  { %vm652_vm10 = vcmp.eq.f32.partialorder %v646_v30, 0.0 }
 0x2bd   :  { %869 = vadd.xlane.f32.xlu1 %v868_v31 }
 0x2c4   :  { %v1897_v32 = vpop.eup %1896 }
 0x2c5   :  { %v1899_v33 = vpop.eup %1898  ;;  %v656_v34 = vmul.f32 %v1897_v32, %v647_v26 }
 0x2c6   :  { %v649_v36 = vmul.f32 %v1899_v33, %v646_v30 }
 0x2c7   :  { %v658_v37 = vsel %vm657_vm3, %v647_v26, %v656_v34  ;;  %v1631_v34 = vld [vmem:[%s2333_s13] ss:$0 sm:$0xff] }
 0x2c8   :  { %v661_v39 = vsel %vm659_vm6, %v660_v35, %v658_v37  ;;  %v651_v40 = vsel %vm650_vm8, %v646_v30, %v649_v36  ;;  %v1630_v30 = vld [vmem:[%s2332_s12] ss:$0 sm:$0xff] }
 0x2c9   :  { %v1623_v41 = vmul.f32 -1.442695, %v661_v39  ;;  %v654_v43 = vsel %vm652_vm10, %v653_v38, %v651_v40  ;;  %v970_v39 = vld [vmem:[%s2334_s19] sm:$0xff]  ;;  %v971_v40 = vld [vmem:[%s2334_s19 + $0x8] sm:$0xf] }
 0x2ca   :  { %v1622_v44 = vmul.f32 -1.442695, %v654_v43 }
 0x2cb   :  { %1900 = vpow2.f32 %v1623_v41  ;;  %v1852_v41 = vpack.c.bf16 %v971_v40, %v970_v39 }
 0x2cc   :  { %1902 = vpow2.f32 %v1622_v44 }
 0x2cd   :  { %1854 = vmatprep.subr.msk.bf16.mxu0 %vm2173_vm9, %v1852_v41 }
 0x2d5   :  { %v1901_v45 = vpop.eup %1900 }
 0x2d6   :  { %v1903_v46 = vpop.eup %1902  ;;  %v669_v47 = vadd.f32 1.0, %v1901_v45 }
 0x2d7   :  { %v668_v48 = vadd.f32 1.0, %v1903_v46 }
 0x2d9   :  { %1904 = vrcp.f32 %v668_v48 }
 0x2da   :  { %1906 = vrcp.f32 %v669_v47 }
 0x2e3   :  { %v1905_v49 = vpop.eup %1904 }
 0x2e4   :  { %v1907_v50 = vpop.eup %1906  ;;  %1776 = vmatprep.mubr.msk.f32.mxu1 %vm675_vm11, %v1905_v49 }
 0x2e5   :  { %1777 = vmatmul.mubr.msk.f32.vlgmr.msra.gmra.mrb[14].mxu1 %vm675_vm11, %v1907_v50 }
 0x2e6   :  { %1788 = vmatprep.mubr.msk.bf16.mxu1 %vm1942_vm2, %v1940_v0  ;;  %1787 = vmatpush3.bf16.msra.mxu1 %v922_v11  ;;  %v1238_v11 = vld [vmem:[%s2337_s20 + $0x8] sm:$0xf] }
 0x2e7   :  { %1805 = vmatprep.subr.bf16.mxu1 %v1940_v0 }
 0x346   :  { %v867_v51 = vpop.xlane.xlu1 %866 }
 0x347   :  { %v872_v2 = vmul.f32 0.0625, %v867_v51 }
 0x349   :  { %v874_v6 = vsub.f32 %v764_v23, %v872_v2 }
 0x34a   :  { %v870_v53 = vpop.xlane.xlu1 %869 }
 0x34b   :  { %v873_v55 = vmul.f32 0.0625, %v870_v53  ;;  %v876_v9 = vmul.f32 %v874_v6, %v874_v6 }
 0x34d   :  { %v875_v56 = vsub.f32 %v765_v29, %v873_v55 }
 0x34f   :  { %v877_v57 = vmul.f32 %v875_v56, %v875_v56 }
 0x351   :  { %v881_v58 = vsel %vm864_vm1, %v877_v57, 0.0 }
 0x352   :  { %882 = vadd.xlane.f32.xlu1 %v881_v58 }
 0x3b8   :  { %v1778_v59 = vpop.f32.mrb[14].mxu1 }
 0x3b9   :  { %v761_v60 = vmul.f32 %v1778_v59, %v2185_v54  ;;  %v751_v61 = vpop.f32.mrb[15].mxu1 }
 0x3ba   :  { %v760_v62 = vmul.f32 %v751_v61, %v2183_v52  ;;  %v878_v52 = vsel %vm864_vm1, %v876_v9, 0.0 }
 0x3bb   :  { %v767_v1 = vmul.f32 %v761_v60, %v761_v60 }
 0x3bc   :  { %v766_v63 = vmul.f32 %v760_v62, %v760_v62 }
 0x3be   :  { %1783 = vmatprep.mubr.msk.f32.mxu0 %vm561_vm15, %v766_v63 }
 0x3bf   :  { %1784 = vmatmul.mubr.msk.f32.vlgmr.msra.gmra.mrb[6].mxu0 %vm561_vm15, %v767_v1 }
 0x3c0   :  { %1857 = vmatpush3.bf16.msk.msra.mxu0 %vm2173_vm9, %v1852_v41 }
 0x3c1   :  { %1799 = vmatprep.subr.bf16.mxu0 %v1940_v0 }
 0x3df   :  { %v883_v12 = vpop.xlane.xlu1 %882 }
 0x3e0   :  { %v885_v13 = vmul.f32 0.0625, %v883_v12  ;;  %v1858_v12 = vpack.c.bf16 %v1238_v11, %v1237_v10 }
 0x3e2   :  { %v887_v16 = vadd.f32 1e-05, %v885_v13  ;;  %v1640_v13 = vld [vmem:[%s2338_s17] ss:$0 sm:$0xff] }
 0x492   :  { %v1785_v3 = vpop.f32.mrb[6].mxu0 }
 0x493   :  { %v840_v4 = vpop.f32.mrb[7].mxu0  ;;  %v850_v7 = vmax.f32 %v1785_v3, 1e-08 }
 0x494   :  { %v849_v5 = vmax.f32 %v840_v4, 1e-08  ;;  %v1891_v4 = vld [vmem:[%s2336_s18] sm:$0x3f]  }
 0x495   :  { %v854_v54 = vsel %vm675_vm11, %v850_v7, 0.0 }
 0x496   :  { %v851_v8 = vsel %vm675_vm11, %v849_v5, 0.0 }
 0x497   :  { %852 = vadd.xlane.f32.xlu0 %v851_v8 }
 0x49b   :  { %855 = vadd.xlane.f32.xlu0 %v854_v54 }
 0x49f   :  { %879 = vadd.xlane.f32.xlu0 %v878_v52  ;;  %v1192_v52 = vsel %vm171_vm4, %v1891_v4, 0 }
 0x524   :  { %v853_v14 = vpop.xlane.xlu0 %852 }
 0x525   :  { %v858_v15 = vmul.f32 0.25, %v853_v14 }
 0x527   :  { %1908 = vrsqrt.f32 %v858_v15 }
 0x528   :  { %v856_v17 = vpop.xlane.xlu0 %855  ;;  %1910 = vrsqrt.f32 %v887_v16 }
 0x529   :  { %v859_v18 = vmul.f32 0.25, %v856_v17 }
 0x52b   :  { %1912 = vrsqrt.f32 %v859_v18 }
 0x52c   :  { %v880_v19 = vpop.xlane.xlu0 %879 }
 0x52d   :  { %v884_v20 = vmul.f32 0.0625, %v880_v19 }
 0x52f   :  { %v886_v21 = vadd.f32 1e-05, %v884_v20 }
 0x531   :  { %1914 = vrsqrt.f32 %v886_v21  ;;  %v1909_v22 = vpop.eup %1908 }
 0x532   :  { %v1911_v23 = vpop.eup %1910  ;;  %v862_v25 = vmul.f32 %v1909_v22, %v760_v62 }
 0x533   :  { %v891_v28 = vmul.f32 %v1911_v23, %v875_v56  ;;  %v1072_v56 = vld [vmem:[%s2335_s16] sm:$0x3] }
 0x534   :  { %v1078_v57 = vsel %vm108_vm0, %v1072_v56, 0 }
 0x535   :  { %v1913_v24 = vpop.eup %1912  ;;  %v900_v32 = vmul.f32 %v1630_v30, %v891_v28 }
 0x536   :  { %v863_v26 = vmul.f32 %v1913_v24, %v761_v60 }
 0x537   :  { %v909_v37 = vadd.f32 %v1631_v34, %v900_v32  ;;  %v1351_v32 = vld [vmem:[%s2339_s21] sm:$0xf]  ;;  %s1944_s21 = smov 16  }
 0x538   :  { %v912_v29 = vpack.c.bf16 %v863_v26, %v862_v25 }
 0x53a   :  { %1789 = vmatmul.mubr.msk.bf16.vlgmr.msra.gmra.mrb[16].mxu1 %vm561_vm15, %v912_v29 }
 0x53b   :  { %v1915_v31 = vpop.eup %1914  ;;  %1806 = vmatpush3.bf16.msra.mxu1 %v1890_v27  ;;  %1807 = vmatprep.mubr.msk.bf16.mxu1 %vm1942_vm2, %v1940_v0 }
 0x53c   :  { %v890_v33 = vmul.f32 %v1915_v31, %v874_v6  ;;  %1860 = vmatprep.subr.msk.bf16.mxu1 %vm2173_vm9, %v1858_v12 }
 0x53e   :  { %v899_v35 = vmul.f32 %v1630_v30, %v890_v33 }
 0x540   :  { %v908_v36 = vadd.f32 %v1631_v34, %v899_v35 }
 0x542   :  { %v967_v38 = vpack.c.bf16 %v909_v37, %v908_v36 }
 0x544   :  { %1808 = vmatmul.mubr.msk.bf16.vlgmr.msra.gmra.mrb[20].mxu1 %vm864_vm1, %v967_v38 }
 0x545   :  { %1863 = vmatpush3.bf16.msk.msra.mxu1 %vm2173_vm9, %v1858_v12 }
 0x546   :  { %1824 = vmatprep.subr.msk.mxu1 %vm439_vm7, %v1351_v32 }
 0x60d   :  { %v958_v43 = vpop.f32.mrb[16].mxu1 }
 0x60e   :  { %v968_v44 = vmul.f32 %v958_v43, %v958_v43  ;;  %v1790_v45 = vpop.f32.mrb[17].mxu1 }
 0x60f   :  { %v961_v46 = vpop.f32.mrb[18].mxu1 }
 0x610   :  { %v969_v47 = vmul.f32 %v961_v46, %v961_v46  ;;  %v1182_v48 = vpack.c.bf16 %v961_v46, %v958_v43  ;;  %v1791_v49 = vpop.f32.mrb[19].mxu1  ;;  %1796 = vmatprep.mubr.msk.f32.mxu0 %vm561_vm15, %v968_v44 }
 0x612   :  { %1797 = vmatmul.mubr.msk.f32.vlgmr.msra.gmra.mrb[12].mxu0 %vm561_vm15, %v969_v47 }
 0x613   :  { %1801 = vmatprep.mubr.msk.bf16.mxu0 %vm1942_vm2, %v1940_v0  ;;  %1800 = vmatpush3.bf16.msra.mxu0 %v1078_v57 }
 0x614   :  { %1811 = vmatprep.subr.bf16.mxu0 %v1940_v0 }
 0x617   :  { %v1164_v50 = vpop.f32.mrb[20].mxu1 }
 0x618   :  { %v1809_v51 = vpop.f32.mrb[21].mxu1 }
 0x619   :  { %v1167_v53 = vpop.f32.mrb[22].mxu1 }
 0x61a   :  { %v1810_v55 = vpop.f32.mrb[23].mxu1 }
 0x6e5   :  { %v1798_v58 = vpop.f32.mrb[12].mxu0 }
 0x6e6   :  { %v1057_v59 = vmax.f32 %v1798_v58, 1e-08  ;;  %v1047_v60 = vpop.f32.mrb[13].mxu0 }
 0x6e7   :  { %v1056_v61 = vmax.f32 %v1047_v60, 1e-08 }
 0x6e8   :  { %1916 = vrsqrt.f32 %v1057_v59  ;;  %vm1067_vm12 = vcmp.eq.f32.partialorder %v1057_v59, inf  ;;  %v1070_v3 = vand.u32 2147483648, %v1057_v59  ;;  %vm1069_vm13 = vcmp.eq.f32.partialorder %v1057_v59, 0.0 }
 0x6e9   :  { %1918 = vrsqrt.f32 %v1056_v61  ;;  %vm1060_vm0 = vcmp.eq.f32.partialorder %v1056_v61, inf  ;;  %v1063_v5 = vand.u32 2147483648, %v1056_v61  ;;  %vm1062_vm14 = vcmp.eq.f32.partialorder %v1056_v61, 0.0 }
 0x6f2   :  { %v1917_v62 = vpop.eup %1916 }
 0x6f3   :  { %v1919_v63 = vpop.eup %1918  ;;  %v1066_v1 = vmul.f32 %v1917_v62, %v1057_v59 }
 0x6f4   :  { %v1059_v2 = vmul.f32 %v1919_v63, %v1056_v61 }
 0x6f5   :  { %v1068_v6 = vsel %vm1067_vm12, %v1057_v59, %v1066_v1 }
 0x6f6   :  { %v1061_v7 = vsel %vm1060_vm0, %v1056_v61, %v1059_v2  ;;  %v1071_v8 = vsel %vm1069_vm13, %v1070_v3, %v1068_v6 }
 0x6f7   :  { %v1064_v54 = vsel %vm1062_vm14, %v1063_v5, %v1061_v7 }
 0x6f8   :  { %v1073_v9 = vpack.c.bf16 %v1071_v8, %v1064_v54 }
 0x6fa   :  { %1802 = vmatmul.mubr.msk.bf16.vlgmr.msra.gmra.mrb[16].mxu0 %vm675_vm11, %v1073_v9 }
 0x6fb   :  { %1812 = vmatpush3.bf16.msra.mxu0 %v1192_v52  ;;  %1813 = vmatprep.mubr.msk.bf16.mxu0 %vm1942_vm2, %v1940_v0 }
 0x6fc   :  { %1866 = vmatprep.subr.msk.bf16.mxu0 %vm2173_vm9, %v1858_v12 }
 0x702   :  { %1814 = vmatmul.mubr.msk.bf16.vlgmr.msra.gmra.mrb[20].mxu0 %vm561_vm15, %v1182_v48 }
 0x703   :  { %1869 = vmatpush3.bf16.msk.msra.mxu0 %vm2173_vm9, %v1858_v12 }
 0x7cd   :  { %v1114_v0 = vpop.f32.mrb[16].mxu0 }
 0x7ce   :  { %v1165_v14 = vadd.f32 %v1164_v50, %v1114_v0  ;;  %v1803_v15 = vpop.f32.mrb[17].mxu0 }
 0x7cf   :  { %v1117_v16 = vpop.f32.mrb[18].mxu0 }
 0x7d0   :  { %v1178_v17 = vadd.f32 %v1640_v13, %v1165_v14  ;;  %v1168_v18 = vadd.f32 %v1167_v53, %v1117_v16  ;;  %v1804_v19 = vpop.f32.mrb[19].mxu0 }
 0x7d2   :  { %v1179_v20 = vadd.f32 %v1640_v13, %v1168_v18  ;;  %v1438_v21 = vmax.f32 %v1178_v17, 0.0 }
 0x7d4   :  { %v2281_v22 = vmin.f32 %v1438_v21, 6.0  ;;  %v1439_v23 = vmax.f32 %v1179_v20, 0.0 }
 0x7d5   :  { %v1228_v24 = vpop.f32.mrb[20].mxu0 }
 0x7d6   :  { %v1235_v25 = vmul.f32 %v1228_v24, %v1228_v24  ;;  %v1815_v42 = vpop.f32.mrb[21].mxu0  ;;  %v1539_v26 = vsel %vm864_vm1, %v2281_v22, 0.0  ;;  %v1441_v27 = vmin.f32 %v1439_v23, 6.0 }
 0x7d7   :  { %v1231_v28 = vpop.f32.mrb[22].mxu0  ;;  %1540 = vadd.xlane.f32.xlu0 %v1539_v26 }
 0x7d8   :  { %v1236_v29 = vmul.f32 %v1231_v28, %v1231_v28  ;;  %v1816_v30 = vpop.f32.mrb[23].mxu0  ;;  %1821 = vmatprep.mubr.msk.f32.mxu1 %vm561_vm15, %v1235_v25  ;;  %v1542_v31 = vsel %vm864_vm1, %v1441_v27, 0.0 }
 0x7d9   :  { %1543 = vadd.xlane.f32.xlu1 %v1542_v31  ;;  %v1654_v30 = vld [vmem:[%s2340_s22] ss:$0 sm:$0xff] }
 0x7da   :  { %1822 = vmatmul.mubr.msk.f32.vlgmr.msra.gmra.mrb[24].mxu1 %vm561_vm15, %v1236_v29 }
 0x7db   :  { %1825 = vmatpush3.msk.msra.mxu1 %vm439_vm7, %v1351_v32 }
 0x864   :  { %v1541_v2 = vpop.xlane.xlu0 %1540 }
 0x865   :  { %v1545_v4 = vmul.f32 0.0625, %v1541_v2 }
 0x866   :  { %v1544_v1 = vpop.xlane.xlu1 %1543 }
 0x867   :  { %v1546_v3 = vmul.f32 0.0625, %v1544_v1  ;;  %v1547_v6 = vsub.f32 %v2281_v22, %v1545_v4 }
 0x869   :  { %v1548_v5 = vsub.f32 %v1441_v27, %v1546_v3  ;;  %v1549_v12 = vmul.f32 %v1547_v6, %v1547_v6 }
 0x86b   :  { %v1550_v10 = vmul.f32 %v1548_v5, %v1548_v5  ;;  %v1551_v13 = vsel %vm864_vm1, %v1549_v12, 0.0 }
 0x86d   :  { %v1554_v0 = vsel %vm864_vm1, %v1550_v10, 0.0 }
 0x8ad   :  { %v1823_v33 = vpop.f32.mrb[24].mxu1 }
 0x8ae   :  { %v1324_v34 = vmax.f32 %v1823_v33, 1e-08  ;;  %v1314_v35 = vpop.f32.mrb[25].mxu1  ;;  %v1655_v33 = vld [vmem:[%s2341_s23] ss:$0 sm:$0xff] }
 0x8af   :  { %v1323_v36 = vmax.f32 %v1314_v35, 1e-08 }
 0x8b0   :  { %1920 = vrsqrt.f32 %v1324_v34  ;;  %vm1334_vm2 = vcmp.eq.f32.partialorder %v1324_v34, inf  ;;  %v1337_v40 = vand.u32 2147483648, %v1324_v34  ;;  %vm1336_vm4 = vcmp.eq.f32.partialorder %v1324_v34, 0.0 }
 0x8b1   :  { %1922 = vrsqrt.f32 %v1323_v36  ;;  %vm1327_vm9 = vcmp.eq.f32.partialorder %v1323_v36, inf  ;;  %v1330_v44 = vand.u32 2147483648, %v1323_v36  ;;  %vm1329_vm3 = vcmp.eq.f32.partialorder %v1323_v36, 0.0 }
 0x8ba   :  { %v1921_v37 = vpop.eup %1920 }
 0x8bb   :  { %v1923_v38 = vpop.eup %1922  ;;  %v1333_v39 = vmul.f32 %v1921_v37, %v1324_v34 }
 0x8bc   :  { %v1326_v41 = vmul.f32 %v1923_v38, %v1323_v36 }
 0x8bd   :  { %v1335_v43 = vsel %vm1334_vm2, %v1324_v34, %v1333_v39 }
 0x8be   :  { %v1338_v45 = vsel %vm1336_vm4, %v1337_v40, %v1335_v43  ;;  %v1328_v46 = vsel %vm1327_vm9, %v1323_v36, %v1326_v41 }
 0x8bf   :  { %v1647_v47 = vmul.f32 -1.442695, %v1338_v45  ;;  %v1331_v48 = vsel %vm1329_vm3, %v1330_v44, %v1328_v46 }
 0x8c0   :  { %v1646_v49 = vmul.f32 -1.442695, %v1331_v48 }
 0x8c1   :  { %1924 = vpow2.f32 %v1647_v47 }
 0x8c2   :  { %1926 = vpow2.f32 %v1646_v49 }
 0x8cb   :  { %v1925_v50 = vpop.eup %1924 }
 0x8cc   :  { %v1927_v51 = vpop.eup %1926  ;;  %v1346_v53 = vadd.f32 1.0, %v1925_v50 }
 0x8cd   :  { %v1345_v55 = vadd.f32 1.0, %v1927_v51 }
 0x8cf   :  { %1928 = vrcp.f32 %v1345_v55 }
 0x8d0   :  { %1930 = vrcp.f32 %v1346_v53 }
 0x8d9   :  { %v1929_v56 = vpop.eup %1928 }
 0x8da   :  { %v1931_v57 = vpop.eup %1930  ;;  %1826 = vmatprep.mubr.msk.f32.mxu1 %vm675_vm11, %v1929_v56 }
 0x8db   :  { %1827 = vmatmul.mubr.msk.f32.vlgmr.msra.gmra.mrb[26].mxu1 %vm675_vm11, %v1931_v57 }
 0x9ae   :  { %v1828_v58 = vpop.f32.mrb[26].mxu1 }
 0x9af   :  { %v1437_v59 = vmul.f32 %v1828_v58, %v1231_v28  ;;  %v1427_v60 = vpop.f32.mrb[27].mxu1 }
 0x9b0   :  { %v1436_v61 = vmul.f32 %v1427_v60, %v1228_v24 }
 0x9b1   :  { %v1443_v63 = vmul.f32 %v1437_v59, %v1437_v59 }
 0x9b2   :  { %v1442_v62 = vmul.f32 %v1436_v61, %v1436_v61 }
 0x9b4   :  { %1833 = vmatprep.mubr.msk.f32.mxu0 %vm561_vm15, %v1442_v62 }
 0x9b5   :  { %1834 = vmatmul.mubr.msk.f32.vlgmr.msra.gmra.mrb[14].mxu0 %vm561_vm15, %v1443_v63 }
 0xa88   :  { %v1835_v7 = vpop.f32.mrb[14].mxu0 }
 0xa89   :  { %v1526_v8 = vmax.f32 %v1835_v7, 1e-08  ;;  %v1516_v54 = vpop.f32.mrb[15].mxu0 }
 0xa8a   :  { %v1525_v9 = vmax.f32 %v1516_v54, 1e-08 }
 0xa8b   :  { %v1530_v52 = vsel %vm675_vm11, %v1526_v8, 0.0 }
 0xa8c   :  { %1531 = vadd.xlane.f32.xlu1 %v1530_v52  ;;  %v1527_v11 = vsel %vm675_vm11, %v1525_v9, 0.0 }
 0xa8d   :  { %1528 = vadd.xlane.f32.xlu0 %v1527_v11 }
 0xa90   :  { %1555 = vadd.xlane.f32.xlu1 %v1554_v0 }
 0xa91   :  { %1552 = vadd.xlane.f32.xlu0 %v1551_v13 }
 0xb19   :  { %v1532_v14 = vpop.xlane.xlu1 %1531 }
 0xb1a   :  { %v1534_v15 = vmul.f32 0.25, %v1532_v14  ;;  %v1529_v16 = vpop.xlane.xlu0 %1528 }
 0xb1b   :  { %v1533_v17 = vmul.f32 0.25, %v1529_v16 }
 0xb1c   :  { %1932 = vrsqrt.f32 %v1534_v15 }
 0xb1d   :  { %1934 = vrsqrt.f32 %v1533_v17  ;;  %v1556_v22 = vpop.xlane.xlu1 %1555 }
 0xb1e   :  { %v1553_v23 = vpop.xlane.xlu0 %1552  ;;  %v1558_v24 = vmul.f32 0.0625, %v1556_v22 }
 0xb1f   :  { %v1557_v25 = vmul.f32 0.0625, %v1553_v23 }
 0xb20   :  { %v1560_v42 = vadd.f32 1e-05, %v1558_v24 }
 0xb21   :  { %v1559_v26 = vadd.f32 1e-05, %v1557_v25 }
 0xb22   :  { %1936 = vrsqrt.f32 %v1560_v42 }
 0xb23   :  { %1938 = vrsqrt.f32 %v1559_v26 }
 0xb26   :  { %v1933_v18 = vpop.eup %1932 }
 0xb27   :  { %v1935_v19 = vpop.eup %1934  ;;  %v1538_v20 = vmul.f32 %v1933_v18, %v1437_v59 }
 0xb28   :  { %v1537_v21 = vmul.f32 %v1935_v19, %v1436_v61 }
 0xb29   :  { %1587 = vrot.lane.b32.xlu1 %v1538_v20, %s1944_s21 }
 0xb2a   :  { %1585 = vrot.lane.b32.xlu0 %v1537_v21, %s1944_s21 }
 0xb2c   :  { %v1937_v27 = vpop.eup %1936 }
 0xb2d   :  { %v1939_v28 = vpop.eup %1938  ;;  %v1564_v29 = vmul.f32 %v1937_v27, %v1548_v5 }
 0xb2e   :  { %v1563_v31 = vmul.f32 %v1939_v28, %v1547_v6 }
 0xb2f   :  { %v1573_v32 = vmul.f32 %v1654_v30, %v1564_v29 }
 0xb30   :  { %v1572_v34 = vmul.f32 %v1654_v30, %v1563_v31 }
 0xb31   :  { %v1582_v35 = vadd.f32 %v1655_v33, %v1573_v32 }
 0xb32   :  { %v1581_v37 = vadd.f32 %v1655_v33, %v1572_v34 }
 0xb9b   :  { %v1588_v36 = vpop.permute.xlu1 %1587 }
 0xb9c   :  { %v1592_v38 = vsel %vm864_vm1, %v1582_v35, %v1588_v36  ;;  %v1586_v39 = vpop.permute.xlu0 %1585 }
 0xb9d   :  { %1594 = vst.msk [vmem:[%s2342_s24 + $0x8] sm:$0xff] %vm167_vm5, %v1592_v38  ;;  %v1591_v40 = vsel %vm864_vm1, %v1581_v37, %v1586_v39 }
 0xb9e   :  { %1593 = vst.msk [vmem:[%s2342_s24] sm:$0xff] %vm167_vm5, %v1591_v40 }

</bundles_post_ra>
